<compile_context>
chip_gen: v7x
topology: tpu7x:2x2x1
jax: 0.10.0
libtpu: 0.0.40
codegen_flags: <defaults>
</compile_context>

<pallas_src>
import jax
import jax.numpy as jnp
from jax import lax
from jax.experimental import pallas as pl
from jax.experimental.pallas import tpu as pltpu


def _choose_batch_tile(n, lq, target_m=256, max_m=2048):
    """Pick a batch tile that makes the folded matmul M-dim (= tile*Lq) MXU-dense
    while keeping >= 2 parallel grid steps when the batch allows (megacore / v7x)."""
    divisors = [d for d in range(1, n + 1) if n % d == 0 and d * lq <= max_m]
    if not divisors:
        return 1
    dense = [d for d in divisors if d * lq >= target_m and n // d >= 2]
    if dense:
        return min(dense)
    parallel = [d for d in divisors if n // d >= 2]
    if parallel:
        return max(parallel)
    return max(divisors)


def _make_kernel(batch_tile, heads, head_dim, lq, lk, lv, inv_scale):
    embed = heads * head_dim
    bf16 = jnp.bfloat16
    f32 = jnp.float32

    def kernel(xq_ref, xk_ref, xv_ref, wqT_ref, wkT_ref, wvT_ref, woT_ref,
               out_ref, attn_ref, o_scratch):
        # Fold batch into the M dim so the E-wide matmuls are MXU-dense.
        xq = xq_ref[...].reshape(batch_tile * lq, embed).astype(bf16)
        xk = xk_ref[...].reshape(batch_tile * lk, embed).astype(bf16)
        xv = xv_ref[...].reshape(batch_tile * lv, embed).astype(bf16)

        # Weights arrive pre-transposed and already bf16 (one-time cast in the wrapper).
        # Full-width projections once per grid step; fuse 1/sqrt(E) into q.
        q = (jnp.dot(xq, wqT_ref[...], preferred_element_type=f32)
             * inv_scale).astype(bf16)                                      # (M, E)
        k = jnp.dot(xk, wkT_ref[...], preferred_element_type=f32).astype(bf16)
        v = jnp.dot(xv, wvT_ref[...], preferred_element_type=f32).astype(bf16)

        # Fused per-(batch, head) attention: energy -> softmax -> attn @ v_h.
        # Static unroll; no stack/concatenate; AV results go straight into a bf16
        # VMEM slab so fc_out is a single full-width matmul afterwards.
        dn = (((1,), (1,)), ((), ()))   # contract last dims: no in-kernel transpose
        for b in range(batch_tile):
            q_b = q[b * lq:(b + 1) * lq]
            k_b = k[b * lk:(b + 1) * lk]
            v_b = v[b * lv:(b + 1) * lv]
            for h in range(heads):
                sl = slice(h * head_dim, (h + 1) * head_dim)   # static lane-aligned slice
                energy = lax.dot_general(q_b[:, sl], k_b[:, sl], dn,
                                         preferred_element_type=f32)        # (Lq, Lk)
                m = jnp.max(energy, axis=-1, keepdims=True)
                p = jnp.exp(energy - m)
                s = jnp.sum(p, axis=-1, keepdims=True)
                attn = p * (1.0 / s)   # exact normalization: returned rows sum to 1
                attn_ref[b, h] = attn.astype(attn_ref.dtype)
                o_scratch[b * lq:(b + 1) * lq, sl] = jnp.dot(
                    attn.astype(bf16), v_b[:, sl],
                    preferred_element_type=f32).astype(bf16)

        # ONE full-width fc_out matmul over all batch_tile*Lq rows.
        out = jnp.dot(o_scratch[...], woT_ref[...], preferred_element_type=f32)
        out_ref[...] = out.reshape(batch_tile, lq, embed).astype(out_ref.dtype)

    return kernel


def attention_forward(query, keys, values, wq, wk, wv, wo, heads, *,
                      batch_tile=None, attn_dtype=jnp.float32):
    """Pallas Attention.forward (attn_mask=None, key_padding_mask=None).

    query/keys/values: (N, L, E) float32
    wq/wk/wv/wo:       (E, E) float32 (nn.Linear layout: out x in, no bias)
    Returns (out, attention): out (N, Lq, E) f32, attention (N, heads, Lq, Lk).
    Dropout at inference is the identity.
    """
    N, Lq, E = query.shape
    Lk = keys.shape[1]
    Lv = values.shape[1]
    assert Lk == Lv, "attention @ values requires key_len == value_len"
    head_dim = E // heads
    assert head_dim * heads == E, "embed_dim must be divisible by heads"

    inv_scale = 1.0 / (float(E) ** 0.5)   # module scales by sqrt(embed_dim), not head_dim

    if batch_tile is None:
        batch_tile = _choose_batch_tile(N, Lq)
    assert N % batch_tile == 0
    n_steps = N // batch_tile

    # One-time transpose + bf16 cast in the wrapper: the kernel never transposes or
    # re-casts weights; weight DMA bytes and resident VMEM are halved.
    wq_t = wq.T.astype(jnp.bfloat16)
    wk_t = wk.T.astype(jnp.bfloat16)
    wv_t = wv.T.astype(jnp.bfloat16)
    wo_t = wo.T.astype(jnp.bfloat16)

    out_shape = (
        jax.ShapeDtypeStruct((N, Lq, E), jnp.float32),
        # attn_dtype=jnp.bfloat16 halves the dominant HBM writeback at production L.
        jax.ShapeDtypeStruct((N, heads, Lq, Lk), attn_dtype),
    )

    kernel = _make_kernel(batch_tile, heads, head_dim, Lq, Lk, Lv, inv_scale)

    def build(weight_pipeline_mode):
        w_kwargs = {} if weight_pipeline_mode is None else {
            "pipeline_mode": weight_pipeline_mode}
        w_spec = pl.BlockSpec((E, E), lambda b: (0, 0), **w_kwargs)
        in_specs = [
            pl.BlockSpec((batch_tile, Lq, E), lambda b: (b, 0, 0)),   # query
            pl.BlockSpec((batch_tile, Lk, E), lambda b: (b, 0, 0)),   # keys
            pl.BlockSpec((batch_tile, Lv, E), lambda b: (b, 0, 0)),   # values
            w_spec, w_spec, w_spec, w_spec,   # Wq.T Wk.T Wv.T Wo.T (bf16, resident)
        ]
        out_specs = (
            pl.BlockSpec((batch_tile, Lq, E), lambda b: (b, 0, 0)),   # lane-dense E
            # TODO(synk): when Lk < 128, pad Lk to 128 (or emit (N, Lq, heads*Lk)) for
            # lane-dense attention stores; irrelevant once production Lk >= 128.
            pl.BlockSpec((batch_tile, heads, Lq, Lk), lambda b: (b, 0, 0, 0)),
        )
        return pl.pallas_call(
            kernel,
            out_shape=out_shape,
            grid_spec=pltpu.PrefetchScalarGridSpec(
                num_scalar_prefetch=0,
                grid=(n_steps,),
                in_specs=in_specs,
                out_specs=out_specs,
                scratch_shapes=[pltpu.VMEM((batch_tile * Lq, E), jnp.bfloat16)],
            ),
            compiler_params=pltpu.CompilerParams(
                dimension_semantics=("parallel",),
                # Raise v5e's 16 MiB / v6e's 32 MiB scoped default; within v7x physical.
                vmem_limit_bytes=64 * 1024 * 1024,
            ),
        )

    args = (query, keys, values, wq_t, wk_t, wv_t, wo_t)
    try:
        # Weights keep the same block every grid step -> single-buffer them.
        out, attn = build(pl.Buffered(1))(*args)
    except Exception:
        # Fallback if this JAX build rejects pipeline_mode on pallas_call BlockSpecs.
        out, attn = build(None)(*args)

    return out, attn


def _reference(query, keys, values, wq, wk, wv, wo, heads):
    """Plain-JAX f32 reference mirroring the PyTorch forward (mask-free path)."""
    N, Lq, E = query.shape
    hd = E // heads
    v = (values @ wv.T).reshape(N, -1, heads, hd)
    k = (keys @ wk.T).reshape(N, -1, heads, hd)
    q = (query @ wq.T).reshape(N, -1, heads, hd)
    energy = jnp.einsum("nqhd,nkhd->nhqk", q, k) / (E ** 0.5)
    attn = jax.nn.softmax(energy, axis=3)
    out = jnp.einsum("nhql,nlhd->nqhd", attn, v).reshape(N, Lq, E)
    out = out @ wo.T
    return out, attn


if __name__ == "__main__":
    # Small, TPU-friendly shapes: head_dim = 128 (lane-aligned), E multiple of 128,
    # L multiple of 8; N=4 so batch_tile=2 folds batch into M while still leaving
    # 2 parallel grid steps for megacore / v7x dual-TC sharding.
    N, L, E, heads = 4, 16, 256, 2

    key = jax.random.PRNGKey(0)
    k0, k1, k2, k3, k4, k5, k6 = jax.random.split(key, 7)

    query = jax.random.normal(k0, (N, L, E), dtype=jnp.float32)
    keys = jax.random.normal(k1, (N, L, E), dtype=jnp.float32)
    values = jax.random.normal(k2, (N, L, E), dtype=jnp.float32)

    # Deterministic parameter init (nn.Linear weight shape: (out, in), no bias).
    wq = jax.random.normal(k3, (E, E), dtype=jnp.float32) * (1.0 / jnp.sqrt(E))
    wk = jax.random.normal(k4, (E, E), dtype=jnp.float32) * (1.0 / jnp.sqrt(E))
    wv = jax.random.normal(k5, (E, E), dtype=jnp.float32) * (1.0 / jnp.sqrt(E))
    wo = jax.random.normal(k6, (E, E), dtype=jnp.float32) * (1.0 / jnp.sqrt(E))

    out, attn = attention_forward(query, keys, values, wq, wk, wv, wo, heads)
    out = jax.block_until_ready(out)
    attn = jax.block_until_ready(attn)

    ref_out, ref_attn = _reference(query, keys, values, wq, wk, wv, wo, heads)

    # bf16 MXU operands (weights + activations) -> loosen tolerances vs the f32 reference.
    assert jnp.allclose(out, ref_out, atol=5e-2, rtol=5e-2), "output mismatch"
    assert jnp.allclose(attn, ref_attn, atol=1e-2, rtol=1e-2), "attention mismatch"

    print("KERNEL_OK")
</pallas_src>

<mosaic_0001>
module attributes {stable_mosaic.version = 11 : i64} {
  func.func @kernel(%arg0: i32, %arg1: memref<2x16x256xf32, #tpu.memory_space<vmem>>, %arg2: memref<2x16x256xf32, #tpu.memory_space<vmem>>, %arg3: memref<2x16x256xf32, #tpu.memory_space<vmem>>, %arg4: memref<256x256xbf16, #tpu.memory_space<vmem>>, %arg5: memref<256x256xbf16, #tpu.memory_space<vmem>>, %arg6: memref<256x256xbf16, #tpu.memory_space<vmem>>, %arg7: memref<256x256xbf16, #tpu.memory_space<vmem>>, %arg8: memref<2x16x256xf32, #tpu.memory_space<vmem>>, %arg9: memref<2x2x16x16xf32, #tpu.memory_space<vmem>>, %arg10: memref<32x256xbf16, #tpu.memory_space<vmem>>) attributes {dimension_semantics = [#tpu.dimension_semantics<parallel>], iteration_bounds = array<i64: 2>, scalar_prefetch = 0 : i64, scratch_operands = 1 : i64, tpu.core_type = #tpu.core_type<tc>, window_params = [{transform_indices = @transform_0, window_bounds = array<i64: 2, 16, 256>}, {transform_indices = @transform_1, window_bounds = array<i64: 2, 16, 256>}, {transform_indices = @transform_2, window_bounds = array<i64: 2, 16, 256>}, {pipeline_mode = #tpu.pipeline_mode<synchronous>, transform_indices = @transform_3, window_bounds = array<i64: 256, 256>}, {pipeline_mode = #tpu.pipeline_mode<synchronous>, transform_indices = @transform_4, window_bounds = array<i64: 256, 256>}, {pipeline_mode = #tpu.pipeline_mode<synchronous>, transform_indices = @transform_5, window_bounds = array<i64: 256, 256>}, {pipeline_mode = #tpu.pipeline_mode<synchronous>, transform_indices = @transform_6, window_bounds = array<i64: 256, 256>}, {transform_indices = @transform_7, window_bounds = array<i64: 2, 16, 256>}, {transform_indices = @transform_8, window_bounds = array<i64: 2, 2, 16, 16>}]} {
    %c0 = arith.constant 0 : index
    %c0_0 = arith.constant 0 : index
    %c0_1 = arith.constant 0 : index
    %0 = vector.load %arg1[%c0, %c0_0, %c0_1] : memref<2x16x256xf32, #tpu.memory_space<vmem>>, vector<2x16x256xf32>
    %1 = vector.shape_cast %0 : vector<2x16x256xf32> to vector<32x256xf32>
    %2 = arith.truncf %1 : vector<32x256xf32> to vector<32x256xbf16>
    %c0_2 = arith.constant 0 : index
    %c0_3 = arith.constant 0 : index
    %c0_4 = arith.constant 0 : index
    %3 = vector.load %arg2[%c0_2, %c0_3, %c0_4] : memref<2x16x256xf32, #tpu.memory_space<vmem>>, vector<2x16x256xf32>
    %4 = vector.shape_cast %3 : vector<2x16x256xf32> to vector<32x256xf32>
    %5 = arith.truncf %4 : vector<32x256xf32> to vector<32x256xbf16>
    %c0_5 = arith.constant 0 : index
    %c0_6 = arith.constant 0 : index
    %c0_7 = arith.constant 0 : index
    %6 = vector.load %arg3[%c0_5, %c0_6, %c0_7] : memref<2x16x256xf32, #tpu.memory_space<vmem>>, vector<2x16x256xf32>
    %7 = vector.shape_cast %6 : vector<2x16x256xf32> to vector<32x256xf32>
    %8 = arith.truncf %7 : vector<32x256xf32> to vector<32x256xbf16>
    %c0_8 = arith.constant 0 : index
    %c0_9 = arith.constant 0 : index
    %9 = vector.load %arg4[%c0_8, %c0_9] : memref<256x256xbf16, #tpu.memory_space<vmem>>, vector<256x256xbf16>
    %cst = arith.constant dense<0.000000e+00> : vector<32x256xf32>
    %10 = tpu.matmul %2, %9, %cst {dimension_numbers = #tpu.dot_dimension_numbers<[1], [0], [0], [1], [0, 0, 1, 1], [], []>} : vector<32x256xbf16>, vector<256x256xbf16>, vector<32x256xf32> -> vector<32x256xf32>
    %cst_10 = arith.constant 6.250000e-02 : f32
    %11 = vector.broadcast %cst_10 : f32 to vector<32x256xf32>
    %12 = arith.mulf %10, %11 : vector<32x256xf32>
    %13 = arith.truncf %12 : vector<32x256xf32> to vector<32x256xbf16>
    %c0_11 = arith.constant 0 : index
    %c0_12 = arith.constant 0 : index
    %14 = vector.load %arg5[%c0_11, %c0_12] : memref<256x256xbf16, #tpu.memory_space<vmem>>, vector<256x256xbf16>
    %cst_13 = arith.constant dense<0.000000e+00> : vector<32x256xf32>
    %15 = tpu.matmul %5, %14, %cst_13 {dimension_numbers = #tpu.dot_dimension_numbers<[1], [0], [0], [1], [0, 0, 1, 1], [], []>} : vector<32x256xbf16>, vector<256x256xbf16>, vector<32x256xf32> -> vector<32x256xf32>
    %16 = arith.truncf %15 : vector<32x256xf32> to vector<32x256xbf16>
    %c0_14 = arith.constant 0 : index
    %c0_15 = arith.constant 0 : index
    %17 = vector.load %arg6[%c0_14, %c0_15] : memref<256x256xbf16, #tpu.memory_space<vmem>>, vector<256x256xbf16>
    %cst_16 = arith.constant dense<0.000000e+00> : vector<32x256xf32>
    %18 = tpu.matmul %8, %17, %cst_16 {dimension_numbers = #tpu.dot_dimension_numbers<[1], [0], [0], [1], [0, 0, 1, 1], [], []>} : vector<32x256xbf16>, vector<256x256xbf16>, vector<32x256xf32> -> vector<32x256xf32>
    %19 = arith.truncf %18 : vector<32x256xf32> to vector<32x256xbf16>
    %20 = vector.extract_strided_slice %13 {offsets = [0, 0], sizes = [16, 256], strides = [1, 1]} : vector<32x256xbf16> to vector<16x256xbf16>
    %21 = vector.extract_strided_slice %16 {offsets = [0, 0], sizes = [16, 256], strides = [1, 1]} : vector<32x256xbf16> to vector<16x256xbf16>
    %22 = vector.extract_strided_slice %19 {offsets = [0, 0], sizes = [16, 256], strides = [1, 1]} : vector<32x256xbf16> to vector<16x256xbf16>
    %23 = vector.extract_strided_slice %20 {offsets = [0, 0], sizes = [16, 128], strides = [1, 1]} : vector<16x256xbf16> to vector<16x128xbf16>
    %24 = vector.extract_strided_slice %21 {offsets = [0, 0], sizes = [16, 128], strides = [1, 1]} : vector<16x256xbf16> to vector<16x128xbf16>
    %cst_17 = arith.constant dense<0.000000e+00> : vector<16x16xf32>
    %25 = tpu.matmul %23, %24, %cst_17 {dimension_numbers = #tpu.dot_dimension_numbers<[1], [1], [0], [0], [0, 0, 1, 0], [], []>} : vector<16x128xbf16>, vector<16x128xbf16>, vector<16x16xf32> -> vector<16x16xf32>
    %cst_18 = arith.constant dense<0xFF800000> : vector<16xf32>
    %26 = vector.multi_reduction <maximumf>, %25, %cst_18 [1] : vector<16x16xf32> to vector<16xf32>
    %27 = vector.shape_cast %26 : vector<16xf32> to vector<16x1xf32>
    %28 = vector.broadcast %27 : vector<16x1xf32> to vector<16x16xf32>
    %29 = arith.subf %25, %28 : vector<16x16xf32>
    %30 = math.exp %29 : vector<16x16xf32>
    %cst_19 = arith.constant dense<0.000000e+00> : vector<16xf32>
    %31 = vector.multi_reduction <add>, %30, %cst_19 [1] : vector<16x16xf32> to vector<16xf32>
    %32 = vector.shape_cast %31 : vector<16xf32> to vector<16x1xf32>
    %cst_20 = arith.constant 1.000000e+00 : f32
    %33 = vector.broadcast %cst_20 : f32 to vector<16x1xf32>
    %34 = arith.divf %33, %32 : vector<16x1xf32>
    %35 = vector.broadcast %34 : vector<16x1xf32> to vector<16x16xf32>
    %36 = arith.mulf %30, %35 : vector<16x16xf32>
    %c0_21 = arith.constant 0 : index
    %c0_22 = arith.constant 0 : index
    %c0_23 = arith.constant 0 : index
    %c0_24 = arith.constant 0 : index
    %37 = vector.load %arg9[%c0_21, %c0_22, %c0_23, %c0_24] : memref<2x2x16x16xf32, #tpu.memory_space<vmem>>, vector<1x1x16x16xf32>
    %38 = vector.shape_cast %37 : vector<1x1x16x16xf32> to vector<16x16xf32>
    %39 = vector.shape_cast %36 : vector<16x16xf32> to vector<1x1x16x16xf32>
    tpu.vector_store %arg9[%c0_21, %c0_22, %c0_23, %c0_24], %39 {strides = array<i32>} : memref<2x2x16x16xf32, #tpu.memory_space<vmem>>, vector<1x1x16x16xf32>,
    %40 = arith.truncf %36 : vector<16x16xf32> to vector<16x16xbf16>
    %41 = vector.extract_strided_slice %22 {offsets = [0, 0], sizes = [16, 128], strides = [1, 1]} : vector<16x256xbf16> to vector<16x128xbf16>
    %cst_25 = arith.constant dense<0.000000e+00> : vector<16x128xf32>
    %42 = tpu.matmul %40, %41, %cst_25 {dimension_numbers = #tpu.dot_dimension_numbers<[1], [0], [0], [1], [0, 0, 1, 1], [], []>} : vector<16x16xbf16>, vector<16x128xbf16>, vector<16x128xf32> -> vector<16x128xf32>
    %43 = arith.truncf %42 : vector<16x128xf32> to vector<16x128xbf16>
    %c0_26 = arith.constant 0 : index
    %c0_27 = arith.constant 0 : index
    %44 = vector.load %arg10[%c0_26, %c0_27] : memref<32x256xbf16, #tpu.memory_space<vmem>>, vector<16x128xbf16>
    tpu.vector_store %arg10[%c0_26, %c0_27], %43 {strides = array<i32>} : memref<32x256xbf16, #tpu.memory_space<vmem>>, vector<16x128xbf16>,
    %45 = vector.extract_strided_slice %20 {offsets = [0, 128], sizes = [16, 128], strides = [1, 1]} : vector<16x256xbf16> to vector<16x128xbf16>
    %46 = vector.extract_strided_slice %21 {offsets = [0, 128], sizes = [16, 128], strides = [1, 1]} : vector<16x256xbf16> to vector<16x128xbf16>
    %cst_28 = arith.constant dense<0.000000e+00> : vector<16x16xf32>
    %47 = tpu.matmul %45, %46, %cst_28 {dimension_numbers = #tpu.dot_dimension_numbers<[1], [1], [0], [0], [0, 0, 1, 0], [], []>} : vector<16x128xbf16>, vector<16x128xbf16>, vector<16x16xf32> -> vector<16x16xf32>
    %cst_29 = arith.constant dense<0xFF800000> : vector<16xf32>
    %48 = vector.multi_reduction <maximumf>, %47, %cst_29 [1] : vector<16x16xf32> to vector<16xf32>
    %49 = vector.shape_cast %48 : vector<16xf32> to vector<16x1xf32>
    %50 = vector.broadcast %49 : vector<16x1xf32> to vector<16x16xf32>
    %51 = arith.subf %47, %50 : vector<16x16xf32>
    %52 = math.exp %51 : vector<16x16xf32>
    %cst_30 = arith.constant dense<0.000000e+00> : vector<16xf32>
    %53 = vector.multi_reduction <add>, %52, %cst_30 [1] : vector<16x16xf32> to vector<16xf32>
    %54 = vector.shape_cast %53 : vector<16xf32> to vector<16x1xf32>
    %cst_31 = arith.constant 1.000000e+00 : f32
    %55 = vector.broadcast %cst_31 : f32 to vector<16x1xf32>
    %56 = arith.divf %55, %54 : vector<16x1xf32>
    %57 = vector.broadcast %56 : vector<16x1xf32> to vector<16x16xf32>
    %58 = arith.mulf %52, %57 : vector<16x16xf32>
    %c0_32 = arith.constant 0 : index
    %c1 = arith.constant 1 : index
    %c0_33 = arith.constant 0 : index
    %c0_34 = arith.constant 0 : index
    %59 = vector.load %arg9[%c0_32, %c1, %c0_33, %c0_34] : memref<2x2x16x16xf32, #tpu.memory_space<vmem>>, vector<1x1x16x16xf32>
    %60 = vector.shape_cast %59 : vector<1x1x16x16xf32> to vector<16x16xf32>
    %61 = vector.shape_cast %58 : vector<16x16xf32> to vector<1x1x16x16xf32>
    tpu.vector_store %arg9[%c0_32, %c1, %c0_33, %c0_34], %61 {strides = array<i32>} : memref<2x2x16x16xf32, #tpu.memory_space<vmem>>, vector<1x1x16x16xf32>,
    %62 = arith.truncf %58 : vector<16x16xf32> to vector<16x16xbf16>
    %63 = vector.extract_strided_slice %22 {offsets = [0, 128], sizes = [16, 128], strides = [1, 1]} : vector<16x256xbf16> to vector<16x128xbf16>
    %cst_35 = arith.constant dense<0.000000e+00> : vector<16x128xf32>
    %64 = tpu.matmul %62, %63, %cst_35 {dimension_numbers = #tpu.dot_dimension_numbers<[1], [0], [0], [1], [0, 0, 1, 1], [], []>} : vector<16x16xbf16>, vector<16x128xbf16>, vector<16x128xf32> -> vector<16x128xf32>
    %65 = arith.truncf %64 : vector<16x128xf32> to vector<16x128xbf16>
    %c0_36 = arith.constant 0 : index
    %c128 = arith.constant 128 : index
    %66 = vector.load %arg10[%c0_36, %c128] : memref<32x256xbf16, #tpu.memory_space<vmem>>, vector<16x128xbf16>
    tpu.vector_store %arg10[%c0_36, %c128], %65 {strides = array<i32>} : memref<32x256xbf16, #tpu.memory_space<vmem>>, vector<16x128xbf16>,
    %67 = vector.extract_strided_slice %13 {offsets = [16, 0], sizes = [16, 256], strides = [1, 1]} : vector<32x256xbf16> to vector<16x256xbf16>
    %68 = vector.extract_strided_slice %16 {offsets = [16, 0], sizes = [16, 256], strides = [1, 1]} : vector<32x256xbf16> to vector<16x256xbf16>
    %69 = vector.extract_strided_slice %19 {offsets = [16, 0], sizes = [16, 256], strides = [1, 1]} : vector<32x256xbf16> to vector<16x256xbf16>
    %70 = vector.extract_strided_slice %67 {offsets = [0, 0], sizes = [16, 128], strides = [1, 1]} : vector<16x256xbf16> to vector<16x128xbf16>
    %71 = vector.extract_strided_slice %68 {offsets = [0, 0], sizes = [16, 128], strides = [1, 1]} : vector<16x256xbf16> to vector<16x128xbf16>
    %cst_37 = arith.constant dense<0.000000e+00> : vector<16x16xf32>
    %72 = tpu.matmul %70, %71, %cst_37 {dimension_numbers = #tpu.dot_dimension_numbers<[1], [1], [0], [0], [0, 0, 1, 0], [], []>} : vector<16x128xbf16>, vector<16x128xbf16>, vector<16x16xf32> -> vector<16x16xf32>
    %cst_38 = arith.constant dense<0xFF800000> : vector<16xf32>
    %73 = vector.multi_reduction <maximumf>, %72, %cst_38 [1] : vector<16x16xf32> to vector<16xf32>
    %74 = vector.shape_cast %73 : vector<16xf32> to vector<16x1xf32>
    %75 = vector.broadcast %74 : vector<16x1xf32> to vector<16x16xf32>
    %76 = arith.subf %72, %75 : vector<16x16xf32>
    %77 = math.exp %76 : vector<16x16xf32>
    %cst_39 = arith.constant dense<0.000000e+00> : vector<16xf32>
    %78 = vector.multi_reduction <add>, %77, %cst_39 [1] : vector<16x16xf32> to vector<16xf32>
    %79 = vector.shape_cast %78 : vector<16xf32> to vector<16x1xf32>
    %cst_40 = arith.constant 1.000000e+00 : f32
    %80 = vector.broadcast %cst_40 : f32 to vector<16x1xf32>
    %81 = arith.divf %80, %79 : vector<16x1xf32>
    %82 = vector.broadcast %81 : vector<16x1xf32> to vector<16x16xf32>
    %83 = arith.mulf %77, %82 : vector<16x16xf32>
    %c1_41 = arith.constant 1 : index
    %c0_42 = arith.constant 0 : index
    %c0_43 = arith.constant 0 : index
    %c0_44 = arith.constant 0 : index
    %84 = vector.load %arg9[%c1_41, %c0_42, %c0_43, %c0_44] : memref<2x2x16x16xf32, #tpu.memory_space<vmem>>, vector<1x1x16x16xf32>
    %85 = vector.shape_cast %84 : vector<1x1x16x16xf32> to vector<16x16xf32>
    %86 = vector.shape_cast %83 : vector<16x16xf32> to vector<1x1x16x16xf32>
    tpu.vector_store %arg9[%c1_41, %c0_42, %c0_43, %c0_44], %86 {strides = array<i32>} : memref<2x2x16x16xf32, #tpu.memory_space<vmem>>, vector<1x1x16x16xf32>,
    %87 = arith.truncf %83 : vector<16x16xf32> to vector<16x16xbf16>
    %88 = vector.extract_strided_slice %69 {offsets = [0, 0], sizes = [16, 128], strides = [1, 1]} : vector<16x256xbf16> to vector<16x128xbf16>
    %cst_45 = arith.constant dense<0.000000e+00> : vector<16x128xf32>
    %89 = tpu.matmul %87, %88, %cst_45 {dimension_numbers = #tpu.dot_dimension_numbers<[1], [0], [0], [1], [0, 0, 1, 1], [], []>} : vector<16x16xbf16>, vector<16x128xbf16>, vector<16x128xf32> -> vector<16x128xf32>
    %90 = arith.truncf %89 : vector<16x128xf32> to vector<16x128xbf16>
    %c16 = arith.constant 16 : index
    %c0_46 = arith.constant 0 : index
    %91 = vector.load %arg10[%c16, %c0_46] : memref<32x256xbf16, #tpu.memory_space<vmem>>, vector<16x128xbf16>
    tpu.vector_store %arg10[%c16, %c0_46], %90 {strides = array<i32>} : memref<32x256xbf16, #tpu.memory_space<vmem>>, vector<16x128xbf16>,
    %92 = vector.extract_strided_slice %67 {offsets = [0, 128], sizes = [16, 128], strides = [1, 1]} : vector<16x256xbf16> to vector<16x128xbf16>
    %93 = vector.extract_strided_slice %68 {offsets = [0, 128], sizes = [16, 128], strides = [1, 1]} : vector<16x256xbf16> to vector<16x128xbf16>
    %cst_47 = arith.constant dense<0.000000e+00> : vector<16x16xf32>
    %94 = tpu.matmul %92, %93, %cst_47 {dimension_numbers = #tpu.dot_dimension_numbers<[1], [1], [0], [0], [0, 0, 1, 0], [], []>} : vector<16x128xbf16>, vector<16x128xbf16>, vector<16x16xf32> -> vector<16x16xf32>
    %cst_48 = arith.constant dense<0xFF800000> : vector<16xf32>
    %95 = vector.multi_reduction <maximumf>, %94, %cst_48 [1] : vector<16x16xf32> to vector<16xf32>
    %96 = vector.shape_cast %95 : vector<16xf32> to vector<16x1xf32>
    %97 = vector.broadcast %96 : vector<16x1xf32> to vector<16x16xf32>
    %98 = arith.subf %94, %97 : vector<16x16xf32>
    %99 = math.exp %98 : vector<16x16xf32>
    %cst_49 = arith.constant dense<0.000000e+00> : vector<16xf32>
    %100 = vector.multi_reduction <add>, %99, %cst_49 [1] : vector<16x16xf32> to vector<16xf32>
    %101 = vector.shape_cast %100 : vector<16xf32> to vector<16x1xf32>
    %cst_50 = arith.constant 1.000000e+00 : f32
    %102 = vector.broadcast %cst_50 : f32 to vector<16x1xf32>
    %103 = arith.divf %102, %101 : vector<16x1xf32>
    %104 = vector.broadcast %103 : vector<16x1xf32> to vector<16x16xf32>
    %105 = arith.mulf %99, %104 : vector<16x16xf32>
    %c1_51 = arith.constant 1 : index
    %c1_52 = arith.constant 1 : index
    %c0_53 = arith.constant 0 : index
    %c0_54 = arith.constant 0 : index
    %106 = vector.load %arg9[%c1_51, %c1_52, %c0_53, %c0_54] : memref<2x2x16x16xf32, #tpu.memory_space<vmem>>, vector<1x1x16x16xf32>
    %107 = vector.shape_cast %106 : vector<1x1x16x16xf32> to vector<16x16xf32>
    %108 = vector.shape_cast %105 : vector<16x16xf32> to vector<1x1x16x16xf32>
    tpu.vector_store %arg9[%c1_51, %c1_52, %c0_53, %c0_54], %108 {strides = array<i32>} : memref<2x2x16x16xf32, #tpu.memory_space<vmem>>, vector<1x1x16x16xf32>,
    %109 = arith.truncf %105 : vector<16x16xf32> to vector<16x16xbf16>
    %110 = vector.extract_strided_slice %69 {offsets = [0, 128], sizes = [16, 128], strides = [1, 1]} : vector<16x256xbf16> to vector<16x128xbf16>
    %cst_55 = arith.constant dense<0.000000e+00> : vector<16x128xf32>
    %111 = tpu.matmul %109, %110, %cst_55 {dimension_numbers = #tpu.dot_dimension_numbers<[1], [0], [0], [1], [0, 0, 1, 1], [], []>} : vector<16x16xbf16>, vector<16x128xbf16>, vector<16x128xf32> -> vector<16x128xf32>
    %112 = arith.truncf %111 : vector<16x128xf32> to vector<16x128xbf16>
    %c16_56 = arith.constant 16 : index
    %c128_57 = arith.constant 128 : index
    %113 = vector.load %arg10[%c16_56, %c128_57] : memref<32x256xbf16, #tpu.memory_space<vmem>>, vector<16x128xbf16>
    tpu.vector_store %arg10[%c16_56, %c128_57], %112 {strides = array<i32>} : memref<32x256xbf16, #tpu.memory_space<vmem>>, vector<16x128xbf16>,
    %c0_58 = arith.constant 0 : index
    %c0_59 = arith.constant 0 : index
    %114 = vector.load %arg10[%c0_58, %c0_59] : memref<32x256xbf16, #tpu.memory_space<vmem>>, vector<32x256xbf16>
    %c0_60 = arith.constant 0 : index
    %c0_61 = arith.constant 0 : index
    %115 = vector.load %arg7[%c0_60, %c0_61] : memref<256x256xbf16, #tpu.memory_space<vmem>>, vector<256x256xbf16>
    %cst_62 = arith.constant dense<0.000000e+00> : vector<32x256xf32>
    %116 = tpu.matmul %114, %115, %cst_62 {dimension_numbers = #tpu.dot_dimension_numbers<[1], [0], [0], [1], [0, 0, 1, 1], [], []>} : vector<32x256xbf16>, vector<256x256xbf16>, vector<32x256xf32> -> vector<32x256xf32>
    %117 = vector.shape_cast %116 : vector<32x256xf32> to vector<2x16x256xf32>
    %c0_63 = arith.constant 0 : index
    %c0_64 = arith.constant 0 : index
    %c0_65 = arith.constant 0 : index
    %118 = vector.load %arg8[%c0_63, %c0_64, %c0_65] : memref<2x16x256xf32, #tpu.memory_space<vmem>>, vector<2x16x256xf32>
    tpu.vector_store %arg8[%c0_63, %c0_64, %c0_65], %117 {strides = array<i32>} : memref<2x16x256xf32, #tpu.memory_space<vmem>>, vector<2x16x256xf32>,
    return
  }
  func.func @transform_0(%arg0: i32) -> (i32, i32, i32) {
    %c0_i32 = arith.constant 0 : i32
    %c0_i32_0 = arith.constant 0 : i32
    %c0_i32_1 = arith.constant 0 : i32
    return %arg0, %c0_i32, %c0_i32_0 : i32, i32, i32
  }
  func.func @transform_1(%arg0: i32) -> (i32, i32, i32) {
    %c0_i32 = arith.constant 0 : i32
    %c0_i32_0 = arith.constant 0 : i32
    %c0_i32_1 = arith.constant 0 : i32
    return %arg0, %c0_i32, %c0_i32_0 : i32, i32, i32
  }
  func.func @transform_2(%arg0: i32) -> (i32, i32, i32) {
    %c0_i32 = arith.constant 0 : i32
    %c0_i32_0 = arith.constant 0 : i32
    %c0_i32_1 = arith.constant 0 : i32
    return %arg0, %c0_i32, %c0_i32_0 : i32, i32, i32
  }
  func.func @transform_3(%arg0: i32) -> (i32, i32) {
    %c0_i32 = arith.constant 0 : i32
    %c0_i32_0 = arith.constant 0 : i32
    %c0_i32_1 = arith.constant 0 : i32
    return %c0_i32, %c0_i32_0 : i32, i32
  }
  func.func @transform_4(%arg0: i32) -> (i32, i32) {
    %c0_i32 = arith.constant 0 : i32
    %c0_i32_0 = arith.constant 0 : i32
    %c0_i32_1 = arith.constant 0 : i32
    return %c0_i32, %c0_i32_0 : i32, i32
  }
  func.func @transform_5(%arg0: i32) -> (i32, i32) {
    %c0_i32 = arith.constant 0 : i32
    %c0_i32_0 = arith.constant 0 : i32
    %c0_i32_1 = arith.constant 0 : i32
    return %c0_i32, %c0_i32_0 : i32, i32
  }
  func.func @transform_6(%arg0: i32) -> (i32, i32) {
    %c0_i32 = arith.constant 0 : i32
    %c0_i32_0 = arith.constant 0 : i32
    %c0_i32_1 = arith.constant 0 : i32
    return %c0_i32, %c0_i32_0 : i32, i32
  }
  func.func @transform_7(%arg0: i32) -> (i32, i32, i32) {
    %c0_i32 = arith.constant 0 : i32
    %c0_i32_0 = arith.constant 0 : i32
    %c0_i32_1 = arith.constant 0 : i32
    return %arg0, %c0_i32, %c0_i32_0 : i32, i32, i32
  }
  func.func @transform_8(%arg0: i32) -> (i32, i32, i32, i32) {
    %c0_i32 = arith.constant 0 : i32
    %c0_i32_0 = arith.constant 0 : i32
    %c0_i32_1 = arith.constant 0 : i32
    %c0_i32_2 = arith.constant 0 : i32
    return %arg0, %c0_i32, %c0_i32_0, %c0_i32_1 : i32, i32, i32, i32
  }
}

module attributes {stable_mosaic.version = 11 : i64} {
  func.func @kernel(%arg0: i32, %arg1: memref<2x16x256xf32, #tpu.memory_space<vmem>>, %arg2: memref<2x16x256xf32, #tpu.memory_space<vmem>>, %arg3: memref<2x16x256xf32, #tpu.memory_space<vmem>>, %arg4: memref<256x256xbf16, #tpu.memory_space<vmem>>, %arg5: memref<256x256xbf16, #tpu.memory_space<vmem>>, %arg6: memref<256x256xbf16, #tpu.memory_space<vmem>>, %arg7: memref<256x256xbf16, #tpu.memory_space<vmem>>, %arg8: memref<2x16x256xf32, #tpu.memory_space<vmem>>, %arg9: memref<2x2x16x16xf32, #tpu.memory_space<vmem>>, %arg10: memref<32x256xbf16, #tpu.memory_space<vmem>>) attributes {dimension_semantics = [#tpu.dimension_semantics<parallel>], iteration_bounds = array<i64: 2>, scalar_prefetch = 0 : i64, scratch_operands = 1 : i64, tpu.core_type = #tpu.core_type<tc>, window_params = [{transform_indices = @transform_0, window_bounds = array<i64: 2, 16, 256>}, {transform_indices = @transform_1, window_bounds = array<i64: 2, 16, 256>}, {transform_indices = @transform_2, window_bounds = array<i64: 2, 16, 256>}, {pipeline_mode = #tpu.pipeline_mode<synchronous>, transform_indices = @transform_3, window_bounds = array<i64: 256, 256>}, {pipeline_mode = #tpu.pipeline_mode<synchronous>, transform_indices = @transform_4, window_bounds = array<i64: 256, 256>}, {pipeline_mode = #tpu.pipeline_mode<synchronous>, transform_indices = @transform_5, window_bounds = array<i64: 256, 256>}, {pipeline_mode = #tpu.pipeline_mode<synchronous>, transform_indices = @transform_6, window_bounds = array<i64: 256, 256>}, {transform_indices = @transform_7, window_bounds = array<i64: 2, 16, 256>}, {transform_indices = @transform_8, window_bounds = array<i64: 2, 2, 16, 16>}]} {
    %c0 = arith.constant 0 : index
    %c0_0 = arith.constant 0 : index
    %c0_1 = arith.constant 0 : index
    %0 = vector.load %arg1[%c0, %c0_0, %c0_1] : memref<2x16x256xf32, #tpu.memory_space<vmem>>, vector<2x16x256xf32>
    %1 = vector.shape_cast %0 : vector<2x16x256xf32> to vector<32x256xf32>
    %2 = arith.truncf %1 : vector<32x256xf32> to vector<32x256xbf16>
    %c0_2 = arith.constant 0 : index
    %c0_3 = arith.constant 0 : index
    %c0_4 = arith.constant 0 : index
    %3 = vector.load %arg2[%c0_2, %c0_3, %c0_4] : memref<2x16x256xf32, #tpu.memory_space<vmem>>, vector<2x16x256xf32>
    %4 = vector.shape_cast %3 : vector<2x16x256xf32> to vector<32x256xf32>
    %5 = arith.truncf %4 : vector<32x256xf32> to vector<32x256xbf16>
    %c0_5 = arith.constant 0 : index
    %c0_6 = arith.constant 0 : index
    %c0_7 = arith.constant 0 : index
    %6 = vector.load %arg3[%c0_5, %c0_6, %c0_7] : memref<2x16x256xf32, #tpu.memory_space<vmem>>, vector<2x16x256xf32>
    %7 = vector.shape_cast %6 : vector<2x16x256xf32> to vector<32x256xf32>
    %8 = arith.truncf %7 : vector<32x256xf32> to vector<32x256xbf16>
    %c0_8 = arith.constant 0 : index
    %c0_9 = arith.constant 0 : index
    %9 = vector.load %arg4[%c0_8, %c0_9] : memref<256x256xbf16, #tpu.memory_space<vmem>>, vector<256x256xbf16>
    %cst = arith.constant dense<0.000000e+00> : vector<32x256xf32>
    %10 = tpu.matmul %2, %9, %cst {dimension_numbers = #tpu.dot_dimension_numbers<[1], [0], [0], [1], [0, 0, 1, 1], [], []>} : vector<32x256xbf16>, vector<256x256xbf16>, vector<32x256xf32> -> vector<32x256xf32>
    %cst_10 = arith.constant 6.250000e-02 : f32
    %11 = vector.broadcast %cst_10 : f32 to vector<32x256xf32>
    %12 = arith.mulf %10, %11 : vector<32x256xf32>
    %13 = arith.truncf %12 : vector<32x256xf32> to vector<32x256xbf16>
    %c0_11 = arith.constant 0 : index
    %c0_12 = arith.constant 0 : index
    %14 = vector.load %arg5[%c0_11, %c0_12] : memref<256x256xbf16, #tpu.memory_space<vmem>>, vector<256x256xbf16>
    %cst_13 = arith.constant dense<0.000000e+00> : vector<32x256xf32>
    %15 = tpu.matmul %5, %14, %cst_13 {dimension_numbers = #tpu.dot_dimension_numbers<[1], [0], [0], [1], [0, 0, 1, 1], [], []>} : vector<32x256xbf16>, vector<256x256xbf16>, vector<32x256xf32> -> vector<32x256xf32>
    %16 = arith.truncf %15 : vector<32x256xf32> to vector<32x256xbf16>
    %c0_14 = arith.constant 0 : index
    %c0_15 = arith.constant 0 : index
    %17 = vector.load %arg6[%c0_14, %c0_15] : memref<256x256xbf16, #tpu.memory_space<vmem>>, vector<256x256xbf16>
    %cst_16 = arith.constant dense<0.000000e+00> : vector<32x256xf32>
    %18 = tpu.matmul %8, %17, %cst_16 {dimension_numbers = #tpu.dot_dimension_numbers<[1], [0], [0], [1], [0, 0, 1, 1], [], []>} : vector<32x256xbf16>, vector<256x256xbf16>, vector<32x256xf32> -> vector<32x256xf32>
    %19 = arith.truncf %18 : vector<32x256xf32> to vector<32x256xbf16>
    %20 = vector.extract_strided_slice %13 {offsets = [0, 0], sizes = [16, 256], strides = [1, 1]} : vector<32x256xbf16> to vector<16x256xbf16>
    %21 = vector.extract_strided_slice %16 {offsets = [0, 0], sizes = [16, 256], strides = [1, 1]} : vector<32x256xbf16> to vector<16x256xbf16>
    %22 = vector.extract_strided_slice %19 {offsets = [0, 0], sizes = [16, 256], strides = [1, 1]} : vector<32x256xbf16> to vector<16x256xbf16>
    %23 = vector.extract_strided_slice %20 {offsets = [0, 0], sizes = [16, 128], strides = [1, 1]} : vector<16x256xbf16> to vector<16x128xbf16>
    %24 = vector.extract_strided_slice %21 {offsets = [0, 0], sizes = [16, 128], strides = [1, 1]} : vector<16x256xbf16> to vector<16x128xbf16>
    %cst_17 = arith.constant dense<0.000000e+00> : vector<16x16xf32>
    %25 = tpu.matmul %23, %24, %cst_17 {dimension_numbers = #tpu.dot_dimension_numbers<[1], [1], [0], [0], [0, 0, 1, 0], [], []>} : vector<16x128xbf16>, vector<16x128xbf16>, vector<16x16xf32> -> vector<16x16xf32>
    %cst_18 = arith.constant dense<0xFF800000> : vector<16xf32>
    %26 = vector.multi_reduction <maximumf>, %25, %cst_18 [1] : vector<16x16xf32> to vector<16xf32>
    %27 = vector.shape_cast %26 : vector<16xf32> to vector<16x1xf32>
    %28 = vector.broadcast %27 : vector<16x1xf32> to vector<16x16xf32>
    %29 = arith.subf %25, %28 : vector<16x16xf32>
    %30 = math.exp %29 : vector<16x16xf32>
    %cst_19 = arith.constant dense<0.000000e+00> : vector<16xf32>
    %31 = vector.multi_reduction <add>, %30, %cst_19 [1] : vector<16x16xf32> to vector<16xf32>
    %32 = vector.shape_cast %31 : vector<16xf32> to vector<16x1xf32>
    %cst_20 = arith.constant 1.000000e+00 : f32
    %33 = vector.broadcast %cst_20 : f32 to vector<16x1xf32>
    %34 = arith.divf %33, %32 : vector<16x1xf32>
    %35 = vector.broadcast %34 : vector<16x1xf32> to vector<16x16xf32>
    %36 = arith.mulf %30, %35 : vector<16x16xf32>
    %c0_21 = arith.constant 0 : index
    %c0_22 = arith.constant 0 : index
    %c0_23 = arith.constant 0 : index
    %c0_24 = arith.constant 0 : index
    %37 = vector.load %arg9[%c0_21, %c0_22, %c0_23, %c0_24] : memref<2x2x16x16xf32, #tpu.memory_space<vmem>>, vector<1x1x16x16xf32>
    %38 = vector.shape_cast %37 : vector<1x1x16x16xf32> to vector<16x16xf32>
    %39 = vector.shape_cast %36 : vector<16x16xf32> to vector<1x1x16x16xf32>
    tpu.vector_store %arg9[%c0_21, %c0_22, %c0_23, %c0_24], %39 {strides = array<i32>} : memref<2x2x16x16xf32, #tpu.memory_space<vmem>>, vector<1x1x16x16xf32>,
    %40 = arith.truncf %36 : vector<16x16xf32> to vector<16x16xbf16>
    %41 = vector.extract_strided_slice %22 {offsets = [0, 0], sizes = [16, 128], strides = [1, 1]} : vector<16x256xbf16> to vector<16x128xbf16>
    %cst_25 = arith.constant dense<0.000000e+00> : vector<16x128xf32>
    %42 = tpu.matmul %40, %41, %cst_25 {dimension_numbers = #tpu.dot_dimension_numbers<[1], [0], [0], [1], [0, 0, 1, 1], [], []>} : vector<16x16xbf16>, vector<16x128xbf16>, vector<16x128xf32> -> vector<16x128xf32>
    %43 = arith.truncf %42 : vector<16x128xf32> to vector<16x128xbf16>
    %c0_26 = arith.constant 0 : index
    %c0_27 = arith.constant 0 : index
    %44 = vector.load %arg10[%c0_26, %c0_27] : memref<32x256xbf16, #tpu.memory_space<vmem>>, vector<16x128xbf16>
    tpu.vector_store %arg10[%c0_26, %c0_27], %43 {strides = array<i32>} : memref<32x256xbf16, #tpu.memory_space<vmem>>, vector<16x128xbf16>,
    %45 = vector.extract_strided_slice %20 {offsets = [0, 128], sizes = [16, 128], strides = [1, 1]} : vector<16x256xbf16> to vector<16x128xbf16>
    %46 = vector.extract_strided_slice %21 {offsets = [0, 128], sizes = [16, 128], strides = [1, 1]} : vector<16x256xbf16> to vector<16x128xbf16>
    %cst_28 = arith.constant dense<0.000000e+00> : vector<16x16xf32>
    %47 = tpu.matmul %45, %46, %cst_28 {dimension_numbers = #tpu.dot_dimension_numbers<[1], [1], [0], [0], [0, 0, 1, 0], [], []>} : vector<16x128xbf16>, vector<16x128xbf16>, vector<16x16xf32> -> vector<16x16xf32>
    %cst_29 = arith.constant dense<0xFF800000> : vector<16xf32>
    %48 = vector.multi_reduction <maximumf>, %47, %cst_29 [1] : vector<16x16xf32> to vector<16xf32>
    %49 = vector.shape_cast %48 : vector<16xf32> to vector<16x1xf32>
    %50 = vector.broadcast %49 : vector<16x1xf32> to vector<16x16xf32>
    %51 = arith.subf %47, %50 : vector<16x16xf32>
    %52 = math.exp %51 : vector<16x16xf32>
    %cst_30 = arith.constant dense<0.000000e+00> : vector<16xf32>
    %53 = vector.multi_reduction <add>, %52, %cst_30 [1] : vector<16x16xf32> to vector<16xf32>
    %54 = vector.shape_cast %53 : vector<16xf32> to vector<16x1xf32>
    %cst_31 = arith.constant 1.000000e+00 : f32
    %55 = vector.broadcast %cst_31 : f32 to vector<16x1xf32>
    %56 = arith.divf %55, %54 : vector<16x1xf32>
    %57 = vector.broadcast %56 : vector<16x1xf32> to vector<16x16xf32>
    %58 = arith.mulf %52, %57 : vector<16x16xf32>
    %c0_32 = arith.constant 0 : index
    %c1 = arith.constant 1 : index
    %c0_33 = arith.constant 0 : index
    %c0_34 = arith.constant 0 : index
    %59 = vector.load %arg9[%c0_32, %c1, %c0_33, %c0_34] : memref<2x2x16x16xf32, #tpu.memory_space<vmem>>, vector<1x1x16x16xf32>
    %60 = vector.shape_cast %59 : vector<1x1x16x16xf32> to vector<16x16xf32>
    %61 = vector.shape_cast %58 : vector<16x16xf32> to vector<1x1x16x16xf32>
    tpu.vector_store %arg9[%c0_32, %c1, %c0_33, %c0_34], %61 {strides = array<i32>} : memref<2x2x16x16xf32, #tpu.memory_space<vmem>>, vector<1x1x16x16xf32>,
    %62 = arith.truncf %58 : vector<16x16xf32> to vector<16x16xbf16>
    %63 = vector.extract_strided_slice %22 {offsets = [0, 128], sizes = [16, 128], strides = [1, 1]} : vector<16x256xbf16> to vector<16x128xbf16>
    %cst_35 = arith.constant dense<0.000000e+00> : vector<16x128xf32>
    %64 = tpu.matmul %62, %63, %cst_35 {dimension_numbers = #tpu.dot_dimension_numbers<[1], [0], [0], [1], [0, 0, 1, 1], [], []>} : vector<16x16xbf16>, vector<16x128xbf16>, vector<16x128xf32> -> vector<16x128xf32>
    %65 = arith.truncf %64 : vector<16x128xf32> to vector<16x128xbf16>
    %c0_36 = arith.constant 0 : index
    %c128 = arith.constant 128 : index
    %66 = vector.load %arg10[%c0_36, %c128] : memref<32x256xbf16, #tpu.memory_space<vmem>>, vector<16x128xbf16>
    tpu.vector_store %arg10[%c0_36, %c128], %65 {strides = array<i32>} : memref<32x256xbf16, #tpu.memory_space<vmem>>, vector<16x128xbf16>,
    %67 = vector.extract_strided_slice %13 {offsets = [16, 0], sizes = [16, 256], strides = [1, 1]} : vector<32x256xbf16> to vector<16x256xbf16>
    %68 = vector.extract_strided_slice %16 {offsets = [16, 0], sizes = [16, 256], strides = [1, 1]} : vector<32x256xbf16> to vector<16x256xbf16>
    %69 = vector.extract_strided_slice %19 {offsets = [16, 0], sizes = [16, 256], strides = [1, 1]} : vector<32x256xbf16> to vector<16x256xbf16>
    %70 = vector.extract_strided_slice %67 {offsets = [0, 0], sizes = [16, 128], strides = [1, 1]} : vector<16x256xbf16> to vector<16x128xbf16>
    %71 = vector.extract_strided_slice %68 {offsets = [0, 0], sizes = [16, 128], strides = [1, 1]} : vector<16x256xbf16> to vector<16x128xbf16>
    %cst_37 = arith.constant dense<0.000000e+00> : vector<16x16xf32>
    %72 = tpu.matmul %70, %71, %cst_37 {dimension_numbers = #tpu.dot_dimension_numbers<[1], [1], [0], [0], [0, 0, 1, 0], [], []>} : vector<16x128xbf16>, vector<16x128xbf16>, vector<16x16xf32> -> vector<16x16xf32>
    %cst_38 = arith.constant dense<0xFF800000> : vector<16xf32>
    %73 = vector.multi_reduction <maximumf>, %72, %cst_38 [1] : vector<16x16xf32> to vector<16xf32>
    %74 = vector.shape_cast %73 : vector<16xf32> to vector<16x1xf32>
    %75 = vector.broadcast %74 : vector<16x1xf32> to vector<16x16xf32>
    %76 = arith.subf %72, %75 : vector<16x16xf32>
    %77 = math.exp %76 : vector<16x16xf32>
    %cst_39 = arith.constant dense<0.000000e+00> : vector<16xf32>
    %78 = vector.multi_reduction <add>, %77, %cst_39 [1] : vector<16x16xf32> to vector<16xf32>
    %79 = vector.shape_cast %78 : vector<16xf32> to vector<16x1xf32>
    %cst_40 = arith.constant 1.000000e+00 : f32
    %80 = vector.broadcast %cst_40 : f32 to vector<16x1xf32>
    %81 = arith.divf %80, %79 : vector<16x1xf32>
    %82 = vector.broadcast %81 : vector<16x1xf32> to vector<16x16xf32>
    %83 = arith.mulf %77, %82 : vector<16x16xf32>
    %c1_41 = arith.constant 1 : index
    %c0_42 = arith.constant 0 : index
    %c0_43 = arith.constant 0 : index
    %c0_44 = arith.constant 0 : index
    %84 = vector.load %arg9[%c1_41, %c0_42, %c0_43, %c0_44] : memref<2x2x16x16xf32, #tpu.memory_space<vmem>>, vector<1x1x16x16xf32>
    %85 = vector.shape_cast %84 : vector<1x1x16x16xf32> to vector<16x16xf32>
    %86 = vector.shape_cast %83 : vector<16x16xf32> to vector<1x1x16x16xf32>
    tpu.vector_store %arg9[%c1_41, %c0_42, %c0_43, %c0_44], %86 {strides = array<i32>} : memref<2x2x16x16xf32, #tpu.memory_space<vmem>>, vector<1x1x16x16xf32>,
    %87 = arith.truncf %83 : vector<16x16xf32> to vector<16x16xbf16>
    %88 = vector.extract_strided_slice %69 {offsets = [0, 0], sizes = [16, 128], strides = [1, 1]} : vector<16x256xbf16> to vector<16x128xbf16>
    %cst_45 = arith.constant dense<0.000000e+00> : vector<16x128xf32>
    %89 = tpu.matmul %87, %88, %cst_45 {dimension_numbers = #tpu.dot_dimension_numbers<[1], [0], [0], [1], [0, 0, 1, 1], [], []>} : vector<16x16xbf16>, vector<16x128xbf16>, vector<16x128xf32> -> vector<16x128xf32>
    %90 = arith.truncf %89 : vector<16x128xf32> to vector<16x128xbf16>
    %c16 = arith.constant 16 : index
    %c0_46 = arith.constant 0 : index
    %91 = vector.load %arg10[%c16, %c0_46] : memref<32x256xbf16, #tpu.memory_space<vmem>>, vector<16x128xbf16>
    tpu.vector_store %arg10[%c16, %c0_46], %90 {strides = array<i32>} : memref<32x256xbf16, #tpu.memory_space<vmem>>, vector<16x128xbf16>,
    %92 = vector.extract_strided_slice %67 {offsets = [0, 128], sizes = [16, 128], strides = [1, 1]} : vector<16x256xbf16> to vector<16x128xbf16>
    %93 = vector.extract_strided_slice %68 {offsets = [0, 128], sizes = [16, 128], strides = [1, 1]} : vector<16x256xbf16> to vector<16x128xbf16>
    %cst_47 = arith.constant dense<0.000000e+00> : vector<16x16xf32>
    %94 = tpu.matmul %92, %93, %cst_47 {dimension_numbers = #tpu.dot_dimension_numbers<[1], [1], [0], [0], [0, 0, 1, 0], [], []>} : vector<16x128xbf16>, vector<16x128xbf16>, vector<16x16xf32> -> vector<16x16xf32>
    %cst_48 = arith.constant dense<0xFF800000> : vector<16xf32>
    %95 = vector.multi_reduction <maximumf>, %94, %cst_48 [1] : vector<16x16xf32> to vector<16xf32>
    %96 = vector.shape_cast %95 : vector<16xf32> to vector<16x1xf32>
    %97 = vector.broadcast %96 : vector<16x1xf32> to vector<16x16xf32>
    %98 = arith.subf %94, %97 : vector<16x16xf32>
    %99 = math.exp %98 : vector<16x16xf32>
    %cst_49 = arith.constant dense<0.000000e+00> : vector<16xf32>
    %100 = vector.multi_reduction <add>, %99, %cst_49 [1] : vector<16x16xf32> to vector<16xf32>
    %101 = vector.shape_cast %100 : vector<16xf32> to vector<16x1xf32>
    %cst_50 = arith.constant 1.000000e+00 : f32
    %102 = vector.broadcast %cst_50 : f32 to vector<16x1xf32>
    %103 = arith.divf %102, %101 : vector<16x1xf32>
    %104 = vector.broadcast %103 : vector<16x1xf32> to vector<16x16xf32>
    %105 = arith.mulf %99, %104 : vector<16x16xf32>
    %c1_51 = arith.constant 1 : index
    %c1_52 = arith.constant 1 : index
    %c0_53 = arith.constant 0 : index
    %c0_54 = arith.constant 0 : index
    %106 = vector.load %arg9[%c1_51, %c1_52, %c0_53, %c0_54] : memref<2x2x16x16xf32, #tpu.memory_space<vmem>>, vector<1x1x16x16xf32>
    %107 = vector.shape_cast %106 : vector<1x1x16x16xf32> to vector<16x16xf32>
    %108 = vector.shape_cast %105 : vector<16x16xf32> to vector<1x1x16x16xf32>
    tpu.vector_store %arg9[%c1_51, %c1_52, %c0_53, %c0_54], %108 {strides = array<i32>} : memref<2x2x16x16xf32, #tpu.memory_space<vmem>>, vector<1x1x16x16xf32>,
    %109 = arith.truncf %105 : vector<16x16xf32> to vector<16x16xbf16>
    %110 = vector.extract_strided_slice %69 {offsets = [0, 128], sizes = [16, 128], strides = [1, 1]} : vector<16x256xbf16> to vector<16x128xbf16>
    %cst_55 = arith.constant dense<0.000000e+00> : vector<16x128xf32>
    %111 = tpu.matmul %109, %110, %cst_55 {dimension_numbers = #tpu.dot_dimension_numbers<[1], [0], [0], [1], [0, 0, 1, 1], [], []>} : vector<16x16xbf16>, vector<16x128xbf16>, vector<16x128xf32> -> vector<16x128xf32>
    %112 = arith.truncf %111 : vector<16x128xf32> to vector<16x128xbf16>
    %c16_56 = arith.constant 16 : index
    %c128_57 = arith.constant 128 : index
    %113 = vector.load %arg10[%c16_56, %c128_57] : memref<32x256xbf16, #tpu.memory_space<vmem>>, vector<16x128xbf16>
    tpu.vector_store %arg10[%c16_56, %c128_57], %112 {strides = array<i32>} : memref<32x256xbf16, #tpu.memory_space<vmem>>, vector<16x128xbf16>,
    %c0_58 = arith.constant 0 : index
    %c0_59 = arith.constant 0 : index
    %114 = vector.load %arg10[%c0_58, %c0_59] : memref<32x256xbf16, #tpu.memory_space<vmem>>, vector<32x256xbf16>
    %c0_60 = arith.constant 0 : index
    %c0_61 = arith.constant 0 : index
    %115 = vector.load %arg7[%c0_60, %c0_61] : memref<256x256xbf16, #tpu.memory_space<vmem>>, vector<256x256xbf16>
    %cst_62 = arith.constant dense<0.000000e+00> : vector<32x256xf32>
    %116 = tpu.matmul %114, %115, %cst_62 {dimension_numbers = #tpu.dot_dimension_numbers<[1], [0], [0], [1], [0, 0, 1, 1], [], []>} : vector<32x256xbf16>, vector<256x256xbf16>, vector<32x256xf32> -> vector<32x256xf32>
    %117 = vector.shape_cast %116 : vector<32x256xf32> to vector<2x16x256xf32>
    %c0_63 = arith.constant 0 : index
    %c0_64 = arith.constant 0 : index
    %c0_65 = arith.constant 0 : index
    %118 = vector.load %arg8[%c0_63, %c0_64, %c0_65] : memref<2x16x256xf32, #tpu.memory_space<vmem>>, vector<2x16x256xf32>
    tpu.vector_store %arg8[%c0_63, %c0_64, %c0_65], %117 {strides = array<i32>} : memref<2x16x256xf32, #tpu.memory_space<vmem>>, vector<2x16x256xf32>,
    return
  }
  func.func @transform_0(%arg0: i32) -> (i32, i32, i32) {
    %c0_i32 = arith.constant 0 : i32
    %c0_i32_0 = arith.constant 0 : i32
    %c0_i32_1 = arith.constant 0 : i32
    return %arg0, %c0_i32, %c0_i32_0 : i32, i32, i32
  }
  func.func @transform_1(%arg0: i32) -> (i32, i32, i32) {
    %c0_i32 = arith.constant 0 : i32
    %c0_i32_0 = arith.constant 0 : i32
    %c0_i32_1 = arith.constant 0 : i32
    return %arg0, %c0_i32, %c0_i32_0 : i32, i32, i32
  }
  func.func @transform_2(%arg0: i32) -> (i32, i32, i32) {
    %c0_i32 = arith.constant 0 : i32
    %c0_i32_0 = arith.constant 0 : i32
    %c0_i32_1 = arith.constant 0 : i32
    return %arg0, %c0_i32, %c0_i32_0 : i32, i32, i32
  }
  func.func @transform_3(%arg0: i32) -> (i32, i32) {
    %c0_i32 = arith.constant 0 : i32
    %c0_i32_0 = arith.constant 0 : i32
    %c0_i32_1 = arith.constant 0 : i32
    return %c0_i32, %c0_i32_0 : i32, i32
  }
  func.func @transform_4(%arg0: i32) -> (i32, i32) {
    %c0_i32 = arith.constant 0 : i32
    %c0_i32_0 = arith.constant 0 : i32
    %c0_i32_1 = arith.constant 0 : i32
    return %c0_i32, %c0_i32_0 : i32, i32
  }
  func.func @transform_5(%arg0: i32) -> (i32, i32) {
    %c0_i32 = arith.constant 0 : i32
    %c0_i32_0 = arith.constant 0 : i32
    %c0_i32_1 = arith.constant 0 : i32
    return %c0_i32, %c0_i32_0 : i32, i32
  }
  func.func @transform_6(%arg0: i32) -> (i32, i32) {
    %c0_i32 = arith.constant 0 : i32
    %c0_i32_0 = arith.constant 0 : i32
    %c0_i32_1 = arith.constant 0 : i32
    return %c0_i32, %c0_i32_0 : i32, i32
  }
  func.func @transform_7(%arg0: i32) -> (i32, i32, i32) {
    %c0_i32 = arith.constant 0 : i32
    %c0_i32_0 = arith.constant 0 : i32
    %c0_i32_1 = arith.constant 0 : i32
    return %arg0, %c0_i32, %c0_i32_0 : i32, i32, i32
  }
  func.func @transform_8(%arg0: i32) -> (i32, i32, i32, i32) {
    %c0_i32 = arith.constant 0 : i32
    %c0_i32_0 = arith.constant 0 : i32
    %c0_i32_1 = arith.constant 0 : i32
    %c0_i32_2 = arith.constant 0 : i32
    return %arg0, %c0_i32, %c0_i32_0, %c0_i32_1 : i32, i32, i32, i32
  }
}

</mosaic_0001>

<bundles_post_ra>
// kernel: tpu_custom_call.1
= control target key start
LH: loop header
LB: loop body
LE: loop exit
PB: predicated region body
PF: predicated region fallthrough
CT: control target
= control target key end

     0   :  { %s3772_s0 = inlined_call_operand.hbm [shape: f32[4,16,256], index: 0, kind: input, shape index: {}]   ;;  %s3773_s1 = inlined_call_operand.hbm [shape: f32[4,16,256], index: 1, kind: input, shape index: {}]   ;;  %s3774_s2 = inlined_call_operand.hbm [shape: f32[4,16,256], index: 2, kind: input, shape index: {}]   ;;  %s3775_s3 = inlined_call_operand.hbm [shape: bf16[256,256], index: 3, kind: input, shape index: {}]   ;;  %s3776_s4 = inlined_call_operand.hbm [shape: bf16[256,256], index: 4, kind: input, shape index: {}]   ;;  %s3777_s5 = inlined_call_operand.hbm [shape: bf16[256,256], index: 5, kind: input, shape index: {}]   ;;  %s3778_s6 = inlined_call_operand.hbm [shape: bf16[256,256], index: 6, kind: input, shape index: {}]   ;;  %s3779_s7 = inlined_call_operand.hbm [shape: f32[4,16,256], index: 7, kind: output, shape index: {0}]   ;;  %s3780_s8 = inlined_call_operand.hbm [shape: f32[4,2,16,16], index: 8, kind: output, shape index: {1}]  }
   0x1   :  { %3809 = sst [smem:[#allocation29_spill]] %s3773_s1 }
   0x2   :  { %3810 = sst [smem:[#allocation30_spill]] %s3775_s3 }
   0x3   :  { %3811 = sst [smem:[#allocation31_spill]] %s3777_s5 }
   0x4   :  { %3812 = sst [smem:[#allocation32_spill]] %s3779_s7 }
   0x5   :  { %3813 = sst [smem:[#allocation33_spill]] %s3780_s8 }
   0x6   :  { %14 = vsyncpa [#allocation4], 0 }
   0x7   :  { %16 = vsyncpa [#allocation4 + $0x1], 0 }
   0x8   :  { %17 = vsyncpa [#allocation7], 0 }
   0x9   :  { %19 = vsyncpa [#allocation7 + $0x1], 0 }
   0xa   :  { %20 = vsyncpa [#allocation10], 0 }
   0xb   :  { %21 = vsyncpa [#allocation13], 0 }
   0xc   :  { %22 = vsyncpa [#allocation5], 0 }
   0xd   :  { %24 = vsyncpa [#allocation5 + $0x1], 0 }
   0xe   :  { %25 = vsyncpa [#allocation17], 0 }
   0xf   :  { %27 = vsyncpa [#allocation17 + $0x1], 0  ;;  %s3175_s27 = smov 0   ;;  %s3177_s28 = smov 0  }
  0x10   :  { %s3179_s29 = smov 0   ;;  %s3181_s30 = smov 0  }
  0x11 LB: > { %3814 = sst [smem:[#allocation24_spill]] %s3097_s27  ;;  %s3196_s9 = sadd.s32 4294967295, %s3109_s30   ;;  %s3109_s30 = sphi %s3181_s30, %s3854_s30   ;;  %s3105_s29 = sphi %s3179_s29, %s3858_s29   ;;  %s3101_s28 = sphi %s3177_s28, %s3857_s28   ;;  %s3097_s27 = sphi %s3175_s27, %s3856_s27  }
  0x12   : > { %3815 = sst [smem:[#allocation25_spill]] %s3109_s30  ;;  %s2210_s10 = sadd.s32 4294967294, %s3109_s30  }
  0x13   : > { %p53_p0 = scmp.ne.s32.totalorder %s3101_s28, %s3097_s27  ;;  %p3781_p1 = scmp.eq.s32.totalorder %s3196_s9, 0 }
  0x14   : > { %p219_p3 = scmp.eq.s32.totalorder %s2210_s10, 1  ;;  %p2211_p5 = scmp.ge.s32.totalorder %s3109_s30, 1 }
  0x15   : > { %p3205_p4 = por %p3781_p1, %p53_p0  ;;  %p252_p7 = scmp.lt.s32.totalorder %s3109_s30, 3 }
  0x16   : > { %p3210_p6 = por %p219_p3, %p53_p0  ;;  %s3111_s14 = smov [#allocation9]  }
  0x17   : > { %s3816_s11 = scalar_select %p3205_p4, 1, 0 }
  0x18   : > { %s3817_s12 = scalar_select %p3210_p6, 1, 0 }
  0x19   : > { %p3215_p8 = pnand %p2211_p5, %p252_p7  ;;  %s264_s15 = sshll.u32 %s3111_s14, 4  ;;  %s3219_s15 = int_to_ptr.vmem [resolvable:$true] %s264_s15 }
  0x1a   : > { %3818 = sst [smem:[#allocation26_spill]] %s3817_s12  ;;  %s3112_s17 = smov [#allocation12]  }
  0x1b   : > { %s3819_s13 = scalar_select %p3215_p8, 1, 0 }
  0x1c   : > { %p2487_p9 = pneg %p3215_p8  ;;  %s290_s18 = sshll.u32 %s3112_s17, 4  ;;  %s3230_s18 = int_to_ptr.vmem [resolvable:$true] %s290_s18 }
  0x1d   : > { %s3821_s3 = sld [smem:[#allocation30_spill]] }
  0x1e   : > { %p3226_p11 = pnand %p2487_p9, %p3781_p1 }
  0x20   : > { %s3820_s16 = scalar_select %p3226_p11, 1, 0 }
  0x21   : > { %p3240_p13 = pneg %p3226_p11 }
  0x23   : > { %s2797_s21 = scalar_lea.hbm %s3821_s3, 4096 }
  0x24   : > { %p2798_p12 = scmp.ne.s32.totalorder %s3821_s3, %s2797_s21  ;;  %p2804_p5 = scmp.lt.u32.totalorder %s2797_s21, %s3821_s3 }
  0x25   : > { %s3822_s24 = scalar_select %p3240_p13, 1, 0 }
  0x26   : > { %p2800_p0 = pnand %p3240_p13, %p2798_p12 }
  0x28   : > { %p2801_p3 = pneg %p2800_p0 }
  0x2a   : > { %p2806_p7 = pnand %p2804_p5, %p2801_p3 }
  0x2c   : > { %2809 = shalt.err (!%p2806_p7)
}
  0x2d   : > { %s2810_s10 = scalar_lea.vmem %s3219_s15, 4096  ;;  %p2818_p2 = scmp.lt.s32.totalorder %s3219_s15, %s3219_s15 }
  0x2e   : > { %p2811_p9 = scmp.ne.s32.totalorder %s3219_s15, %s2810_s10  ;;  %p2819_p6 = scmp.lt.s32.totalorder %s2810_s10, %s2810_s10 }
  0x30   : > { %p2813_p10 = pnand %p2811_p9, %p3240_p13  ;;  %p2820_p12 = por %p2819_p6, %p2818_p2 }
  0x32   : > { %p2814_p1 = pneg %p2813_p10 }
  0x34   : > { %p2821_p0 = pnand %p2820_p12, %p2814_p1 }
  0x36   : > { %2824 = shalt.err (!%p2821_p0)
}
  0x37   : > { %s3784_s14 = smov 128   ;;  %s3786_s17 = smov 8  }
  0x38   : > { %2490 = dma.hbm_to_vmem [thread:$0]  (!%p3226_p11), %s3821_s3, 4096, %s3219_s15, [#allocation10], %s3784_s14, %s3784_s14, %s3786_s17  }
  0x39   : > { %s3823_s5 = sld [smem:[#allocation31_spill]] }
  0x3f   : > { %s2825_s23 = scalar_lea.hbm %s3823_s5, 4096 }
  0x40   : > { %p2826_p1 = scmp.ne.s32.totalorder %s3823_s5, %s2825_s23  ;;  %p2832_p10 = scmp.lt.u32.totalorder %s2825_s23, %s3823_s5 }
  0x42   : > { %p2828_p2 = pnand %p2826_p1, %p3240_p13 }
  0x44   : > { %p2829_p6 = pneg %p2828_p2 }
  0x46   : > { %p2834_p3 = pnand %p2832_p10, %p2829_p6 }
  0x48   : > { %2837 = shalt.err (!%p2834_p3)
}
  0x49   : > { %s2838_s15 = scalar_lea.vmem %s3230_s18, 4096  ;;  %p2846_p12 = scmp.lt.s32.totalorder %s3230_s18, %s3230_s18 }
  0x4a   : > { %p2839_p5 = scmp.ne.s32.totalorder %s3230_s18, %s2838_s15  ;;  %p2847_p0 = scmp.lt.s32.totalorder %s2838_s15, %s2838_s15 }
  0x4c   : > { %p2841_p7 = pnand %p2839_p5, %p3240_p13  ;;  %p2848_p1 = por %p2847_p0, %p2846_p12 }
  0x4e   : > { %p2842_p9 = pneg %p2841_p7 }
  0x50   : > { %p2849_p2 = pnand %p2848_p1, %p2842_p9 }
  0x52   : > { %2852 = shalt.err (!%p2849_p2)
}
  0x53   : > { %2496 = dma.hbm_to_vmem [thread:$0]  (!%p3226_p11), %s3823_s5, 4096, %s3230_s18, [#allocation13], %s3784_s14, %s3784_s14, %s3786_s17  }
  0x54   : > { %s3291_s20 = sadd.s32 1, %s3109_s30   ;;  %s40_s21 = sadd.s32 1, %s3105_s29 }
  0x55   : > { %3824 = sst [smem:[#allocation27_spill]] %s3291_s20  ;;  %s37_s22 = ssub.s32 %s3109_s30, %s3291_s20 }
  0x56   : > { %p47_p6 = scmp.ne.s32.totalorder %s3105_s29, %s3101_s28  ;;  %p38_p10 = scmp.eq.s32.totalorder %s37_s22, 0 }
  0x57   : > { %p48_p3 = scmp.eq.s32.totalorder %s3109_s30, 0  ;;  %p3825_p5 = scmp.eq.s32.totalorder %s3196_s9, 1 }
  0x58   : > { %p2521_p9 = scmp.lt.s32.totalorder %s3109_s30, 2  ;;  %s3783_s26 = sand.u32 1, %s3105_s29  }
  0x59   : > { %p3301_p7 = por %p3825_p5, %p47_p6  ;;  %p49_p12 = por %p48_p3, %p47_p6 }
  0x5a   : > { %s3307_s25 = scalar_select %p38_p10, %s3105_s29, %s40_s21  }
  0x5b   : > { %s3826_s23 = scalar_select %p3301_p7, 1, 0 }
  0x5c   : > { %3827 = sst [smem:[#allocation28_spill]] %s3307_s25  ;;  %s3312_s18 = sshll.u32 %s3783_s26, 6 }
  0x5d   : > { %s3315_s10 = sshll.u32 %s3109_s30, 10  ;;  %p3317_p0 = pnand %p2521_p9, %p49_p12 }
  0x5e   : > { %s339_s12 = sand.u32 1, %s3109_s30   ;;  %s3829_s1 = sld [smem:[#allocation29_spill]] }
  0x5f   : > { %s3828_s15 = scalar_select %p3317_p0, 1, 0 }
  0x60   : > { %s343_s26 = scalar_lea.vmem [#allocation6], %s3312_s18  ;;  %s3115_s17 = smov [#allocation11]  }
  0x61   : > { %s351_s14 = sshll.u32 %s343_s26, 4  ;;  %s3331_s3 = sshll.u32 %s3115_s17, 4  ;;  %s3329_s14 = int_to_ptr.vmem [resolvable:$true] %s351_s14  ;;  %s278_s3 = int_to_ptr.vmem [resolvable:$true] %s3331_s3 }
  0x62   : > { %s3333_s5 = scalar_lea.sflag [#allocation7], %s339_s12  ;;  %p3339_p2 = pneg %p3317_p0 }
  0x64   : > { %s3326_s21 = scalar_lea.hbm %s3829_s1, %s3315_s10  ;;  %s2858_s20 = scalar_lea.hbm %s3829_s1, 2048 }
  0x65   : > { %s2853_s25 = scalar_lea.hbm %s3326_s21, 1024  ;;  %p2859_p3 = scmp.lt.u32.totalorder %s3326_s21, %s3829_s1 }
  0x66   : > { %p2854_p1 = scmp.ne.s32.totalorder %s3326_s21, %s2853_s25  ;;  %p2860_p5 = scmp.lt.u32.totalorder %s2858_s20, %s2853_s25 }
  0x67   : > { %s3830_s19 = scalar_select %p3339_p2, 1, 0 }
  0x68   : > { %p2856_p6 = pnand %p3339_p2, %p2854_p1  ;;  %p2861_p9 = por %p2860_p5, %p2859_p3 }
  0x69   : > { %p2862_p12 = scmp.lt.u32.totalorder %s2853_s25, %s3326_s21 }
  0x6a   : > { %p2857_p10 = pneg %p2856_p6 }
  0x6b   : > { %p2863_p7 = por %p2862_p12, %p2861_p9 }
  0x6d   : > { %p2864_p4 = pnand %p2863_p7, %p2857_p10 }
  0x6f   : > { %2867 = shalt.err (!%p2864_p4)
}
  0x70   : > { %s2868_s12 = scalar_lea.vmem %s3329_s14, 1024  ;;  %s3116_s22 = smov [#allocation6]  }
  0x71   : > { %p2869_p1 = scmp.ne.s32.totalorder %s3329_s14, %s2868_s12  ;;  %s2873_s26 = sshll.u32 %s3116_s22, 4  ;;  %s2874_s26 = int_to_ptr.vmem [resolvable:$false] %s2873_s26 }
  0x72   : > { %s2875_s30 = scalar_lea.vmem %s2874_s26, 2048  ;;  %p2876_p11 = scmp.lt.s32.totalorder %s3329_s14, %s2874_s26 }
  0x73   : > { %p2871_p6 = pnand %p2869_p1, %p3339_p2  ;;  %p2877_p13 = scmp.lt.s32.totalorder %s2875_s30, %s2868_s12 }
  0x75   : > { %p2872_p8 = pneg %p2871_p6  ;;  %p2878_p3 = por %p2877_p13, %p2876_p11 }
  0x77   : > { %p2879_p5 = pnand %p2878_p3, %p2872_p8 }
  0x79   : > { %2882 = shalt.err (!%p2879_p5)
}
  0x7a   : > { %s3802_s20 = smov 256   ;;  %s3804_s25 = smov 16  }
  0x7b   : > { %2506 = dma.hbm_to_vmem [thread:$0]  (!%p3317_p0), %s3326_s21, 1024, %s3329_s14, %s3333_s5, %s3802_s20, %s3802_s20, %s3804_s25  }
  0x7c   : > { %s2883_s12 = scalar_lea.hbm %s3776_s4, 4096  ;;  %p3831_p8 = scmp.ne.s32.totalorder %s3822_s24, 0 }
  0x7d   : > { %p2884_p4 = scmp.ne.s32.totalorder %s3776_s4, %s2883_s12  ;;  %p2890_p7 = scmp.lt.u32.totalorder %s2883_s12, %s3776_s4 }
  0x7f   : > { %p2886_p11 = pnand %p2884_p4, %p3831_p8 }
  0x81   : > { %p2887_p13 = pneg %p2886_p11 }
  0x83   : > { %p2892_p10 = pnand %p2890_p7, %p2887_p13 }
  0x85   : > { %2895 = shalt.err (!%p2892_p10)
}
  0x86   : > { %s2896_s7 = scalar_lea.vmem %s278_s3, 4096  ;;  %p2904_p6 = scmp.lt.s32.totalorder %s278_s3, %s278_s3 }
  0x87   : > { %p2897_p9 = scmp.ne.s32.totalorder %s278_s3, %s2896_s7  ;;  %p2905_p3 = scmp.lt.s32.totalorder %s2896_s7, %s2896_s7 }
  0x89   : > { %p2899_p12 = pnand %p2897_p9, %p3831_p8  ;;  %p2906_p5 = por %p2905_p3, %p2904_p6 }
  0x8b   : > { %p2900_p1 = pneg %p2899_p12 }
  0x8d   : > { %p2907_p0 = pnand %p2906_p5, %p2900_p1 }
  0x8f   : > { %2910 = shalt.err (!%p2907_p0)
}
  0x90   : > { %p3832_p4 = scmp.ne.s32.totalorder %s3820_s16, 0  ;;  %s3833_s14 = smov 8  }
  0x91   : > { %s3834_s21 = smov 128   ;;  %s3119_s17 = smov [#allocation14]  }
  0x92   : > { %2493 = dma.hbm_to_vmem [thread:$0]  (!%p3832_p4), %s3776_s4, 4096, %s278_s3, [#allocation10], %s3834_s21, %s3834_s21, %s3833_s14  }
  0x93   : > { %s303_s22 = sshll.u32 %s3119_s17, 4  ;;  %s2911_s7 = scalar_lea.hbm %s3778_s6, 4096  ;;  %s304_s22 = int_to_ptr.vmem [resolvable:$true] %s303_s22 }
  0x94   : > { %p2912_p0 = scmp.ne.s32.totalorder %s3778_s6, %s2911_s7  ;;  %p2918_p7 = scmp.lt.u32.totalorder %s2911_s7, %s3778_s6 }
  0x96   : > { %p2914_p11 = pnand %p2912_p0, %p3831_p8 }
  0x98   : > { %p2915_p13 = pneg %p2914_p11 }
  0x9a   : > { %p2920_p10 = pnand %p2918_p7, %p2915_p13 }
  0x9c   : > { %2923 = shalt.err (!%p2920_p10)
}
  0x9d   : > { %s2924_s3 = scalar_lea.vmem %s304_s22, 4096  ;;  %p2932_p6 = scmp.lt.s32.totalorder %s304_s22, %s304_s22 }
  0x9e   : > { %p2925_p9 = scmp.ne.s32.totalorder %s304_s22, %s2924_s3  ;;  %p2933_p3 = scmp.lt.s32.totalorder %s2924_s3, %s2924_s3 }
  0xa0   : > { %p2927_p12 = pnand %p2925_p9, %p3831_p8  ;;  %p2934_p5 = por %p2933_p3, %p2932_p6 }
  0xa2   : > { %p2928_p1 = pneg %p2927_p12 }
  0xa4   : > { %p2935_p2 = pnand %p2934_p5, %p2928_p1 }
  0xa6   : > { %2938 = shalt.err (!%p2935_p2)
}
  0xa7   : > { %2499 = dma.hbm_to_vmem [thread:$0]  (!%p3832_p4), %s3778_s6, 4096, %s304_s22, [#allocation13], %s3834_s21, %s3834_s21, %s3833_s14  }
  0xa8   : > { %s3413_s1 = scalar_lea.hbm %s3772_s0, %s3315_s10  ;;  %s321_s16 = scalar_lea.vmem [#allocation3], %s3312_s18 }
  0xa9   : > { %s329_s27 = sshll.u32 %s321_s16, 4  ;;  %s3835_s17 = sand.u32 1, %s3105_s29   ;;  %s3416_s27 = int_to_ptr.vmem [resolvable:$true] %s329_s27 }
  0xaa   : > { %s3420_s12 = scalar_lea.sflag [#allocation4], %s3835_s17  ;;  %s2939_s26 = scalar_lea.hbm %s3413_s1, 1024 }
  0xab   : > { %p2940_p2 = scmp.ne.s32.totalorder %s3413_s1, %s2939_s26  ;;  %p3836_p8 = scmp.ne.s32.totalorder %s3830_s19, 0 }
  0xac   : > { %s2944_s22 = scalar_lea.hbm %s3772_s0, 2048  ;;  %p2945_p11 = scmp.lt.u32.totalorder %s3413_s1, %s3772_s0 }
  0xad   : > { %p2942_p4 = pnand %p2940_p2, %p3836_p8  ;;  %p2946_p13 = scmp.lt.u32.totalorder %s2944_s22, %s2939_s26 }
  0xae   : > { %p2948_p10 = scmp.lt.u32.totalorder %s2939_s26, %s3413_s1 }
  0xaf   : > { %p2943_p0 = pneg %p2942_p4  ;;  %p2947_p7 = por %p2946_p13, %p2945_p11 }
  0xb1   : > { %p2949_p9 = por %p2948_p10, %p2947_p7 }
  0xb3   : > { %p2950_p12 = pnand %p2949_p9, %p2943_p0 }
  0xb5   : > { %2953 = shalt.err (!%p2950_p12)
}
  0xb6   : > { %s2954_s3 = scalar_lea.vmem %s3416_s27, 1024  ;;  %s3120_s8 = smov [#allocation3]  }
  0xb7   : > { %p2955_p1 = scmp.ne.s32.totalorder %s3416_s27, %s2954_s3  ;;  %s2959_s20 = sshll.u32 %s3120_s8, 4  ;;  %s2960_s20 = int_to_ptr.vmem [resolvable:$false] %s2959_s20 }
  0xb8   : > { %s2961_s24 = scalar_lea.vmem %s2960_s20, 2048  ;;  %p2962_p5 = scmp.lt.s32.totalorder %s3416_s27, %s2960_s20 }
  0xb9   : > { %p2957_p6 = pnand %p2955_p1, %p3836_p8  ;;  %p2963_p2 = scmp.lt.s32.totalorder %s2961_s24, %s2954_s3 }
  0xbb   : > { %p2958_p3 = pneg %p2957_p6  ;;  %p2964_p4 = por %p2963_p2, %p2962_p5 }
  0xbd   : > { %p2965_p11 = pnand %p2964_p4, %p2958_p3 }
  0xbf   : > { %2968 = shalt.err (!%p2965_p11)
}
  0xc0   : > { %p3837_p0 = scmp.ne.s32.totalorder %s3828_s15, 0  ;;  %s3838_s25 = smov 16  }
  0xc1   : > { %s3839_s16 = smov 256   ;;  %s3451_s14 = scalar_lea.hbm %s3774_s2, %s3315_s10 }
  0xc2   : > { %2503 = dma.hbm_to_vmem [thread:$0]  (!%p3837_p0), %s3413_s1, 1024, %s3416_s27, %s3420_s12, %s3839_s16, %s3839_s16, %s3838_s25  }
  0xc3   : > { %s365_s21 = scalar_lea.vmem [#allocation8], %s3312_s18  ;;  %s2969_s7 = scalar_lea.hbm %s3451_s14, 1024 }
  0xc4   : > { %s373_s22 = sshll.u32 %s365_s21, 4  ;;  %p2970_p13 = scmp.ne.s32.totalorder %s3451_s14, %s2969_s7  ;;  %s3454_s22 = int_to_ptr.vmem [resolvable:$true] %s373_s22 }
  0xc5   : > { %s2974_s27 = scalar_lea.hbm %s3774_s2, 2048  ;;  %p2975_p9 = scmp.lt.u32.totalorder %s3451_s14, %s3774_s2 }
  0xc6   : > { %p2972_p7 = pnand %p2970_p13, %p3836_p8  ;;  %p2976_p12 = scmp.lt.u32.totalorder %s2974_s27, %s2969_s7 }
  0xc7   : > { %p2978_p6 = scmp.lt.u32.totalorder %s2969_s7, %s3451_s14 }
  0xc8   : > { %p2973_p10 = pneg %p2972_p7  ;;  %p2977_p1 = por %p2976_p12, %p2975_p9 }
  0xca   : > { %p2979_p3 = por %p2978_p6, %p2977_p1 }
  0xcc   : > { %p2980_p5 = pnand %p2979_p3, %p2973_p10 }
  0xce   : > { %2983 = shalt.err (!%p2980_p5)
}
  0xcf   : > { %s2984_s18 = scalar_lea.vmem %s3454_s22, 1024  ;;  %s3121_s3 = smov [#allocation8]  }
  0xd0   : > { %p2985_p2 = scmp.ne.s32.totalorder %s3454_s22, %s2984_s18  ;;  %s2989_s8 = sshll.u32 %s3121_s3, 4  ;;  %s2990_s8 = int_to_ptr.vmem [resolvable:$false] %s2989_s8 }
  0xd1   : > { %s2991_s20 = scalar_lea.vmem %s2990_s8, 2048  ;;  %p2992_p13 = scmp.lt.s32.totalorder %s3454_s22, %s2990_s8 }
  0xd2   : > { %p2987_p4 = pnand %p2985_p2, %p3836_p8  ;;  %p2993_p7 = scmp.lt.s32.totalorder %s2991_s20, %s2984_s18 }
  0xd4   : > { %p2988_p11 = pneg %p2987_p4  ;;  %p2994_p9 = por %p2993_p7, %p2992_p13 }
  0xd6   : > { %p2995_p12 = pnand %p2994_p9, %p2988_p11 }
  0xd8   : > { %2998 = shalt.err (!%p2995_p12)
}
  0xd9   : > { %2509 = dma.hbm_to_vmem [thread:$0]  (!%p3837_p0), %s3451_s14, 1024, %s3454_s22, %s3333_s5, %s3839_s16, %s3839_s16, %s3838_s25  }
  0xda   : > { %p3840_p8 = scmp.ne.s32.totalorder %s3819_s13, 0 }
  0xdb   : > { %s3484_s19 = sand.u32 (!%p3840_p8), 1, %s3101_s28   ;;  %p3841_p10 = scmp.ne.s32.totalorder (!%p3840_p8), %s3816_s11, 0 }
  0xdc   : > { %385 = sbr.rel (%p3840_p8) target bundleno = 3118 (0xc2e), region = 48  ;;  %s3487_s24 = sshll.u32 (!%p3840_p8), %s3484_s19, 6 }
  0xdd   : > { %s388_s15 = scalar_lea.sflag (!%p3840_p8), [#allocation4], %s3484_s19  ;;  %s3491_s17 = scalar_lea.vmem (!%p3840_p8), [#allocation3], %s3487_s24 }
  0xe3   : > { %3072 = dma.done.wait (%p3841_p10), %s388_s15, 1024  }
  0xe4   : > { %3074 = vsyncadd (%p3841_p10), %s388_s15, 4294966272  ;;  %s396_s5 = sand.u32 1, %s3196_s9   ;;  %s3499_s25 = scalar_lea.vmem [#allocation6], %s3487_s24 }
  0xe5   : > { %s397_s13 = scalar_lea.sflag [#allocation7], %s396_s5 }
  0xe6   : > { %3076 = dma.done.wait (%p3841_p10), %s397_s13, 2048  }
  0xe7   : > { %3078 = vsyncadd (%p3841_p10), %s397_s13, 4294965248  ;;  %s3506_s16 = scalar_lea.vmem [#allocation8], %s3487_s24  ;;  %p3842_p0 = scmp.eq.s32.totalorder %s3196_s9, 0 }
  0xe9   : > { %3080 = dma.done.wait (%p3842_p0), [#allocation10], 8192   ;;  %p3843_p1 = pmov %p3842_p0 }
  0xea   : > { %p3844_p6 = pmov %p3842_p0 }
  0xeb   : > { %3082 = vsyncadd (%p3843_p1), [#allocation10], 4294959104 }
  0xec   : > { %3084 = dma.done.wait (%p3844_p6), [#allocation13], 8192   ;;  %p3845_p3 = pmov %p3842_p0 }
  0xed   : > { %v2573_v0 = vld [vmem:[#allocation11 + $0x4] ss:$8 sps:$4 sm:$0xff]   ;;  %v2575_v1 = vld [vmem:[#allocation11] ss:$8 sps:$4 sm:$0xff]   ;;  %v2576_v2 = vld [vmem:[#allocation11 + $0x14] ss:$8 sps:$4 sm:$0xff]  }
  0xee   : > { %3086 = vsyncadd (%p3845_p3), [#allocation13], 4294959104  ;;  %964 = vmatprep.subr.bf16.mxu1 %v2573_v0  ;;  %v2578_v3 = vld [vmem:[#allocation9 + $0x4] ss:$8 sps:$4 sm:$0xff]   ;;  %v2580_v4 = vld [vmem:[#allocation11 + $0x10] ss:$8 sps:$4 sm:$0xff]  }
  0xef   : > { %965 = vmatpush1.bf16.msra.mxu1 %v2575_v1  ;;  %v2581_v5 = vld [vmem:[#allocation9] ss:$8 sps:$4 sm:$0xff]   ;;  %v2582_v6 = vld [vmem:[#allocation11 + $0x24] ss:$8 sps:$4 sm:$0xff]   ;;  %707 = vmatprep.subr.bf16.mxu0 %v2578_v3  ;;  %v2584_v7 = vld [vmem:[#allocation9 + $0x14] ss:$8 sps:$4 sm:$0xff]  }
  0xf0   : > { %966 = vmatprep.subr.bf16.mxu1 %v2576_v2  ;;  %708 = vmatpush1.bf16.msra.mxu0 %v2581_v5  ;;  %v2587_v8 = vld [vmem:[#allocation9 + $0x10] ss:$8 sps:$4 sm:$0xff]   ;;  %v2586_v9 = vld [vmem:[#allocation11 + $0x20] ss:$8 sps:$4 sm:$0xff]   ;;  %v2588_v10 = vld [vmem:[#allocation11 + $0x34] ss:$8 sps:$4 sm:$0xff]  }
  0xf1   : > { %709 = vmatprep.subr.bf16.mxu0 %v2584_v7  ;;  %v2590_v11 = vld [vmem:[#allocation9 + $0x24] ss:$8 sps:$4 sm:$0xff]   ;;  %v2593_v12 = vld [vmem:[#allocation9 + $0x20] ss:$8 sps:$4 sm:$0xff]   ;;  %v2592_v13 = vld [vmem:[#allocation11 + $0x30] ss:$8 sps:$4 sm:$0xff]  }
  0xf2   : > { %v2596_v14 = vld [vmem:[#allocation9 + $0x34] ss:$8 sps:$4 sm:$0xff]   ;;  %v2594_v15 = vld [vmem:[#allocation11 + $0x44] ss:$8 sps:$4 sm:$0xff]   ;;  %v2598_v16 = vld [vmem:[#allocation11 + $0x40] ss:$8 sps:$4 sm:$0xff]  }
  0xf3   : > { %967 = vmatpush1.bf16.msra.mxu1 %v2580_v4  ;;  %v2599_v17 = vld [vmem:[#allocation9 + $0x30] ss:$8 sps:$4 sm:$0xff]   ;;  %v2602_v18 = vld [vmem:[#allocation9 + $0x44] ss:$8 sps:$4 sm:$0xff]   ;;  %v2600_v19 = vld [vmem:[#allocation11 + $0x54] ss:$8 sps:$4 sm:$0xff]  }
  0xf4   : > { %968 = vmatprep.subr.bf16.mxu1 %v2582_v6  ;;  %710 = vmatpush1.bf16.msra.mxu0 %v2587_v8  ;;  %v2605_v20 = vld [vmem:[#allocation9 + $0x40] ss:$8 sps:$4 sm:$0xff]   ;;  %v2604_v21 = vld [vmem:[#allocation11 + $0x50] ss:$8 sps:$4 sm:$0xff]   ;;  %v2608_v22 = vld [vmem:[#allocation9 + $0x54] ss:$8 sps:$4 sm:$0xff]  }
  0xf5   : > { %711 = vmatprep.subr.bf16.mxu0 %v2590_v11  ;;  %v2606_v23 = vld [vmem:[#allocation11 + $0x64] ss:$8 sps:$4 sm:$0xff]   ;;  %v2610_v24 = vld [vmem:[#allocation11 + $0x60] ss:$8 sps:$4 sm:$0xff]   ;;  %v2611_v25 = vld [vmem:[#allocation9 + $0x50] ss:$8 sps:$4 sm:$0xff]  }
  0xf6   : > { %v2614_v26 = vld [vmem:[#allocation9 + $0x64] ss:$8 sps:$4 sm:$0xff]   ;;  %v2612_v27 = vld [vmem:[#allocation11 + $0x74] ss:$8 sps:$4 sm:$0xff]   ;;  %v2617_v28 = vld [vmem:[#allocation9 + $0x60] ss:$8 sps:$4 sm:$0xff]  }
  0xf7   : > { %969 = vmatpush1.bf16.msra.mxu1 %v2586_v9  ;;  %v2616_v29 = vld [vmem:[#allocation11 + $0x70] ss:$8 sps:$4 sm:$0xff]   ;;  %v2620_v30 = vld [vmem:[#allocation9 + $0x74] ss:$8 sps:$4 sm:$0xff]   ;;  %v2618_v31 = vld [vmem:[#allocation11 + $0x84] ss:$8 sps:$4 sm:$0xff]  }
  0xf8   : > { %970 = vmatprep.subr.bf16.mxu1 %v2588_v10  ;;  %712 = vmatpush1.bf16.msra.mxu0 %v2593_v12  ;;  %v2622_v32 = vld [vmem:[#allocation11 + $0x80] ss:$8 sps:$4 sm:$0xff]   ;;  %v2623_v33 = vld [vmem:[#allocation9 + $0x70] ss:$8 sps:$4 sm:$0xff]   ;;  %v2626_v34 = vld [vmem:[#allocation9 + $0x84] ss:$8 sps:$4 sm:$0xff]  }
  0xf9   : > { %713 = vmatprep.subr.bf16.mxu0 %v2596_v14  ;;  %v2624_v35 = vld [vmem:[#allocation11 + $0x94] ss:$8 sps:$4 sm:$0xff]   ;;  %v2629_v36 = vld [vmem:[#allocation9 + $0x80] ss:$8 sps:$4 sm:$0xff]   ;;  %v2628_v37 = vld [vmem:[#allocation11 + $0x90] ss:$8 sps:$4 sm:$0xff]  }
  0xfa   : > { %v2632_v38 = vld [vmem:[#allocation9 + $0x94] ss:$8 sps:$4 sm:$0xff]   ;;  %v2630_v39 = vld [vmem:[#allocation11 + $0xa4] ss:$8 sps:$4 sm:$0xff]   ;;  %v2634_v40 = vld [vmem:[#allocation11 + $0xa0] ss:$8 sps:$4 sm:$0xff]  }
  0xfb   : > { %971 = vmatpush1.bf16.msra.mxu1 %v2592_v13  ;;  %v2635_v41 = vld [vmem:[#allocation9 + $0x90] ss:$8 sps:$4 sm:$0xff]   ;;  %v2638_v42 = vld [vmem:[#allocation9 + $0xa4] ss:$8 sps:$4 sm:$0xff]   ;;  %v2636_v43 = vld [vmem:[#allocation11 + $0xb4] ss:$8 sps:$4 sm:$0xff]  }
  0xfc   : > { %972 = vmatprep.subr.bf16.mxu1 %v2594_v15  ;;  %714 = vmatpush1.bf16.msra.mxu0 %v2599_v17  ;;  %v492_v44 = vld [vmem:[%s3499_s25 + $0x8] sm:$0xff]  ;;  %v494_v45 = vld [vmem:[%s3499_s25 + $0x18] sm:$0xff]  ;;  %v491_v4 = vld [vmem:[%s3499_s25] sm:$0xff]  ;;  %vm3123_vm0 = vmmov 0   ;;  %vm1311_vm1 = vcmask 130048   ;;  %s3584_s11 = scalar_lea.vmem [#allocation16], %s3487_s24 }
  0xfd   : > { %715 = vmatprep.subr.bf16.mxu0 %v2602_v18  ;;  %v2640_v46 = vld [vmem:[#allocation11 + $0xb0] ss:$8 sps:$4 sm:$0xff]   ;;  %v2641_v47 = vld [vmem:[#allocation9 + $0xa0] ss:$8 sps:$4 sm:$0xff]   ;;  %v500_v48 = vpack.c.bf16 %v494_v45, %v492_v44  ;;  %v2642_v49 = vld [vmem:[#allocation11 + $0xc4] ss:$8 sps:$4 sm:$0xff]  }
  0xfe   : > { %v2644_v50 = vld [vmem:[#allocation9 + $0xb4] ss:$8 sps:$4 sm:$0xff]   ;;  %v2647_v51 = vld [vmem:[#allocation9 + $0xb0] ss:$8 sps:$4 sm:$0xff]   ;;  %v480_v52 = vld [vmem:[%s3491_s17 + $0x8] sm:$0xff]  ;;  %v3122_v18 = vmov 0.0  }
  0xff   : > { %973 = vmatpush1.bf16.msra.mxu1 %v2598_v16  ;;  %996 = vmatprep.mubr.bf16.mxu1 %v500_v48  ;;  %v482_v53 = vld [vmem:[%s3491_s17 + $0x18] sm:$0xff]  ;;  %v2646_v54 = vld [vmem:[#allocation11 + $0xc0] ss:$8 sps:$4 sm:$0xff]   ;;  %v2650_v55 = vld [vmem:[#allocation9 + $0xc4] ss:$8 sps:$4 sm:$0xff]   ;;  %s3650_s26 = scalar_lea.vmem [#allocation15], %s3487_s24 }
 0x100   : > { %974 = vmatprep.subr.bf16.mxu1 %v2600_v19  ;;  %716 = vmatpush1.bf16.msra.mxu0 %v2605_v20  ;;  %v488_v56 = vpack.c.bf16 %v482_v53, %v480_v52  ;;  %v2648_v57 = vld [vmem:[#allocation11 + $0xd4] ss:$8 sps:$4 sm:$0xff]   ;;  %v2653_v58 = vld [vmem:[#allocation9 + $0xc0] ss:$8 sps:$4 sm:$0xff]   ;;  %v2652_v59 = vld [vmem:[#allocation11 + $0xd0] ss:$8 sps:$4 sm:$0xff]  }
 0x101   : > { %717 = vmatprep.subr.bf16.mxu0 %v2608_v22  ;;  %v2656_v60 = vld [vmem:[#allocation9 + $0xd4] ss:$8 sps:$4 sm:$0xff]   ;;  %v2654_v61 = vld [vmem:[#allocation11 + $0xe4] ss:$8 sps:$4 sm:$0xff]   ;;  %v2659_v62 = vld [vmem:[#allocation9 + $0xd0] ss:$8 sps:$4 sm:$0xff]  }
 0x102   : > { %739 = vmatprep.mubr.bf16.mxu0 %v488_v56  ;;  %v2658_v63 = vld [vmem:[#allocation11 + $0xe0] ss:$8 sps:$4 sm:$0xff]   ;;  %v2662_v0 = vld [vmem:[#allocation9 + $0xe4] ss:$8 sps:$4 sm:$0xff]   ;;  %v2660_v1 = vld [vmem:[#allocation11 + $0xf4] ss:$8 sps:$4 sm:$0xff]  }
 0x103   : > { %975 = vmatpush1.bf16.msra.mxu1 %v2604_v21  ;;  %v2665_v2 = vld [vmem:[#allocation9 + $0xe0] ss:$8 sps:$4 sm:$0xff]   ;;  %v2664_v3 = vld [vmem:[#allocation11 + $0xf0] ss:$8 sps:$4 sm:$0xff]   ;;  %v2666_v6 = vld [vmem:[#allocation9 + $0xf4] ss:$8 sps:$4 sm:$0xff]  }
 0x104   : > { %976 = vmatprep.subr.bf16.mxu1 %v2606_v23  ;;  %718 = vmatpush1.bf16.msra.mxu0 %v2611_v25  ;;  %v493_v5 = vld [vmem:[%s3499_s25 + $0x10] sm:$0xff]  ;;  %v479_v8 = vld [vmem:[%s3491_s17] sm:$0xff]  ;;  %v496_v12 = vld [vmem:[%s3499_s25 + $0x28] sm:$0xff]  ;;  %s2394_s14 = sshll.u32 %s3196_s9, 10  ;;  %s3846_s7 = sld [smem:[#allocation33_spill]] }
 0x105   : > { %719 = vmatprep.subr.bf16.mxu0 %v2614_v26  ;;  %v2668_v7 = vld [vmem:[#allocation9 + $0xf0] ss:$8 sps:$4 sm:$0xff]   ;;  %v499_v10 = vpack.c.bf16 %v493_v5, %v491_v4  ;;  %v495_v15 = vld [vmem:[%s3499_s25 + $0x20] sm:$0xff]  ;;  %v484_v48 = vld [vmem:[%s3491_s17 + $0x28] sm:$0xff]  ;;  %s2024_s1 = sshll.u32 %s3584_s11, 4  ;;  %s1993_s27 = scalar_lea.sflag [#allocation17], %s3484_s19  ;;  %s3690_s1 = int_to_ptr.vmem [resolvable:$true] %s2024_s1 }
 0x106   : > { %v481_v9 = vld [vmem:[%s3491_s17 + $0x10] sm:$0xff]  ;;  %v498_v13 = vld [vmem:[%s3499_s25 + $0x38] sm:$0xff]  ;;  %v2677_v45 = vld [vmem:[#allocation12 + $0x24] ss:$8 sps:$4 sm:$0xff]   ;;  %s2999_s12 = scalar_lea.vmem %s3690_s1, 1024  ;;  %p3847_p2 = scmp.ne.s32.totalorder %s3826_s23, 0 }
 0x107   : > { %977 = vmatpush1.bf16.msra.mxu1 %v2610_v24  ;;  %v487_v11 = vpack.c.bf16 %v481_v9, %v479_v8  ;;  %v502_v14 = vpack.c.bf16 %v498_v13, %v496_v12  ;;  %v497_v16 = vld [vmem:[%s3499_s25 + $0x30] sm:$0xff]  ;;  %v504_v56 = vld [vmem:[%s3506_s16 + $0x8] sm:$0xff]  ;;  %p3000_p5 = scmp.ne.s32.totalorder %s3690_s1, %s2999_s12  ;;  %s3124_s10 = smov [#allocation16]  }
 0x108   : > { %978 = vmatprep.subr.bf16.mxu1 %v2612_v27  ;;  %720 = vmatpush1.bf16.msra.mxu0 %v2617_v28  ;;  %v501_v17 = vpack.c.bf16 %v497_v16, %v495_v15  ;;  %v2672_v44 = vld [vmem:[#allocation12 + $0x10] ss:$8 sps:$4 sm:$0xff]   ;;  %v2698_v4 = vld [vmem:[#allocation12 + $0x94] ss:$8 sps:$4 sm:$0xff]   ;;  %v2711_v15 = vld [vmem:[#allocation12 + $0xe0] ss:$8 sps:$4 sm:$0xff]  }
 0x109   : > { %721 = vmatprep.subr.bf16.mxu0 %v2620_v30  ;;  %v485_v52 = vld [vmem:[%s3491_s17 + $0x30] sm:$0xff]  ;;  %p3001_p4 = pnand %p3000_p5, %p3847_p2  ;;  %s3003_s18 = sshll.u32 %s3124_s10, 4  ;;  %s3004_s18 = int_to_ptr.vmem [resolvable:$false] %s3003_s18 }
 0x10a   : > { %v2678_v53 = vld [vmem:[#allocation12 + $0x30] ss:$8 sps:$4 sm:$0xff]   ;;  %v2704_v8 = vld [vmem:[#allocation12 + $0xb4] ss:$8 sps:$4 sm:$0xff]   ;;  %s3687_s30 = scalar_lea.hbm %s3846_s7, %s2394_s14  ;;  %s3005_s3 = scalar_lea.vmem %s3004_s18, 2048 }
 0x10b   : > { %979 = vmatpush1.bf16.msra.mxu1 %v2616_v29  ;;  %v2696_v5 = vld [vmem:[#allocation12 + $0x90] ss:$8 sps:$4 sm:$0xff]   ;;  %v2710_v12 = vld [vmem:[#allocation12 + $0xd4] ss:$8 sps:$4 sm:$0xff]   ;;  %p3002_p11 = pneg %p3001_p4  ;;  %p3006_p13 = scmp.lt.s32.totalorder %s3690_s1, %s3004_s18 }
 0x10c   : > { %980 = vmatprep.subr.bf16.mxu1 %v2618_v31  ;;  %722 = vmatpush1.bf16.msra.mxu0 %v2623_v33  ;;  %v2702_v9 = vld [vmem:[#allocation12 + $0xb0] ss:$8 sps:$4 sm:$0xff]   ;;  %v2716_v16 = vld [vmem:[#allocation12 + $0xf4] ss:$8 sps:$4 sm:$0xff]   ;;  %p3007_p7 = scmp.lt.s32.totalorder %s3005_s3, %s2999_s12 }
 0x10d   : > { %723 = vmatprep.subr.bf16.mxu0 %v2626_v34  ;;  %v2708_v13 = vld [vmem:[#allocation12 + $0xd0] ss:$8 sps:$4 sm:$0xff]  }
 0x10e   : > { %p3008_p9 = por %p3007_p7, %p3006_p13 }
 0x10f   : > { %981 = vmatpush1.bf16.msra.mxu1 %v2622_v32 }
 0x110   : > { %982 = vmatprep.subr.bf16.mxu1 %v2624_v35  ;;  %724 = vmatpush1.bf16.msra.mxu0 %v2629_v36  ;;  %p3009_p12 = pnand %p3008_p9, %p3002_p11 }
 0x111   : > { %725 = vmatprep.subr.bf16.mxu0 %v2632_v38 }
 0x113   : > { %983 = vmatpush1.bf16.msra.mxu1 %v2628_v37 }
 0x114   : > { %984 = vmatprep.subr.bf16.mxu1 %v2630_v39  ;;  %726 = vmatpush1.bf16.msra.mxu0 %v2635_v41  ;;  %v2669_v41 = vld [vmem:[#allocation12] ss:$8 sps:$4 sm:$0xff]  }
 0x115   : > { %727 = vmatprep.subr.bf16.mxu0 %v2638_v42  ;;  %v2671_v42 = vld [vmem:[#allocation12 + $0x4] ss:$8 sps:$4 sm:$0xff]  }
 0x117   : > { %985 = vmatpush1.bf16.msra.mxu1 %v2634_v40 }
 0x118   : > { %986 = vmatprep.subr.bf16.mxu1 %v2636_v43  ;;  %728 = vmatpush1.bf16.msra.mxu0 %v2641_v47  ;;  %v2674_v43 = vld [vmem:[#allocation12 + $0x14] ss:$8 sps:$4 sm:$0xff]  }
 0x119   : > { %729 = vmatprep.subr.bf16.mxu0 %v2644_v50  ;;  %v2680_v47 = vld [vmem:[#allocation12 + $0x34] ss:$8 sps:$4 sm:$0xff]  }
 0x11b   : > { %987 = vmatpush1.bf16.msra.mxu1 %v2640_v46  ;;  %v2675_v46 = vld [vmem:[#allocation12 + $0x20] ss:$8 sps:$4 sm:$0xff]  }
 0x11c   : > { %988 = vmatprep.subr.bf16.mxu1 %v2642_v49  ;;  %730 = vmatpush1.bf16.msra.mxu0 %v2647_v51  ;;  %v486_v49 = vld [vmem:[%s3491_s17 + $0x38] sm:$0xff]  ;;  %v483_v51 = vld [vmem:[%s3491_s17 + $0x20] sm:$0xff] }
 0x11d   : > { %731 = vmatprep.subr.bf16.mxu0 %v2650_v55  ;;  %v490_v50 = vpack.c.bf16 %v486_v49, %v484_v48  ;;  %v2683_v55 = vld [vmem:[#allocation12 + $0x44] ss:$8 sps:$4 sm:$0xff]  }
 0x11f   : > { %989 = vmatpush1.bf16.msra.mxu1 %v2646_v54  ;;  %v489_v54 = vpack.c.bf16 %v485_v52, %v483_v51 }
 0x120   : > { %990 = vmatprep.subr.bf16.mxu1 %v2648_v57  ;;  %732 = vmatpush1.bf16.msra.mxu0 %v2653_v58  ;;  %v506_v57 = vld [vmem:[%s3506_s16 + $0x18] sm:$0xff] }
 0x121   : > { %733 = vmatprep.subr.bf16.mxu0 %v2656_v60  ;;  %v512_v58 = vpack.c.bf16 %v506_v57, %v504_v56  ;;  %v2686_v60 = vld [vmem:[#allocation12 + $0x54] ss:$8 sps:$4 sm:$0xff]  }
 0x123   : > { %991 = vmatpush1.bf16.msra.mxu1 %v2652_v59  ;;  %v2681_v59 = vld [vmem:[#allocation12 + $0x40] ss:$8 sps:$4 sm:$0xff]  }
 0x124   : > { %992 = vmatprep.subr.bf16.mxu1 %v2654_v61  ;;  %734 = vmatpush1.bf16.msra.mxu0 %v2659_v62  ;;  %v2684_v61 = vld [vmem:[#allocation12 + $0x50] ss:$8 sps:$4 sm:$0xff]   ;;  %v2689_v62 = vld [vmem:[#allocation12 + $0x64] ss:$8 sps:$4 sm:$0xff]  }
 0x125   : > { %735 = vmatprep.subr.bf16.mxu0 %v2662_v0  ;;  %v2692_v0 = vld [vmem:[#allocation12 + $0x74] ss:$8 sps:$4 sm:$0xff]  }
 0x127   : > { %993 = vmatpush1.bf16.msra.mxu1 %v2658_v63  ;;  %v2687_v63 = vld [vmem:[#allocation12 + $0x60] ss:$8 sps:$4 sm:$0xff]  }
 0x128   : > { %994 = vmatprep.subr.bf16.mxu1 %v2660_v1  ;;  %736 = vmatpush1.bf16.msra.mxu0 %v2665_v2  ;;  %v2690_v1 = vld [vmem:[#allocation12 + $0x70] ss:$8 sps:$4 sm:$0xff]   ;;  %v2695_v2 = vld [vmem:[#allocation12 + $0x84] ss:$8 sps:$4 sm:$0xff]  }
 0x129   : > { %737 = vmatprep.subr.bf16.mxu0 %v2666_v6  ;;  %v2701_v6 = vld [vmem:[#allocation12 + $0xa4] ss:$8 sps:$4 sm:$0xff]  }
 0x12b   : > { %995 = vmatpush1.bf16.msra.mxu1 %v2664_v3  ;;  %v2693_v3 = vld [vmem:[#allocation12 + $0x80] ss:$8 sps:$4 sm:$0xff]  }
 0x12c   : > { %738 = vmatpush1.bf16.msra.mxu0 %v2668_v7  ;;  %2413 = vmatprep.subr.bf16.mxu1 %v3122_v18  ;;  %v2699_v7 = vld [vmem:[#allocation12 + $0xa0] ss:$8 sps:$4 sm:$0xff]  }
 0x12d   : > { %1213 = vmatprep.subr.bf16.mxu0 %v2671_v42 }
 0x12e   : > { %997 = vmatmul.mubr.bf16.vlgmr.msra.gmra.mrb[0].mxu1 %v499_v10  ;;  %v2707_v10 = vld [vmem:[#allocation12 + $0xc4] ss:$8 sps:$4 sm:$0xff]  }
 0x12f   : > { %740 = vmatmul.mubr.bf16.vlgmr.msra.gmra.mrb[0].mxu0 %v487_v11  ;;  %1006 = vmatprep.mubr.bf16.mxu1 %v502_v14  ;;  %v2705_v11 = vld [vmem:[#allocation12 + $0xc0] ss:$8 sps:$4 sm:$0xff]   ;;  %v2713_v14 = vld [vmem:[#allocation12 + $0xe4] ss:$8 sps:$4 sm:$0xff]  }
 0x130   : > { %1214 = vmatpush1.bf16.msra.mxu0 %v2669_v41  ;;  %749 = vmatprep.mubr.bf16.mxu0 %v490_v50 }
 0x131   : > { %1215 = vmatprep.subr.bf16.mxu0 %v2674_v43 }
 0x134   : > { %1216 = vmatpush1.bf16.msra.mxu0 %v2672_v44 }
 0x135   : > { %1217 = vmatprep.subr.bf16.mxu0 %v2677_v45 }
 0x136   : > { %1007 = vmatmul.mubr.bf16.gmra.mrb[4].mxu1 %v501_v17  ;;  %v2714_v17 = vld [vmem:[#allocation12 + $0xf0] ss:$8 sps:$4 sm:$0xff]  }
 0x137   : > { %2415 = vmatprep.mubr.msk.bf16.mxu1 %vm3123_vm0, %v3122_v18  ;;  %750 = vmatmul.mubr.bf16.gmra.mrb[4].mxu0 %v489_v54 }
 0x138   : > { %1218 = vmatpush1.bf16.msra.mxu0 %v2675_v46  ;;  %1245 = vmatprep.mubr.bf16.mxu0 %v512_v58 }
 0x139   : > { %1219 = vmatprep.subr.bf16.mxu0 %v2680_v47 }
 0x13c   : > { %1220 = vmatpush1.bf16.msra.mxu0 %v2678_v53 }
 0x13d   : > { %1221 = vmatprep.subr.bf16.mxu0 %v2683_v55 }
 0x140   : > { %1222 = vmatpush1.bf16.msra.mxu0 %v2681_v59 }
 0x141   : > { %1223 = vmatprep.subr.bf16.mxu0 %v2686_v60 }
 0x144   : > { %1224 = vmatpush1.bf16.msra.mxu0 %v2684_v61 }
 0x145   : > { %1225 = vmatprep.subr.bf16.mxu0 %v2689_v62 }
 0x148   : > { %1226 = vmatpush1.bf16.msra.mxu0 %v2687_v63 }
 0x149   : > { %1227 = vmatprep.subr.bf16.mxu0 %v2692_v0 }
 0x14c   : > { %1228 = vmatpush1.bf16.msra.mxu0 %v2690_v1 }
 0x14d   : > { %1229 = vmatprep.subr.bf16.mxu0 %v2695_v2 }
 0x150   : > { %1230 = vmatpush1.bf16.msra.mxu0 %v2693_v3 }
 0x151   : > { %1231 = vmatprep.subr.bf16.mxu0 %v2698_v4 }
 0x154   : > { %1232 = vmatpush1.bf16.msra.mxu0 %v2696_v5 }
 0x155   : > { %1233 = vmatprep.subr.bf16.mxu0 %v2701_v6 }
 0x158   : > { %1234 = vmatpush1.bf16.msra.mxu0 %v2699_v7 }
 0x159   : > { %1235 = vmatprep.subr.bf16.mxu0 %v2704_v8 }
 0x15c   : > { %1236 = vmatpush1.bf16.msra.mxu0 %v2702_v9 }
 0x15d   : > { %1237 = vmatprep.subr.bf16.mxu0 %v2707_v10 }
 0x160   : > { %1238 = vmatpush1.bf16.msra.mxu0 %v2705_v11 }
 0x161   : > { %1239 = vmatprep.subr.bf16.mxu0 %v2710_v12 }
 0x164   : > { %1240 = vmatpush1.bf16.msra.mxu0 %v2708_v13 }
 0x165   : > { %1241 = vmatprep.subr.bf16.mxu0 %v2713_v14 }
 0x168   : > { %1242 = vmatpush1.bf16.msra.mxu0 %v2711_v15 }
 0x169   : > { %1243 = vmatprep.subr.bf16.mxu0 %v2716_v16 }
 0x16c   : > { %1244 = vmatpush1.bf16.msra.mxu0 %v2714_v17 }
 0x201   : > { %v998_v19 = vpop.f32.mrb[0].mxu1 }
 0x202   : > { %v3531_v20 = vpop.f32.mrb[1].mxu1  ;;  %v741_v24 = vpop.f32.mrb[0].mxu0 }
 0x203   : > { %v1002_v21 = vpop.f32.mrb[2].mxu1  ;;  %v760_v26 = vmul.f32 0.0625, %v741_v24  ;;  %v743_v27 = vpop.f32.mrb[1].mxu0 }
 0x204   : > { %v1017_v22 = vpack.c.bf16 %v1002_v21, %v998_v19  ;;  %v3533_v23 = vpop.f32.mrb[3].mxu1  ;;  %v3537_v28 = vmul.f32 0.0625, %v743_v27  ;;  %v745_v29 = vpop.f32.mrb[2].mxu0  ;;  %v503_v19 = vld [vmem:[%s3506_s16] sm:$0xff]  ;;  %v505_v21 = vld [vmem:[%s3506_s16 + $0x10] sm:$0xff] }
 0x205   : > { %v1018_v25 = vpack.c.bf16 %v3533_v23, %v3531_v20  ;;  %v762_v30 = vmul.f32 0.0625, %v745_v29  ;;  %v747_v31 = vpop.f32.mrb[3].mxu0 }
 0x206   : > { %2414 = vmatpush3.bf16.xpose.msra.mxu1 %v1017_v22  ;;  %v3540_v32 = vmul.f32 0.0625, %v747_v31  ;;  %v511_v22 = vpack.c.bf16 %v505_v21, %v503_v19 }
 0x207   : > { %2419 = vmatprep.subr.bf16.mxu1 %v3122_v18  ;;  %v768_v33 = vpack.c.bf16 %v762_v30, %v760_v26 }
 0x208   : > { %v769_v34 = vpack.c.bf16 %v3540_v32, %v3537_v28  ;;  %1246 = vmatmul.mubr.bf16.vlgmr.msra.gmra.mrb[8].mxu0 %v511_v22 }
 0x209   : > { %v3546_v35 = vpop.f32.mrb[4].mxu1 }
 0x20a   : > { %v3548_v36 = vpop.f32.mrb[5].mxu1  ;;  %v751_v50 = vpop.f32.mrb[4].mxu0 }
 0x20b   : > { %v3550_v37 = vpop.f32.mrb[6].mxu1  ;;  %v753_v51 = vpop.f32.mrb[5].mxu0  ;;  %v3570_v54 = vmul.f32 0.0625, %v751_v50 }
 0x20c   : > { %v1019_v38 = vpack.c.bf16 %v3550_v37, %v3546_v35  ;;  %v3554_v39 = vpop.f32.mrb[7].mxu1  ;;  %v755_v52 = vpop.f32.mrb[6].mxu0  ;;  %v3572_v55 = vmul.f32 0.0625, %v753_v51  ;;  %v2731_v51 = vld [vmem:[#allocation14 + $0x44] ss:$8 sps:$4 sm:$0xff]  }
 0x20d   : > { %2416 = vmatmul.mubr.bf16.vlgmr.msra.gmra.mrb[8].mxu1 %v768_v33  ;;  %v1020_v40 = vpack.c.bf16 %v3554_v39, %v3548_v36  ;;  %v757_v53 = vpop.f32.mrb[7].mxu0  ;;  %v3574_v56 = vmul.f32 0.0625, %v755_v52  ;;  %v2729_v52 = vld [vmem:[#allocation14 + $0x40] ss:$8 sps:$4 sm:$0xff]  }
 0x20e   : > { %2421 = vmatprep.mubr.msk.bf16.mxu1 %vm3123_vm0, %v3122_v18  ;;  %v3576_v57 = vmul.f32 0.0625, %v757_v53  ;;  %v2734_v53 = vld [vmem:[#allocation14 + $0x54] ss:$8 sps:$4 sm:$0xff]  }
 0x20f   : > { %v770_v58 = vpack.c.bf16 %v3574_v56, %v3570_v54 }
 0x210   : > { %v771_v59 = vpack.c.bf16 %v3576_v57, %v3572_v55 }
 0x2db   : > { %v1247_v60 = vpop.f32.mrb[8].mxu0 }
 0x2dc   : > { %v1249_v61 = vpop.f32.mrb[9].mxu0 }
 0x2dd   : > { %v1251_v62 = vpop.f32.mrb[10].mxu0 }
 0x2de   : > { %v1253_v63 = vpop.f32.mrb[11].mxu0  ;;  %v1266_v0 = vpack.c.bf16 %v1251_v62, %v1247_v60  ;;  %v2732_v60 = vld [vmem:[#allocation14 + $0x50] ss:$8 sps:$4 sm:$0xff]   ;;  %v2735_v62 = vld [vmem:[#allocation14 + $0x60] ss:$8 sps:$4 sm:$0xff]  }
 0x2df   : > { %v1267_v1 = vpack.c.bf16 %v1253_v63, %v1249_v61  ;;  %v2737_v61 = vld [vmem:[#allocation14 + $0x64] ss:$8 sps:$4 sm:$0xff]   ;;  %v2740_v63 = vld [vmem:[#allocation14 + $0x74] ss:$8 sps:$4 sm:$0xff]  }
 0x2e0   : > { %v1304_v24 = vpop.f32.mrb[8].mxu1  ;;  %2420 = vmatpush3.bf16.msra.mxu1 %v1266_v0  ;;  %v2738_v0 = vld [vmem:[#allocation14 + $0x70] ss:$8 sps:$4 sm:$0xff]  }
 0x2e1   : > { %v1312_v26 = vsel %vm1311_vm1, %v1304_v24, -inf  ;;  %v2417_v27 = vpop.f32.mrb[9].mxu1  ;;  %2425 = vmatprep.subr.bf16.mxu1 %v3122_v18 }
 0x2e2   : > { %1313 = vmax.xlane.f32.xlu0 %v1312_v26  ;;  %v1307_v29 = vpop.f32.mrb[10].mxu1 }
 0x2e3   : > { %v2418_v30 = vpop.f32.mrb[11].mxu1  ;;  %v1315_v31 = vsel %vm1311_vm1, %v1307_v29, -inf }
 0x2e4   : > { %v2719_v30 = vld [vmem:[#allocation14 + $0x4] ss:$8 sps:$4 sm:$0xff]  }
 0x2e5   : > { %1926 = vmatprep.subr.bf16.mxu0 %v2719_v30 }
 0x2e6   : > { %1316 = vmax.xlane.f32.xlu0 %v1315_v31  ;;  %v2722_v31 = vld [vmem:[#allocation14 + $0x14] ss:$8 sps:$4 sm:$0xff]  }
 0x36f   : > { %v1314_v33 = vpop.xlane.xlu0 %1313 }
 0x370   : > { %v1318_v41 = vsub.f32 %v1304_v24, %v1314_v33  ;;  %v2720_v33 = vld [vmem:[#allocation14 + $0x10] ss:$8 sps:$4 sm:$0xff]  }
 0x372   : > { %v1320_v42 = vmul.f32 1.442695, %v1318_v41  ;;  %v2725_v41 = vld [vmem:[#allocation14 + $0x24] ss:$8 sps:$4 sm:$0xff]  }
 0x373   : > { %v1317_v43 = vpop.xlane.xlu0 %1316 }
 0x374   : > { %2765 = vpow2.f32 %v1320_v42  ;;  %v1319_v44 = vsub.f32 %v1307_v29, %v1317_v43  ;;  %v2717_v29 = vld [vmem:[#allocation14] ss:$8 sps:$4 sm:$0xff]   ;;  %v2728_v43 = vld [vmem:[#allocation14 + $0x34] ss:$8 sps:$4 sm:$0xff]  }
 0x375   : > { %1927 = vmatpush1.bf16.msra.mxu0 %v2717_v29  ;;  %v2723_v42 = vld [vmem:[#allocation14 + $0x20] ss:$8 sps:$4 sm:$0xff]  }
 0x376   : > { %v1322_v45 = vmul.f32 1.442695, %v1319_v44  ;;  %1928 = vmatprep.subr.bf16.mxu0 %v2722_v31  ;;  %v508_v44 = vld [vmem:[%s3506_s16 + $0x28] sm:$0xff] }
 0x378   : > { %2767 = vpow2.f32 %v1322_v45  ;;  %v510_v45 = vld [vmem:[%s3506_s16 + $0x38] sm:$0xff] }
 0x379   : > { %1929 = vmatpush1.bf16.msra.mxu0 %v2720_v33 }
 0x37a   : > { %1930 = vmatprep.subr.bf16.mxu0 %v2725_v41 }
 0x37d   : > { %1931 = vmatpush1.bf16.msra.mxu0 %v2723_v42 }
 0x37e   : > { %v2766_v46 = vpop.eup %2765  ;;  %1932 = vmatprep.subr.bf16.mxu0 %v2728_v43 }
 0x37f   : > { %v1324_v47 = vsel %vm1311_vm1, %v2766_v46, 0.0 }
 0x380   : > { %1325 = vadd.xlane.f32.xlu1 %v1324_v47  ;;  %v507_v47 = vld [vmem:[%s3506_s16 + $0x20] sm:$0xff] }
 0x382   : > { %v2768_v48 = vpop.eup %2767 }
 0x383   : > { %v1327_v49 = vsel %vm1311_vm1, %v2768_v48, 0.0 }
 0x384   : > { %1328 = vadd.xlane.f32.xlu1 %v1327_v49  ;;  %v2726_v49 = vld [vmem:[#allocation14 + $0x30] ss:$8 sps:$4 sm:$0xff]  }
 0x385   : > { %1933 = vmatpush1.bf16.msra.mxu0 %v2726_v49 }
 0x386   : > { %1934 = vmatprep.subr.bf16.mxu0 %v2731_v51 }
 0x389   : > { %1935 = vmatpush1.bf16.msra.mxu0 %v2729_v52 }
 0x38a   : > { %1936 = vmatprep.subr.bf16.mxu0 %v2734_v53 }
 0x38d   : > { %1937 = vmatpush1.bf16.msra.mxu0 %v2732_v60 }
 0x38e   : > { %1938 = vmatprep.subr.bf16.mxu0 %v2737_v61 }
 0x391   : > { %1939 = vmatpush1.bf16.msra.mxu0 %v2735_v62 }
 0x392   : > { %1940 = vmatprep.subr.bf16.mxu0 %v2740_v63 }
 0x395   : > { %1941 = vmatpush1.bf16.msra.mxu0 %v2738_v0 }
 0x40d   : > { %v1326_v2 = vpop.xlane.xlu1 %1325 }
 0x40e   : > { %2769 = vrcp.f32 %v1326_v2  ;;  %v2741_v2 = vld [vmem:[#allocation14 + $0x80] ss:$8 sps:$4 sm:$0xff]  }
 0x411   : > { %v1329_v3 = vpop.xlane.xlu1 %1328 }
 0x412   : > { %2771 = vrcp.f32 %v1329_v3  ;;  %v2746_v3 = vld [vmem:[#allocation14 + $0x94] ss:$8 sps:$4 sm:$0xff]  }
 0x418   : > { %v2770_v4 = vpop.eup %2769 }
 0x419   : > { %v1334_v5 = vmul.f32 %v2770_v4, %v2766_v46  ;;  %v514_v46 = vpack.c.bf16 %v510_v45, %v508_v44  ;;  %v2744_v4 = vld [vmem:[#allocation14 + $0x90] ss:$8 sps:$4 sm:$0xff]  }
 0x41b   : > { %1336 = vst.msk [vmem:[%s3584_s11] sm:$0xff] %vm1311_vm1, %v1334_v5  ;;  %1255 = vmatprep.mubr.bf16.mxu0 %v514_v46 }
 0x41c   : > { %v2772_v6 = vpop.eup %2771 }
 0x41d   : > { %v1335_v7 = vmul.f32 %v2772_v6, %v2768_v48  ;;  %v509_v48 = vld [vmem:[%s3506_s16 + $0x30] sm:$0xff]  ;;  %v2747_v6 = vld [vmem:[#allocation14 + $0xa0] ss:$8 sps:$4 sm:$0xff]  }
 0x41e   : > { %v513_v50 = vpack.c.bf16 %v509_v48, %v507_v47 }
 0x41f   : > { %1337 = vst.msk [vmem:[%s3584_s11 + $0x8] sm:$0xff] %vm1311_vm1, %v1335_v7  ;;  %v1338_v8 = vpack.c.bf16 %v1335_v7, %v1334_v5  ;;  %v2749_v5 = vld [vmem:[#allocation14 + $0xa4] ss:$8 sps:$4 sm:$0xff]   ;;  %v2752_v7 = vld [vmem:[#allocation14 + $0xb4] ss:$8 sps:$4 sm:$0xff]  }
 0x420   : > { %1256 = vmatmul.mubr.bf16.gmra.mrb[12].mxu0 %v513_v50 }
 0x421   : > { %2422 = vmatmul.mubr.msk.bf16.vlgmr.msra.gmra.mrb[12].mxu1 %vm1311_vm1, %v1338_v8  ;;  %v2750_v8 = vld [vmem:[#allocation14 + $0xb0] ss:$8 sps:$4 sm:$0xff]  }
 0x422   : > { %2426 = vmatpush3.bf16.xpose.msra.mxu1 %v1018_v25  ;;  %2427 = vmatprep.mubr.msk.bf16.mxu1 %vm3123_vm0, %v3122_v18 }
 0x423   : > { %2431 = vmatprep.subr.bf16.mxu1 %v3122_v18 }
 0x429   : > { %2428 = vmatmul.mubr.bf16.vlgmr.msra.gmra.mrb[16].mxu1 %v769_v34 }
 0x42a   : > { %2432 = vmatpush3.bf16.msra.mxu1 %v1267_v1  ;;  %2433 = vmatprep.mubr.msk.bf16.mxu1 %vm3123_vm0, %v3122_v18  ;;  %v2743_v1 = vld [vmem:[#allocation14 + $0x84] ss:$8 sps:$4 sm:$0xff]  }
 0x42b   : > { %2437 = vmatprep.subr.bf16.mxu1 %v3122_v18  ;;  %1942 = vmatprep.subr.bf16.mxu0 %v2743_v1 }
 0x42c   : > { %1943 = vmatpush1.bf16.msra.mxu0 %v2741_v2 }
 0x42d   : > { %1944 = vmatprep.subr.bf16.mxu0 %v2746_v3 }
 0x430   : > { %1945 = vmatpush1.bf16.msra.mxu0 %v2744_v4 }
 0x431   : > { %1946 = vmatprep.subr.bf16.mxu0 %v2749_v5 }
 0x434   : > { %1947 = vmatpush1.bf16.msra.mxu0 %v2747_v6 }
 0x435   : > { %1948 = vmatprep.subr.bf16.mxu0 %v2752_v7 }
 0x438   : > { %1949 = vmatpush1.bf16.msra.mxu0 %v2750_v8 }
 0x4f3   : > { %v1257_v31 = vpop.f32.mrb[12].mxu0 }
 0x4f4   : > { %v3603_v9 = vpop.f32.mrb[12].mxu1  ;;  %v1259_v33 = vpop.f32.mrb[13].mxu0 }
 0x4f5   : > { %v2423_v10 = vpop.f32.mrb[13].mxu1  ;;  %v1261_v41 = vpop.f32.mrb[14].mxu0 }
 0x4f6   : > { %v3605_v20 = vpop.f32.mrb[14].mxu1  ;;  %v2755_v10 = vld [vmem:[#allocation14 + $0xc4] ss:$8 sps:$4 sm:$0xff]   ;;  %v1268_v42 = vpack.c.bf16 %v1261_v41, %v1257_v31  ;;  %v1263_v43 = vpop.f32.mrb[15].mxu0 }
 0x4f7   : > { %v1383_v23 = vpack.c.bf16 %v3605_v20, %v3603_v9  ;;  %v2424_v25 = vpop.f32.mrb[15].mxu1  ;;  %1950 = vmatprep.subr.bf16.mxu0 %v2755_v10  ;;  %v1269_v44 = vpack.c.bf16 %v1263_v43, %v1259_v33 }
 0x4f8   : > { %v2753_v25 = vld [vmem:[#allocation14 + $0xc0] ss:$8 sps:$4 sm:$0xff]  }
 0x4f9   : > { %1951 = vmatpush1.bf16.msra.mxu0 %v2753_v25 }
 0x4fc   : > { %v1419_v11 = vpop.f32.mrb[16].mxu1 }
 0x4fd   : > { %v2429_v12 = vpop.f32.mrb[17].mxu1  ;;  %v1426_v28 = vsel %vm1311_vm1, %v1419_v11, -inf }
 0x4fe   : > { %1427 = vmax.xlane.f32.xlu0 %v1426_v28  ;;  %v1422_v32 = vpop.f32.mrb[18].mxu1  ;;  %v2756_v12 = vld [vmem:[#allocation14 + $0xd0] ss:$8 sps:$4 sm:$0xff]   ;;  %v2761_v28 = vld [vmem:[#allocation14 + $0xe4] ss:$8 sps:$4 sm:$0xff]  }
 0x4ff   : > { %v2430_v34 = vpop.f32.mrb[19].mxu1  ;;  %v1429_v13 = vsel %vm1311_vm1, %v1422_v32, -inf }
 0x500   : > { %1430 = vmax.xlane.f32.xlu1 %v1429_v13 }
 0x58b   : > { %v1428_v14 = vpop.xlane.xlu0 %1427 }
 0x58c   : > { %v1432_v15 = vsub.f32 %v1419_v11, %v1428_v14  ;;  %v2758_v11 = vld [vmem:[#allocation14 + $0xd4] ss:$8 sps:$4 sm:$0xff]  }
 0x58d   : > { %v1431_v16 = vpop.xlane.xlu1 %1430  ;;  %1952 = vmatprep.subr.bf16.mxu0 %v2758_v11 }
 0x58e   : > { %v1434_v17 = vmul.f32 1.442695, %v1432_v15  ;;  %v1433_v19 = vsub.f32 %v1422_v32, %v1431_v16  ;;  %1953 = vmatpush1.bf16.msra.mxu0 %v2756_v12  ;;  %v2759_v32 = vld [vmem:[#allocation14 + $0xe0] ss:$8 sps:$4 sm:$0xff]  }
 0x58f   : > { %1954 = vmatprep.subr.bf16.mxu0 %v2761_v28 }
 0x590   : > { %2773 = vpow2.f32 %v1434_v17  ;;  %v1436_v21 = vmul.f32 1.442695, %v1433_v19 }
 0x592   : > { %2775 = vpow2.f32 %v1436_v21  ;;  %1955 = vmatpush1.bf16.msra.mxu0 %v2759_v32  ;;  %v2764_v21 = vld [vmem:[#allocation14 + $0xf4] ss:$8 sps:$4 sm:$0xff]  }
 0x593   : > { %1956 = vmatprep.subr.bf16.mxu0 %v2764_v21 }
 0x59a   : > { %v3611_v22 = vpop.eup %2773 }
 0x59b   : > { %v1438_v24 = vsel %vm1311_vm1, %v3611_v22, 0.0 }
 0x59c   : > { %v3615_v26 = vpop.eup %2775  ;;  %1439 = vadd.xlane.f32.xlu0 %v1438_v24 }
 0x59d   : > { %v1441_v27 = vsel %vm1311_vm1, %v3615_v26, 0.0 }
 0x59e   : > { %1442 = vadd.xlane.f32.xlu1 %v1441_v27 }
 0x629   : > { %v1440_v34 = vpop.xlane.xlu0 %1439 }
 0x62a   : > { %2777 = vrcp.f32 %v1440_v34 }
 0x62b   : > { %v1443_v13 = vpop.xlane.xlu1 %1442 }
 0x62c   : > { %2779 = vrcp.f32 %v1443_v13 }
 0x634   : > { %v2778_v14 = vpop.eup %2777 }
 0x635   : > { %v1448_v15 = vmul.f32 %v2778_v14, %v3611_v22  ;;  %v2762_v22 = vld [vmem:[#allocation14 + $0xf0] ss:$8 sps:$4 sm:$0xff]  }
 0x636   : > { %v2780_v16 = vpop.eup %2779  ;;  %1957 = vmatpush1.bf16.msra.mxu0 %v2762_v22 }
 0x637   : > { %2336 = vst.msk [vmem:[%s3584_s11 + $0x10] sm:$0xff] %vm1311_vm1, %v1448_v15  ;;  %v1449_v17 = vmul.f32 %v2780_v16, %v3615_v26 }
 0x639   : > { %2337 = vst.msk [vmem:[%s3584_s11 + $0x18] sm:$0xff] %vm1311_vm1, %v1449_v17  ;;  %v1453_v19 = vpack.c.bf16 %v1449_v17, %v1448_v15 }
 0x63b   : > { %2434 = vmatmul.mubr.msk.bf16.vlgmr.msra.gmra.mrb[20].mxu1 %vm1311_vm1, %v1453_v19 }
 0x63c   : > { %2438 = vmatpush3.bf16.xpose.msra.mxu1 %v1019_v38  ;;  %2439 = vmatprep.mubr.msk.bf16.mxu1 %vm3123_vm0, %v3122_v18 }
 0x63d   : > { %2443 = vmatprep.subr.bf16.mxu1 %v3122_v18 }
 0x643   : > { %2440 = vmatmul.mubr.bf16.vlgmr.msra.gmra.mrb[24].mxu1 %v770_v58 }
 0x644   : > { %2445 = vmatprep.mubr.msk.bf16.mxu1 %vm3123_vm0, %v3122_v18  ;;  %2444 = vmatpush3.bf16.msra.mxu1 %v1268_v42 }
 0x645   : > { %2449 = vmatprep.subr.bf16.mxu1 %v3122_v18 }
 0x70e   : > { %v1491_v24 = vpop.f32.mrb[20].mxu1 }
 0x70f   : > { %v2435_v26 = vpop.f32.mrb[21].mxu1 }
 0x710   : > { %v1494_v35 = vpop.f32.mrb[22].mxu1 }
 0x711   : > { %v1498_v37 = vpack.c.bf16 %v1494_v35, %v1491_v24  ;;  %v2436_v38 = vpop.f32.mrb[23].mxu1 }
 0x713   : > { %1958 = vmatprep.mubr.bf16.mxu0 %v1498_v37 }
 0x714   : > { %1959 = vmatmul.mubr.bf16.vlgmr.msra.gmra.mrb[16].mxu0 %v1383_v23 }
 0x716   : > { %v1534_v27 = vpop.f32.mrb[24].mxu1 }
 0x717   : > { %v2441_v54 = vpop.f32.mrb[25].mxu1  ;;  %v1541_v56 = vsel %vm1311_vm1, %v1534_v27, -inf }
 0x718   : > { %1542 = vmax.xlane.f32.xlu0 %v1541_v56  ;;  %v1537_v58 = vpop.f32.mrb[26].mxu1 }
 0x719   : > { %v2442_v29 = vpop.f32.mrb[27].mxu1  ;;  %v1544_v30 = vsel %vm1311_vm1, %v1537_v58, -inf }
 0x71a   : > { %1545 = vmax.xlane.f32.xlu1 %v1544_v30 }
 0x7a5   : > { %v1543_v9 = vpop.xlane.xlu0 %1542 }
 0x7a6   : > { %v1547_v20 = vsub.f32 %v1534_v27, %v1543_v9 }
 0x7a7   : > { %v1546_v23 = vpop.xlane.xlu1 %1545 }
 0x7a8   : > { %v1549_v45 = vmul.f32 1.442695, %v1547_v20  ;;  %v1548_v46 = vsub.f32 %v1537_v58, %v1546_v23 }
 0x7aa   : > { %2781 = vpow2.f32 %v1549_v45  ;;  %v1551_v47 = vmul.f32 1.442695, %v1548_v46 }
 0x7ac   : > { %2783 = vpow2.f32 %v1551_v47 }
 0x7b4   : > { %v2782_v48 = vpop.eup %2781 }
 0x7b5   : > { %v1553_v49 = vsel %vm1311_vm1, %v2782_v48, 0.0 }
 0x7b6   : > { %v2784_v50 = vpop.eup %2783  ;;  %1554 = vadd.xlane.f32.xlu0 %v1553_v49 }
 0x7b7   : > { %v1556_v51 = vsel %vm1311_vm1, %v2784_v50, 0.0 }
 0x7b8   : > { %1557 = vadd.xlane.f32.xlu1 %v1556_v51 }
 0x7e7   : > { %v1960_v52 = vpop.f32.mrb[16].mxu0 }
 0x7e8   : > { %1979 = vst [vmem:[%s3650_s26] sm:$0xff] %v1960_v52  ;;  %v1962_v53 = vpop.f32.mrb[17].mxu0 }
 0x7e9   : > { %1980 = vst [vmem:[%s3650_s26 + $0x8] sm:$0xff] %v1962_v53  ;;  %v1964_v60 = vpop.f32.mrb[18].mxu0 }
 0x7ea   : > { %1981 = vst [vmem:[%s3650_s26 + $0x10] sm:$0xff] %v1964_v60  ;;  %v1966_v61 = vpop.f32.mrb[19].mxu0 }
 0x7eb   : > { %1982 = vst [vmem:[%s3650_s26 + $0x18] sm:$0xff] %v1966_v61 }
 0x843   : > { %v1555_v62 = vpop.xlane.xlu0 %1554 }
 0x844   : > { %2785 = vrcp.f32 %v1555_v62 }
 0x845   : > { %v1558_v63 = vpop.xlane.xlu1 %1557 }
 0x846   : > { %2787 = vrcp.f32 %v1558_v63 }
 0x84e   : > { %v2786_v0 = vpop.eup %2785 }
 0x84f   : > { %v1563_v1 = vmul.f32 %v2786_v0, %v2782_v48 }
 0x850   : > { %v2788_v2 = vpop.eup %2787 }
 0x851   : > { %2339 = vst.msk [vmem:[%s3584_s11 + $0x20] sm:$0xff] %vm1311_vm1, %v1563_v1  ;;  %v1564_v3 = vmul.f32 %v2788_v2, %v2784_v50 }
 0x853   : > { %2340 = vst.msk [vmem:[%s3584_s11 + $0x28] sm:$0xff] %vm1311_vm1, %v1564_v3  ;;  %v1568_v4 = vpack.c.bf16 %v1564_v3, %v1563_v1 }
 0x855   : > { %2446 = vmatmul.mubr.msk.bf16.vlgmr.msra.gmra.mrb[28].mxu1 %vm1311_vm1, %v1568_v4 }
 0x856   : > { %2450 = vmatpush3.bf16.xpose.msra.mxu1 %v1020_v40  ;;  %2451 = vmatprep.mubr.msk.bf16.mxu1 %vm3123_vm0, %v3122_v18 }
 0x857   : > { %2455 = vmatprep.subr.bf16.mxu1 %v3122_v18 }
 0x85d   : > { %2452 = vmatmul.mubr.bf16.vlgmr.msra.gmra.mrb[32].mxu1 %v771_v59 }
 0x85e   : > { %2456 = vmatpush3.bf16.msra.mxu1 %v1269_v44  ;;  %2457 = vmatprep.mubr.msk.bf16.mxu1 %vm3123_vm0, %v3122_v18 }
 0x928   : > { %v1606_v5 = vpop.f32.mrb[28].mxu1 }
 0x929   : > { %v2447_v6 = vpop.f32.mrb[29].mxu1 }
 0x92a   : > { %v1609_v7 = vpop.f32.mrb[30].mxu1 }
 0x92b   : > { %v1613_v8 = vpack.c.bf16 %v1609_v7, %v1606_v5  ;;  %v2448_v10 = vpop.f32.mrb[31].mxu1 }
 0x930   : > { %v1649_v36 = vpop.f32.mrb[32].mxu1 }
 0x931   : > { %v2453_v39 = vpop.f32.mrb[33].mxu1  ;;  %v1656_v40 = vsel %vm1311_vm1, %v1649_v36, -inf }
 0x932   : > { %1657 = vmax.xlane.f32.xlu0 %v1656_v40  ;;  %v1652_v25 = vpop.f32.mrb[34].mxu1 }
 0x933   : > { %v2454_v11 = vpop.f32.mrb[35].mxu1  ;;  %v1659_v12 = vsel %vm1311_vm1, %v1652_v25, -inf }
 0x934   : > { %1660 = vmax.xlane.f32.xlu1 %v1659_v12 }
 0x9bf   : > { %v1658_v55 = vpop.xlane.xlu0 %1657 }
 0x9c0   : > { %v1662_v57 = vsub.f32 %v1649_v36, %v1658_v55 }
 0x9c1   : > { %v1661_v59 = vpop.xlane.xlu1 %1660 }
 0x9c2   : > { %v1664_v28 = vmul.f32 1.442695, %v1662_v57  ;;  %v1663_v18 = vsub.f32 %v1652_v25, %v1661_v59 }
 0x9c4   : > { %2789 = vpow2.f32 %v1664_v28  ;;  %v1666_v32 = vmul.f32 1.442695, %v1663_v18 }
 0x9c6   : > { %2791 = vpow2.f32 %v1666_v32 }
 0x9ce   : > { %v2790_v34 = vpop.eup %2789 }
 0x9cf   : > { %v1668_v13 = vsel %vm1311_vm1, %v2790_v34, 0.0 }
 0x9d0   : > { %v2792_v14 = vpop.eup %2791  ;;  %1669 = vadd.xlane.f32.xlu0 %v1668_v13 }
 0x9d1   : > { %v1671_v15 = vsel %vm1311_vm1, %v2792_v14, 0.0 }
 0x9d2   : > { %1672 = vadd.xlane.f32.xlu1 %v1671_v15 }
 0xa5d   : > { %v1670_v16 = vpop.xlane.xlu0 %1669 }
 0xa5e   : > { %2793 = vrcp.f32 %v1670_v16 }
 0xa5f   : > { %v1673_v17 = vpop.xlane.xlu1 %1672 }
 0xa60   : > { %2795 = vrcp.f32 %v1673_v17 }
 0xa68   : > { %v2794_v19 = vpop.eup %2793 }
 0xa69   : > { %v1678_v21 = vmul.f32 %v2794_v19, %v2790_v34 }
 0xa6a   : > { %v2796_v22 = vpop.eup %2795 }
 0xa6b   : > { %2342 = vst.msk [vmem:[%s3584_s11 + $0x30] sm:$0xff] %vm1311_vm1, %v1678_v21  ;;  %v1679_v24 = vmul.f32 %v2796_v22, %v2792_v14 }
 0xa6d   : > { %2343 = vst.msk [vmem:[%s3584_s11 + $0x38] sm:$0xff] %vm1311_vm1, %v1679_v24  ;;  %v1683_v26 = vpack.c.bf16 %v1679_v24, %v1678_v21 }
 0xa6f   : > { %2458 = vmatmul.mubr.msk.bf16.vlgmr.msra.gmra.mrb[36].mxu1 %vm1311_vm1, %v1683_v26 }
 0xb42   : > { %v1721_v35 = vpop.f32.mrb[36].mxu1 }
 0xb43   : > { %v2459_v37 = vpop.f32.mrb[37].mxu1 }
 0xb44   : > { %v1724_v38 = vpop.f32.mrb[38].mxu1 }
 0xb45   : > { %v1728_v27 = vpack.c.bf16 %v1724_v38, %v1721_v35  ;;  %v2460_v54 = vpop.f32.mrb[39].mxu1 }
 0xb47   : > { %1968 = vmatprep.mubr.bf16.mxu0 %v1728_v27 }
 0xb48   : > { %1969 = vmatmul.mubr.bf16.gmra.mrb[20].mxu0 %v1613_v8 }
 0xb49   : > { %3012 = shalt.err (!%p3009_p12)
}
 0xb4a   : > { %s3013_s8 = scalar_lea.hbm %s3687_s30, 1024  ;;  %s3017_s15 = scalar_lea.hbm %s3846_s7, 2048 }
 0xb4b   : > { %p3014_p8 = scmp.ne.s32.totalorder %s3687_s30, %s3013_s8  ;;  %p3018_p1 = scmp.lt.u32.totalorder %s3687_s30, %s3846_s7 }
 0xb4c   : > { %p3019_p6 = scmp.lt.u32.totalorder %s3017_s15, %s3013_s8  ;;  %p3021_p5 = scmp.lt.u32.totalorder %s3013_s8, %s3687_s30 }
 0xb4d   : > { %p3015_p10 = pnand %p3014_p8, %p3847_p2 }
 0xb4e   : > { %p3020_p3 = por %p3019_p6, %p3018_p1 }
 0xb4f   : > { %p3016_p0 = pneg %p3015_p10 }
 0xb50   : > { %p3022_p4 = por %p3021_p5, %p3020_p3 }
 0xb52   : > { %p3023_p11 = pnand %p3022_p4, %p3016_p0 }
 0xb54   : > { %3026 = shalt.err (!%p3023_p11)
}
 0xb55   : > { %s3125_s13 = smov 128   ;;  %s3126_s25 = smov 8  }
 0xb56   : > { %2484 = dma.vmem_to_hbm [thread:$0]  (%p3847_p2), %s3690_s1, 1024, %s3687_s30, %s1993_s27, %s3125_s13, %s3125_s13, %s3126_s25  }
 0xb57   : > { %s2007_s16 = sshll.u32 %s3650_s26, 4  ;;  %s3848_s22 = sld [smem:[#allocation32_spill]]  ;;  %s3717_s16 = int_to_ptr.vmem [resolvable:$true] %s2007_s16 }
 0xb58   : > { %s1988_s30 = scalar_lea.sflag [#allocation5], %s3484_s19  ;;  %s3027_s1 = scalar_lea.vmem %s3717_s16, 1024 }
 0xb59   : > { %p3028_p13 = scmp.ne.s32.totalorder %s3717_s16, %s3027_s1  ;;  %s3127_s27 = smov [#allocation15]  }
 0xb5a   : > { %s3031_s10 = sshll.u32 %s3127_s27, 4  ;;  %s3032_s10 = int_to_ptr.vmem [resolvable:$false] %s3031_s10 }
 0xb5b   : > { %p3029_p7 = pnand %p3028_p13, %p3847_p2  ;;  %s3033_s9 = scalar_lea.vmem %s3032_s10, 2048 }
 0xb5c   : > { %p3034_p12 = scmp.lt.s32.totalorder %s3717_s16, %s3032_s10  ;;  %p3035_p8 = scmp.lt.s32.totalorder %s3033_s9, %s3027_s1 }
 0xb5d   : > { %s3725_s12 = scalar_lea.hbm %s3848_s22, %s2394_s14  ;;  %p3030_p9 = pneg %p3029_p7 }
 0xb5e   : > { %p3036_p10 = por %p3035_p8, %p3034_p12 }
 0xb60   : > { %p3037_p0 = pnand %p3036_p10, %p3030_p9 }
 0xc1b   : > { %v1970_v56 = vpop.f32.mrb[20].mxu0 }
 0xc1c   : > { %1983 = vst [vmem:[%s3650_s26 + $0x20] sm:$0xff] %v1970_v56  ;;  %v1972_v58 = vpop.f32.mrb[21].mxu0 }
 0xc1d   : > { %1984 = vst [vmem:[%s3650_s26 + $0x28] sm:$0xff] %v1972_v58  ;;  %v1974_v29 = vpop.f32.mrb[22].mxu0 }
 0xc1e   : > { %1985 = vst [vmem:[%s3650_s26 + $0x30] sm:$0xff] %v1974_v29  ;;  %v1976_v30 = vpop.f32.mrb[23].mxu0 }
 0xc1f   : > { %1986 = vst [vmem:[%s3650_s26 + $0x38] sm:$0xff] %v1976_v30 }
 0xc20   : > { %3040 = shalt.err (!%p3037_p0)
}
 0xc21   : > { %s3041_s26 = scalar_lea.hbm %s3725_s12, 1024  ;;  %s3045_s3 = scalar_lea.hbm %s3848_s22, 2048 }
 0xc22   : > { %p3042_p1 = scmp.ne.s32.totalorder %s3725_s12, %s3041_s26  ;;  %p3046_p5 = scmp.lt.u32.totalorder %s3725_s12, %s3848_s22 }
 0xc23   : > { %p3047_p4 = scmp.lt.u32.totalorder %s3045_s3, %s3041_s26  ;;  %p3049_p13 = scmp.lt.u32.totalorder %s3041_s26, %s3725_s12 }
 0xc24   : > { %p3043_p6 = pnand %p3042_p1, %p3847_p2 }
 0xc25   : > { %p3048_p11 = por %p3047_p4, %p3046_p5 }
 0xc26   : > { %p3044_p3 = pneg %p3043_p6 }
 0xc27   : > { %p3050_p7 = por %p3049_p13, %p3048_p11 }
 0xc29   : > { %p3051_p9 = pnand %p3050_p7, %p3044_p3 }
 0xc2b   : > { %3054 = shalt.err (!%p3051_p9)
}
 0xc2c   : > { %s3128_s24 = smov 256   ;;  %s3129_s15 = smov 16  }
 0xc2d   : > { %2483 = dma.vmem_to_hbm [thread:$0]  (%p3847_p2), %s3717_s16, 1024, %s3725_s12, %s1988_s30, %s3128_s24, %s3128_s24, %s3129_s15  }
 0xc2e PF: > { %s3849_s17 = sld [smem:[#allocation24_spill]]  ;;  %s3850_s5 = sld [smem:[#allocation26_spill]] }
 0xc2f   : > { %s3851_s13 = sld [smem:[#allocation25_spill]] }
 0xc34   : > { %s2039_s25 = sand.u32 1, %s3849_s17   ;;  %p3852_p12 = scmp.ne.s32.totalorder %s3850_s5, 0 }
 0xc35   : > { %p3853_p8 = scmp.ge.s32.totalorder %s3851_s13, 2  ;;  %s2040_s11 = scalar_lea.sflag [#allocation5], %s2039_s25 }
 0xc37   : > { %p2511_p10 = pnand %p3853_p8, %p3852_p12 }
 0xc39   : > { %3088 = dma.done.wait (!%p2511_p10), %s2040_s11, 1024  }
 0xc3a   : > { %3090 = vsyncadd (!%p2511_p10), %s2040_s11, 4294966272  ;;  %s2049_s21 = scalar_lea.sflag [#allocation17], %s2039_s25 }
 0xc3b   : > { %3092 = dma.done.wait (!%p2511_p10), %s2049_s21, 1024  }
 0xc3c   : > { %3094 = vsyncadd (!%p2511_p10), %s2049_s21, 4294966272  ;;  %s3854_s30 = sld [smem:[#allocation27_spill]]  ;;  %s3855_s23 = sld [smem:[#allocation28_spill]] }
 0xc3d   : > { %s3856_s27 = smov %s3101_s28  ;;  %s3857_s28 = smov %s3105_s29 }
 0xc42   : > { %p30_p2 = scmp.ge.s32.totalorder %s3854_s30, 4   ;;  %s3858_s29 = smov %s3855_s23 }
 0xc44   :  { %32 = sbr.rel (!%p30_p2) target bundleno = 17 (0x11), region = 153 }
 0xc4b   :  { %2054 = vsyncpa [#allocation4], 1 }
 0xc4c   :  { %2056 = vsyncpa [#allocation4 + $0x1], 1 }
 0xc4d   :  { %2057 = vsyncpa [#allocation7], 1 }
 0xc4e   :  { %2059 = vsyncpa [#allocation7 + $0x1], 1 }
 0xc4f   :  { %2060 = vsyncpa [#allocation10], 1 }
 0xc50   :  { %2061 = vsyncpa [#allocation13], 1 }
 0xc51   :  { %2062 = vsyncpa [#allocation5], 1 }
 0xc52   :  { %2064 = vsyncpa [#allocation5 + $0x1], 1 }
 0xc53   :  { %2065 = vsyncpa [#allocation17], 1 }
 0xc54   :  { %2067 = vsyncpa [#allocation17 + $0x1], 1 }

// kernel: tpu_custom_call.1
= control target key start
LH: loop header
LB: loop body
LE: loop exit
PB: predicated region body
PF: predicated region fallthrough
CT: control target
= control target key end

     0   :  { %s3772_s0 = inlined_call_operand.hbm [shape: f32[4,16,256], index: 0, kind: input, shape index: {}]   ;;  %s3773_s1 = inlined_call_operand.hbm [shape: f32[4,16,256], index: 1, kind: input, shape index: {}]   ;;  %s3774_s2 = inlined_call_operand.hbm [shape: f32[4,16,256], index: 2, kind: input, shape index: {}]   ;;  %s3775_s3 = inlined_call_operand.hbm [shape: bf16[256,256], index: 3, kind: input, shape index: {}]   ;;  %s3776_s4 = inlined_call_operand.hbm [shape: bf16[256,256], index: 4, kind: input, shape index: {}]   ;;  %s3777_s5 = inlined_call_operand.hbm [shape: bf16[256,256], index: 5, kind: input, shape index: {}]   ;;  %s3778_s6 = inlined_call_operand.hbm [shape: bf16[256,256], index: 6, kind: input, shape index: {}]   ;;  %s3779_s7 = inlined_call_operand.hbm [shape: f32[4,16,256], index: 7, kind: output, shape index: {0}]   ;;  %s3780_s8 = inlined_call_operand.hbm [shape: f32[4,2,16,16], index: 8, kind: output, shape index: {1}]  }
   0x1   :  { %3809 = sst [smem:[#allocation29_spill]] %s3773_s1 }
   0x2   :  { %3810 = sst [smem:[#allocation30_spill]] %s3775_s3 }
   0x3   :  { %3811 = sst [smem:[#allocation31_spill]] %s3777_s5 }
   0x4   :  { %3812 = sst [smem:[#allocation32_spill]] %s3779_s7 }
   0x5   :  { %3813 = sst [smem:[#allocation33_spill]] %s3780_s8 }
   0x6   :  { %14 = vsyncpa [#allocation4], 0 }
   0x7   :  { %16 = vsyncpa [#allocation4 + $0x1], 0 }
   0x8   :  { %17 = vsyncpa [#allocation7], 0 }
   0x9   :  { %19 = vsyncpa [#allocation7 + $0x1], 0 }
   0xa   :  { %20 = vsyncpa [#allocation10], 0 }
   0xb   :  { %21 = vsyncpa [#allocation13], 0 }
   0xc   :  { %22 = vsyncpa [#allocation5], 0 }
   0xd   :  { %24 = vsyncpa [#allocation5 + $0x1], 0 }
   0xe   :  { %25 = vsyncpa [#allocation17], 0 }
   0xf   :  { %27 = vsyncpa [#allocation17 + $0x1], 0  ;;  %s3175_s27 = smov 0   ;;  %s3177_s28 = smov 0  }
  0x10   :  { %s3179_s29 = smov 0   ;;  %s3181_s30 = smov 0  }
  0x11 LB: > { %3814 = sst [smem:[#allocation24_spill]] %s3097_s27  ;;  %s3196_s9 = sadd.s32 4294967295, %s3109_s30   ;;  %s3109_s30 = sphi %s3181_s30, %s3854_s30   ;;  %s3105_s29 = sphi %s3179_s29, %s3858_s29   ;;  %s3101_s28 = sphi %s3177_s28, %s3857_s28   ;;  %s3097_s27 = sphi %s3175_s27, %s3856_s27  }
  0x12   : > { %3815 = sst [smem:[#allocation25_spill]] %s3109_s30  ;;  %s2210_s10 = sadd.s32 4294967294, %s3109_s30  }
  0x13   : > { %p53_p0 = scmp.ne.s32.totalorder %s3101_s28, %s3097_s27  ;;  %p3781_p1 = scmp.eq.s32.totalorder %s3196_s9, 0 }
  0x14   : > { %p219_p3 = scmp.eq.s32.totalorder %s2210_s10, 1  ;;  %p2211_p5 = scmp.ge.s32.totalorder %s3109_s30, 1 }
  0x15   : > { %p3205_p4 = por %p3781_p1, %p53_p0  ;;  %p252_p7 = scmp.lt.s32.totalorder %s3109_s30, 3 }
  0x16   : > { %p3210_p6 = por %p219_p3, %p53_p0  ;;  %s3111_s14 = smov [#allocation9]  }
  0x17   : > { %s3816_s11 = scalar_select %p3205_p4, 1, 0 }
  0x18   : > { %s3817_s12 = scalar_select %p3210_p6, 1, 0 }
  0x19   : > { %p3215_p8 = pnand %p2211_p5, %p252_p7  ;;  %s264_s15 = sshll.u32 %s3111_s14, 4  ;;  %s3219_s15 = int_to_ptr.vmem [resolvable:$true] %s264_s15 }
  0x1a   : > { %3818 = sst [smem:[#allocation26_spill]] %s3817_s12  ;;  %s3112_s17 = smov [#allocation12]  }
  0x1b   : > { %s3819_s13 = scalar_select %p3215_p8, 1, 0 }
  0x1c   : > { %p2487_p9 = pneg %p3215_p8  ;;  %s290_s18 = sshll.u32 %s3112_s17, 4  ;;  %s3230_s18 = int_to_ptr.vmem [resolvable:$true] %s290_s18 }
  0x1d   : > { %s3821_s3 = sld [smem:[#allocation30_spill]] }
  0x1e   : > { %p3226_p11 = pnand %p2487_p9, %p3781_p1 }
  0x20   : > { %s3820_s16 = scalar_select %p3226_p11, 1, 0 }
  0x21   : > { %p3240_p13 = pneg %p3226_p11 }
  0x23   : > { %s2797_s21 = scalar_lea.hbm %s3821_s3, 4096 }
  0x24   : > { %p2798_p12 = scmp.ne.s32.totalorder %s3821_s3, %s2797_s21  ;;  %p2804_p5 = scmp.lt.u32.totalorder %s2797_s21, %s3821_s3 }
  0x25   : > { %s3822_s24 = scalar_select %p3240_p13, 1, 0 }
  0x26   : > { %p2800_p0 = pnand %p3240_p13, %p2798_p12 }
  0x28   : > { %p2801_p3 = pneg %p2800_p0 }
  0x2a   : > { %p2806_p7 = pnand %p2804_p5, %p2801_p3 }
  0x2c   : > { %2809 = shalt.err (!%p2806_p7)
}
  0x2d   : > { %s2810_s10 = scalar_lea.vmem %s3219_s15, 4096  ;;  %p2818_p2 = scmp.lt.s32.totalorder %s3219_s15, %s3219_s15 }
  0x2e   : > { %p2811_p9 = scmp.ne.s32.totalorder %s3219_s15, %s2810_s10  ;;  %p2819_p6 = scmp.lt.s32.totalorder %s2810_s10, %s2810_s10 }
  0x30   : > { %p2813_p10 = pnand %p2811_p9, %p3240_p13  ;;  %p2820_p12 = por %p2819_p6, %p2818_p2 }
  0x32   : > { %p2814_p1 = pneg %p2813_p10 }
  0x34   : > { %p2821_p0 = pnand %p2820_p12, %p2814_p1 }
  0x36   : > { %2824 = shalt.err (!%p2821_p0)
}
  0x37   : > { %s3784_s14 = smov 128   ;;  %s3786_s17 = smov 8  }
  0x38   : > { %2490 = dma.hbm_to_vmem [thread:$0]  (!%p3226_p11), %s3821_s3, 4096, %s3219_s15, [#allocation10], %s3784_s14, %s3784_s14, %s3786_s17  }
  0x39   : > { %s3823_s5 = sld [smem:[#allocation31_spill]] }
  0x3f   : > { %s2825_s23 = scalar_lea.hbm %s3823_s5, 4096 }
  0x40   : > { %p2826_p1 = scmp.ne.s32.totalorder %s3823_s5, %s2825_s23  ;;  %p2832_p10 = scmp.lt.u32.totalorder %s2825_s23, %s3823_s5 }
  0x42   : > { %p2828_p2 = pnand %p2826_p1, %p3240_p13 }
  0x44   : > { %p2829_p6 = pneg %p2828_p2 }
  0x46   : > { %p2834_p3 = pnand %p2832_p10, %p2829_p6 }
  0x48   : > { %2837 = shalt.err (!%p2834_p3)
}
  0x49   : > { %s2838_s15 = scalar_lea.vmem %s3230_s18, 4096  ;;  %p2846_p12 = scmp.lt.s32.totalorder %s3230_s18, %s3230_s18 }
  0x4a   : > { %p2839_p5 = scmp.ne.s32.totalorder %s3230_s18, %s2838_s15  ;;  %p2847_p0 = scmp.lt.s32.totalorder %s2838_s15, %s2838_s15 }
  0x4c   : > { %p2841_p7 = pnand %p2839_p5, %p3240_p13  ;;  %p2848_p1 = por %p2847_p0, %p2846_p12 }
  0x4e   : > { %p2842_p9 = pneg %p2841_p7 }
  0x50   : > { %p2849_p2 = pnand %p2848_p1, %p2842_p9 }
  0x52   : > { %2852 = shalt.err (!%p2849_p2)
}
  0x53   : > { %2496 = dma.hbm_to_vmem [thread:$0]  (!%p3226_p11), %s3823_s5, 4096, %s3230_s18, [#allocation13], %s3784_s14, %s3784_s14, %s3786_s17  }
  0x54   : > { %s3291_s20 = sadd.s32 1, %s3109_s30   ;;  %s40_s21 = sadd.s32 1, %s3105_s29 }
  0x55   : > { %3824 = sst [smem:[#allocation27_spill]] %s3291_s20  ;;  %s37_s22 = ssub.s32 %s3109_s30, %s3291_s20 }
  0x56   : > { %p47_p6 = scmp.ne.s32.totalorder %s3105_s29, %s3101_s28  ;;  %p38_p10 = scmp.eq.s32.totalorder %s37_s22, 0 }
  0x57   : > { %p48_p3 = scmp.eq.s32.totalorder %s3109_s30, 0  ;;  %p3825_p5 = scmp.eq.s32.totalorder %s3196_s9, 1 }
  0x58   : > { %p2521_p9 = scmp.lt.s32.totalorder %s3109_s30, 2  ;;  %s3783_s26 = sand.u32 1, %s3105_s29  }
  0x59   : > { %p3301_p7 = por %p3825_p5, %p47_p6  ;;  %p49_p12 = por %p48_p3, %p47_p6 }
  0x5a   : > { %s3307_s25 = scalar_select %p38_p10, %s3105_s29, %s40_s21  }
  0x5b   : > { %s3826_s23 = scalar_select %p3301_p7, 1, 0 }
  0x5c   : > { %3827 = sst [smem:[#allocation28_spill]] %s3307_s25  ;;  %s3312_s18 = sshll.u32 %s3783_s26, 6 }
  0x5d   : > { %s3315_s10 = sshll.u32 %s3109_s30, 10  ;;  %p3317_p0 = pnand %p2521_p9, %p49_p12 }
  0x5e   : > { %s339_s12 = sand.u32 1, %s3109_s30   ;;  %s3829_s1 = sld [smem:[#allocation29_spill]] }
  0x5f   : > { %s3828_s15 = scalar_select %p3317_p0, 1, 0 }
  0x60   : > { %s343_s26 = scalar_lea.vmem [#allocation6], %s3312_s18  ;;  %s3115_s17 = smov [#allocation11]  }
  0x61   : > { %s351_s14 = sshll.u32 %s343_s26, 4  ;;  %s3331_s3 = sshll.u32 %s3115_s17, 4  ;;  %s3329_s14 = int_to_ptr.vmem [resolvable:$true] %s351_s14  ;;  %s278_s3 = int_to_ptr.vmem [resolvable:$true] %s3331_s3 }
  0x62   : > { %s3333_s5 = scalar_lea.sflag [#allocation7], %s339_s12  ;;  %p3339_p2 = pneg %p3317_p0 }
  0x64   : > { %s3326_s21 = scalar_lea.hbm %s3829_s1, %s3315_s10  ;;  %s2858_s20 = scalar_lea.hbm %s3829_s1, 2048 }
  0x65   : > { %s2853_s25 = scalar_lea.hbm %s3326_s21, 1024  ;;  %p2859_p3 = scmp.lt.u32.totalorder %s3326_s21, %s3829_s1 }
  0x66   : > { %p2854_p1 = scmp.ne.s32.totalorder %s3326_s21, %s2853_s25  ;;  %p2860_p5 = scmp.lt.u32.totalorder %s2858_s20, %s2853_s25 }
  0x67   : > { %s3830_s19 = scalar_select %p3339_p2, 1, 0 }
  0x68   : > { %p2856_p6 = pnand %p3339_p2, %p2854_p1  ;;  %p2861_p9 = por %p2860_p5, %p2859_p3 }
  0x69   : > { %p2862_p12 = scmp.lt.u32.totalorder %s2853_s25, %s3326_s21 }
  0x6a   : > { %p2857_p10 = pneg %p2856_p6 }
  0x6b   : > { %p2863_p7 = por %p2862_p12, %p2861_p9 }
  0x6d   : > { %p2864_p4 = pnand %p2863_p7, %p2857_p10 }
  0x6f   : > { %2867 = shalt.err (!%p2864_p4)
}
  0x70   : > { %s2868_s12 = scalar_lea.vmem %s3329_s14, 1024  ;;  %s3116_s22 = smov [#allocation6]  }
  0x71   : > { %p2869_p1 = scmp.ne.s32.totalorder %s3329_s14, %s2868_s12  ;;  %s2873_s26 = sshll.u32 %s3116_s22, 4  ;;  %s2874_s26 = int_to_ptr.vmem [resolvable:$false] %s2873_s26 }
  0x72   : > { %s2875_s30 = scalar_lea.vmem %s2874_s26, 2048  ;;  %p2876_p11 = scmp.lt.s32.totalorder %s3329_s14, %s2874_s26 }
  0x73   : > { %p2871_p6 = pnand %p2869_p1, %p3339_p2  ;;  %p2877_p13 = scmp.lt.s32.totalorder %s2875_s30, %s2868_s12 }
  0x75   : > { %p2872_p8 = pneg %p2871_p6  ;;  %p2878_p3 = por %p2877_p13, %p2876_p11 }
  0x77   : > { %p2879_p5 = pnand %p2878_p3, %p2872_p8 }
  0x79   : > { %2882 = shalt.err (!%p2879_p5)
}
  0x7a   : > { %s3802_s20 = smov 256   ;;  %s3804_s25 = smov 16  }
  0x7b   : > { %2506 = dma.hbm_to_vmem [thread:$0]  (!%p3317_p0), %s3326_s21, 1024, %s3329_s14, %s3333_s5, %s3802_s20, %s3802_s20, %s3804_s25  }
  0x7c   : > { %s2883_s12 = scalar_lea.hbm %s3776_s4, 4096  ;;  %p3831_p8 = scmp.ne.s32.totalorder %s3822_s24, 0 }
  0x7d   : > { %p2884_p4 = scmp.ne.s32.totalorder %s3776_s4, %s2883_s12  ;;  %p2890_p7 = scmp.lt.u32.totalorder %s2883_s12, %s3776_s4 }
  0x7f   : > { %p2886_p11 = pnand %p2884_p4, %p3831_p8 }
  0x81   : > { %p2887_p13 = pneg %p2886_p11 }
  0x83   : > { %p2892_p10 = pnand %p2890_p7, %p2887_p13 }
  0x85   : > { %2895 = shalt.err (!%p2892_p10)
}
  0x86   : > { %s2896_s7 = scalar_lea.vmem %s278_s3, 4096  ;;  %p2904_p6 = scmp.lt.s32.totalorder %s278_s3, %s278_s3 }
  0x87   : > { %p2897_p9 = scmp.ne.s32.totalorder %s278_s3, %s2896_s7  ;;  %p2905_p3 = scmp.lt.s32.totalorder %s2896_s7, %s2896_s7 }
  0x89   : > { %p2899_p12 = pnand %p2897_p9, %p3831_p8  ;;  %p2906_p5 = por %p2905_p3, %p2904_p6 }
  0x8b   : > { %p2900_p1 = pneg %p2899_p12 }
  0x8d   : > { %p2907_p0 = pnand %p2906_p5, %p2900_p1 }
  0x8f   : > { %2910 = shalt.err (!%p2907_p0)
}
  0x90   : > { %p3832_p4 = scmp.ne.s32.totalorder %s3820_s16, 0  ;;  %s3833_s14 = smov 8  }
  0x91   : > { %s3834_s21 = smov 128   ;;  %s3119_s17 = smov [#allocation14]  }
  0x92   : > { %2493 = dma.hbm_to_vmem [thread:$0]  (!%p3832_p4), %s3776_s4, 4096, %s278_s3, [#allocation10], %s3834_s21, %s3834_s21, %s3833_s14  }
  0x93   : > { %s303_s22 = sshll.u32 %s3119_s17, 4  ;;  %s2911_s7 = scalar_lea.hbm %s3778_s6, 4096  ;;  %s304_s22 = int_to_ptr.vmem [resolvable:$true] %s303_s22 }
  0x94   : > { %p2912_p0 = scmp.ne.s32.totalorder %s3778_s6, %s2911_s7  ;;  %p2918_p7 = scmp.lt.u32.totalorder %s2911_s7, %s3778_s6 }
  0x96   : > { %p2914_p11 = pnand %p2912_p0, %p3831_p8 }
  0x98   : > { %p2915_p13 = pneg %p2914_p11 }
  0x9a   : > { %p2920_p10 = pnand %p2918_p7, %p2915_p13 }
  0x9c   : > { %2923 = shalt.err (!%p2920_p10)
}
  0x9d   : > { %s2924_s3 = scalar_lea.vmem %s304_s22, 4096  ;;  %p2932_p6 = scmp.lt.s32.totalorder %s304_s22, %s304_s22 }
  0x9e   : > { %p2925_p9 = scmp.ne.s32.totalorder %s304_s22, %s2924_s3  ;;  %p2933_p3 = scmp.lt.s32.totalorder %s2924_s3, %s2924_s3 }
  0xa0   : > { %p2927_p12 = pnand %p2925_p9, %p3831_p8  ;;  %p2934_p5 = por %p2933_p3, %p2932_p6 }
  0xa2   : > { %p2928_p1 = pneg %p2927_p12 }
  0xa4   : > { %p2935_p2 = pnand %p2934_p5, %p2928_p1 }
  0xa6   : > { %2938 = shalt.err (!%p2935_p2)
}
  0xa7   : > { %2499 = dma.hbm_to_vmem [thread:$0]  (!%p3832_p4), %s3778_s6, 4096, %s304_s22, [#allocation13], %s3834_s21, %s3834_s21, %s3833_s14  }
  0xa8   : > { %s3413_s1 = scalar_lea.hbm %s3772_s0, %s3315_s10  ;;  %s321_s16 = scalar_lea.vmem [#allocation3], %s3312_s18 }
  0xa9   : > { %s329_s27 = sshll.u32 %s321_s16, 4  ;;  %s3835_s17 = sand.u32 1, %s3105_s29   ;;  %s3416_s27 = int_to_ptr.vmem [resolvable:$true] %s329_s27 }
  0xaa   : > { %s3420_s12 = scalar_lea.sflag [#allocation4], %s3835_s17  ;;  %s2939_s26 = scalar_lea.hbm %s3413_s1, 1024 }
  0xab   : > { %p2940_p2 = scmp.ne.s32.totalorder %s3413_s1, %s2939_s26  ;;  %p3836_p8 = scmp.ne.s32.totalorder %s3830_s19, 0 }
  0xac   : > { %s2944_s22 = scalar_lea.hbm %s3772_s0, 2048  ;;  %p2945_p11 = scmp.lt.u32.totalorder %s3413_s1, %s3772_s0 }
  0xad   : > { %p2942_p4 = pnand %p2940_p2, %p3836_p8  ;;  %p2946_p13 = scmp.lt.u32.totalorder %s2944_s22, %s2939_s26 }
  0xae   : > { %p2948_p10 = scmp.lt.u32.totalorder %s2939_s26, %s3413_s1 }
  0xaf   : > { %p2943_p0 = pneg %p2942_p4  ;;  %p2947_p7 = por %p2946_p13, %p2945_p11 }
  0xb1   : > { %p2949_p9 = por %p2948_p10, %p2947_p7 }
  0xb3   : > { %p2950_p12 = pnand %p2949_p9, %p2943_p0 }
  0xb5   : > { %2953 = shalt.err (!%p2950_p12)
}
  0xb6   : > { %s2954_s3 = scalar_lea.vmem %s3416_s27, 1024  ;;  %s3120_s8 = smov [#allocation3]  }
  0xb7   : > { %p2955_p1 = scmp.ne.s32.totalorder %s3416_s27, %s2954_s3  ;;  %s2959_s20 = sshll.u32 %s3120_s8, 4  ;;  %s2960_s20 = int_to_ptr.vmem [resolvable:$false] %s2959_s20 }
  0xb8   : > { %s2961_s24 = scalar_lea.vmem %s2960_s20, 2048  ;;  %p2962_p5 = scmp.lt.s32.totalorder %s3416_s27, %s2960_s20 }
  0xb9   : > { %p2957_p6 = pnand %p2955_p1, %p3836_p8  ;;  %p2963_p2 = scmp.lt.s32.totalorder %s2961_s24, %s2954_s3 }
  0xbb   : > { %p2958_p3 = pneg %p2957_p6  ;;  %p2964_p4 = por %p2963_p2, %p2962_p5 }
  0xbd   : > { %p2965_p11 = pnand %p2964_p4, %p2958_p3 }
  0xbf   : > { %2968 = shalt.err (!%p2965_p11)
}
  0xc0   : > { %p3837_p0 = scmp.ne.s32.totalorder %s3828_s15, 0  ;;  %s3838_s25 = smov 16  }
  0xc1   : > { %s3839_s16 = smov 256   ;;  %s3451_s14 = scalar_lea.hbm %s3774_s2, %s3315_s10 }
  0xc2   : > { %2503 = dma.hbm_to_vmem [thread:$0]  (!%p3837_p0), %s3413_s1, 1024, %s3416_s27, %s3420_s12, %s3839_s16, %s3839_s16, %s3838_s25  }
  0xc3   : > { %s365_s21 = scalar_lea.vmem [#allocation8], %s3312_s18  ;;  %s2969_s7 = scalar_lea.hbm %s3451_s14, 1024 }
  0xc4   : > { %s373_s22 = sshll.u32 %s365_s21, 4  ;;  %p2970_p13 = scmp.ne.s32.totalorder %s3451_s14, %s2969_s7  ;;  %s3454_s22 = int_to_ptr.vmem [resolvable:$true] %s373_s22 }
  0xc5   : > { %s2974_s27 = scalar_lea.hbm %s3774_s2, 2048  ;;  %p2975_p9 = scmp.lt.u32.totalorder %s3451_s14, %s3774_s2 }
  0xc6   : > { %p2972_p7 = pnand %p2970_p13, %p3836_p8  ;;  %p2976_p12 = scmp.lt.u32.totalorder %s2974_s27, %s2969_s7 }
  0xc7   : > { %p2978_p6 = scmp.lt.u32.totalorder %s2969_s7, %s3451_s14 }
  0xc8   : > { %p2973_p10 = pneg %p2972_p7  ;;  %p2977_p1 = por %p2976_p12, %p2975_p9 }
  0xca   : > { %p2979_p3 = por %p2978_p6, %p2977_p1 }
  0xcc   : > { %p2980_p5 = pnand %p2979_p3, %p2973_p10 }
  0xce   : > { %2983 = shalt.err (!%p2980_p5)
}
  0xcf   : > { %s2984_s18 = scalar_lea.vmem %s3454_s22, 1024  ;;  %s3121_s3 = smov [#allocation8]  }
  0xd0   : > { %p2985_p2 = scmp.ne.s32.totalorder %s3454_s22, %s2984_s18  ;;  %s2989_s8 = sshll.u32 %s3121_s3, 4  ;;  %s2990_s8 = int_to_ptr.vmem [resolvable:$false] %s2989_s8 }
  0xd1   : > { %s2991_s20 = scalar_lea.vmem %s2990_s8, 2048  ;;  %p2992_p13 = scmp.lt.s32.totalorder %s3454_s22, %s2990_s8 }
  0xd2   : > { %p2987_p4 = pnand %p2985_p2, %p3836_p8  ;;  %p2993_p7 = scmp.lt.s32.totalorder %s2991_s20, %s2984_s18 }
  0xd4   : > { %p2988_p11 = pneg %p2987_p4  ;;  %p2994_p9 = por %p2993_p7, %p2992_p13 }
  0xd6   : > { %p2995_p12 = pnand %p2994_p9, %p2988_p11 }
  0xd8   : > { %2998 = shalt.err (!%p2995_p12)
}
  0xd9   : > { %2509 = dma.hbm_to_vmem [thread:$0]  (!%p3837_p0), %s3451_s14, 1024, %s3454_s22, %s3333_s5, %s3839_s16, %s3839_s16, %s3838_s25  }
  0xda   : > { %p3840_p8 = scmp.ne.s32.totalorder %s3819_s13, 0 }
  0xdb   : > { %s3484_s19 = sand.u32 (!%p3840_p8), 1, %s3101_s28   ;;  %p3841_p10 = scmp.ne.s32.totalorder (!%p3840_p8), %s3816_s11, 0 }
  0xdc   : > { %385 = sbr.rel (%p3840_p8) target bundleno = 3118 (0xc2e), region = 48  ;;  %s3487_s24 = sshll.u32 (!%p3840_p8), %s3484_s19, 6 }
  0xdd   : > { %s388_s15 = scalar_lea.sflag (!%p3840_p8), [#allocation4], %s3484_s19  ;;  %s3491_s17 = scalar_lea.vmem (!%p3840_p8), [#allocation3], %s3487_s24 }
  0xe3   : > { %3072 = dma.done.wait (%p3841_p10), %s388_s15, 1024  }
  0xe4   : > { %3074 = vsyncadd (%p3841_p10), %s388_s15, 4294966272  ;;  %s396_s5 = sand.u32 1, %s3196_s9   ;;  %s3499_s25 = scalar_lea.vmem [#allocation6], %s3487_s24 }
  0xe5   : > { %s397_s13 = scalar_lea.sflag [#allocation7], %s396_s5 }
  0xe6   : > { %3076 = dma.done.wait (%p3841_p10), %s397_s13, 2048  }
  0xe7   : > { %3078 = vsyncadd (%p3841_p10), %s397_s13, 4294965248  ;;  %s3506_s16 = scalar_lea.vmem [#allocation8], %s3487_s24  ;;  %p3842_p0 = scmp.eq.s32.totalorder %s3196_s9, 0 }
  0xe9   : > { %3080 = dma.done.wait (%p3842_p0), [#allocation10], 8192   ;;  %p3843_p1 = pmov %p3842_p0 }
  0xea   : > { %p3844_p6 = pmov %p3842_p0 }
  0xeb   : > { %3082 = vsyncadd (%p3843_p1), [#allocation10], 4294959104 }
  0xec   : > { %3084 = dma.done.wait (%p3844_p6), [#allocation13], 8192   ;;  %p3845_p3 = pmov %p3842_p0 }
  0xed   : > { %v2573_v0 = vld [vmem:[#allocation11 + $0x4] ss:$8 sps:$4 sm:$0xff]   ;;  %v2575_v1 = vld [vmem:[#allocation11] ss:$8 sps:$4 sm:$0xff]   ;;  %v2576_v2 = vld [vmem:[#allocation11 + $0x14] ss:$8 sps:$4 sm:$0xff]  }
  0xee   : > { %3086 = vsyncadd (%p3845_p3), [#allocation13], 4294959104  ;;  %964 = vmatprep.subr.bf16.mxu1 %v2573_v0  ;;  %v2578_v3 = vld [vmem:[#allocation9 + $0x4] ss:$8 sps:$4 sm:$0xff]   ;;  %v2580_v4 = vld [vmem:[#allocation11 + $0x10] ss:$8 sps:$4 sm:$0xff]  }
  0xef   : > { %965 = vmatpush1.bf16.msra.mxu1 %v2575_v1  ;;  %v2581_v5 = vld [vmem:[#allocation9] ss:$8 sps:$4 sm:$0xff]   ;;  %v2582_v6 = vld [vmem:[#allocation11 + $0x24] ss:$8 sps:$4 sm:$0xff]   ;;  %707 = vmatprep.subr.bf16.mxu0 %v2578_v3  ;;  %v2584_v7 = vld [vmem:[#allocation9 + $0x14] ss:$8 sps:$4 sm:$0xff]  }
  0xf0   : > { %966 = vmatprep.subr.bf16.mxu1 %v2576_v2  ;;  %708 = vmatpush1.bf16.msra.mxu0 %v2581_v5  ;;  %v2587_v8 = vld [vmem:[#allocation9 + $0x10] ss:$8 sps:$4 sm:$0xff]   ;;  %v2586_v9 = vld [vmem:[#allocation11 + $0x20] ss:$8 sps:$4 sm:$0xff]   ;;  %v2588_v10 = vld [vmem:[#allocation11 + $0x34] ss:$8 sps:$4 sm:$0xff]  }
  0xf1   : > { %709 = vmatprep.subr.bf16.mxu0 %v2584_v7  ;;  %v2590_v11 = vld [vmem:[#allocation9 + $0x24] ss:$8 sps:$4 sm:$0xff]   ;;  %v2593_v12 = vld [vmem:[#allocation9 + $0x20] ss:$8 sps:$4 sm:$0xff]   ;;  %v2592_v13 = vld [vmem:[#allocation11 + $0x30] ss:$8 sps:$4 sm:$0xff]  }
  0xf2   : > { %v2596_v14 = vld [vmem:[#allocation9 + $0x34] ss:$8 sps:$4 sm:$0xff]   ;;  %v2594_v15 = vld [vmem:[#allocation11 + $0x44] ss:$8 sps:$4 sm:$0xff]   ;;  %v2598_v16 = vld [vmem:[#allocation11 + $0x40] ss:$8 sps:$4 sm:$0xff]  }
  0xf3   : > { %967 = vmatpush1.bf16.msra.mxu1 %v2580_v4  ;;  %v2599_v17 = vld [vmem:[#allocation9 + $0x30] ss:$8 sps:$4 sm:$0xff]   ;;  %v2602_v18 = vld [vmem:[#allocation9 + $0x44] ss:$8 sps:$4 sm:$0xff]   ;;  %v2600_v19 = vld [vmem:[#allocation11 + $0x54] ss:$8 sps:$4 sm:$0xff]  }
  0xf4   : > { %968 = vmatprep.subr.bf16.mxu1 %v2582_v6  ;;  %710 = vmatpush1.bf16.msra.mxu0 %v2587_v8  ;;  %v2605_v20 = vld [vmem:[#allocation9 + $0x40] ss:$8 sps:$4 sm:$0xff]   ;;  %v2604_v21 = vld [vmem:[#allocation11 + $0x50] ss:$8 sps:$4 sm:$0xff]   ;;  %v2608_v22 = vld [vmem:[#allocation9 + $0x54] ss:$8 sps:$4 sm:$0xff]  }
  0xf5   : > { %711 = vmatprep.subr.bf16.mxu0 %v2590_v11  ;;  %v2606_v23 = vld [vmem:[#allocation11 + $0x64] ss:$8 sps:$4 sm:$0xff]   ;;  %v2610_v24 = vld [vmem:[#allocation11 + $0x60] ss:$8 sps:$4 sm:$0xff]   ;;  %v2611_v25 = vld [vmem:[#allocation9 + $0x50] ss:$8 sps:$4 sm:$0xff]  }
  0xf6   : > { %v2614_v26 = vld [vmem:[#allocation9 + $0x64] ss:$8 sps:$4 sm:$0xff]   ;;  %v2612_v27 = vld [vmem:[#allocation11 + $0x74] ss:$8 sps:$4 sm:$0xff]   ;;  %v2617_v28 = vld [vmem:[#allocation9 + $0x60] ss:$8 sps:$4 sm:$0xff]  }
  0xf7   : > { %969 = vmatpush1.bf16.msra.mxu1 %v2586_v9  ;;  %v2616_v29 = vld [vmem:[#allocation11 + $0x70] ss:$8 sps:$4 sm:$0xff]   ;;  %v2620_v30 = vld [vmem:[#allocation9 + $0x74] ss:$8 sps:$4 sm:$0xff]   ;;  %v2618_v31 = vld [vmem:[#allocation11 + $0x84] ss:$8 sps:$4 sm:$0xff]  }
  0xf8   : > { %970 = vmatprep.subr.bf16.mxu1 %v2588_v10  ;;  %712 = vmatpush1.bf16.msra.mxu0 %v2593_v12  ;;  %v2622_v32 = vld [vmem:[#allocation11 + $0x80] ss:$8 sps:$4 sm:$0xff]   ;;  %v2623_v33 = vld [vmem:[#allocation9 + $0x70] ss:$8 sps:$4 sm:$0xff]   ;;  %v2626_v34 = vld [vmem:[#allocation9 + $0x84] ss:$8 sps:$4 sm:$0xff]  }
  0xf9   : > { %713 = vmatprep.subr.bf16.mxu0 %v2596_v14  ;;  %v2624_v35 = vld [vmem:[#allocation11 + $0x94] ss:$8 sps:$4 sm:$0xff]   ;;  %v2629_v36 = vld [vmem:[#allocation9 + $0x80] ss:$8 sps:$4 sm:$0xff]   ;;  %v2628_v37 = vld [vmem:[#allocation11 + $0x90] ss:$8 sps:$4 sm:$0xff]  }
  0xfa   : > { %v2632_v38 = vld [vmem:[#allocation9 + $0x94] ss:$8 sps:$4 sm:$0xff]   ;;  %v2630_v39 = vld [vmem:[#allocation11 + $0xa4] ss:$8 sps:$4 sm:$0xff]   ;;  %v2634_v40 = vld [vmem:[#allocation11 + $0xa0] ss:$8 sps:$4 sm:$0xff]  }
  0xfb   : > { %971 = vmatpush1.bf16.msra.mxu1 %v2592_v13  ;;  %v2635_v41 = vld [vmem:[#allocation9 + $0x90] ss:$8 sps:$4 sm:$0xff]   ;;  %v2638_v42 = vld [vmem:[#allocation9 + $0xa4] ss:$8 sps:$4 sm:$0xff]   ;;  %v2636_v43 = vld [vmem:[#allocation11 + $0xb4] ss:$8 sps:$4 sm:$0xff]  }
  0xfc   : > { %972 = vmatprep.subr.bf16.mxu1 %v2594_v15  ;;  %714 = vmatpush1.bf16.msra.mxu0 %v2599_v17  ;;  %v492_v44 = vld [vmem:[%s3499_s25 + $0x8] sm:$0xff]  ;;  %v494_v45 = vld [vmem:[%s3499_s25 + $0x18] sm:$0xff]  ;;  %v491_v4 = vld [vmem:[%s3499_s25] sm:$0xff]  ;;  %vm3123_vm0 = vmmov 0   ;;  %vm1311_vm1 = vcmask 130048   ;;  %s3584_s11 = scalar_lea.vmem [#allocation16], %s3487_s24 }
  0xfd   : > { %715 = vmatprep.subr.bf16.mxu0 %v2602_v18  ;;  %v2640_v46 = vld [vmem:[#allocation11 + $0xb0] ss:$8 sps:$4 sm:$0xff]   ;;  %v2641_v47 = vld [vmem:[#allocation9 + $0xa0] ss:$8 sps:$4 sm:$0xff]   ;;  %v500_v48 = vpack.c.bf16 %v494_v45, %v492_v44  ;;  %v2642_v49 = vld [vmem:[#allocation11 + $0xc4] ss:$8 sps:$4 sm:$0xff]  }
  0xfe   : > { %v2644_v50 = vld [vmem:[#allocation9 + $0xb4] ss:$8 sps:$4 sm:$0xff]   ;;  %v2647_v51 = vld [vmem:[#allocation9 + $0xb0] ss:$8 sps:$4 sm:$0xff]   ;;  %v480_v52 = vld [vmem:[%s3491_s17 + $0x8] sm:$0xff]  ;;  %v3122_v18 = vmov 0.0  }
  0xff   : > { %973 = vmatpush1.bf16.msra.mxu1 %v2598_v16  ;;  %996 = vmatprep.mubr.bf16.mxu1 %v500_v48  ;;  %v482_v53 = vld [vmem:[%s3491_s17 + $0x18] sm:$0xff]  ;;  %v2646_v54 = vld [vmem:[#allocation11 + $0xc0] ss:$8 sps:$4 sm:$0xff]   ;;  %v2650_v55 = vld [vmem:[#allocation9 + $0xc4] ss:$8 sps:$4 sm:$0xff]   ;;  %s3650_s26 = scalar_lea.vmem [#allocation15], %s3487_s24 }
 0x100   : > { %974 = vmatprep.subr.bf16.mxu1 %v2600_v19  ;;  %716 = vmatpush1.bf16.msra.mxu0 %v2605_v20  ;;  %v488_v56 = vpack.c.bf16 %v482_v53, %v480_v52  ;;  %v2648_v57 = vld [vmem:[#allocation11 + $0xd4] ss:$8 sps:$4 sm:$0xff]   ;;  %v2653_v58 = vld [vmem:[#allocation9 + $0xc0] ss:$8 sps:$4 sm:$0xff]   ;;  %v2652_v59 = vld [vmem:[#allocation11 + $0xd0] ss:$8 sps:$4 sm:$0xff]  }
 0x101   : > { %717 = vmatprep.subr.bf16.mxu0 %v2608_v22  ;;  %v2656_v60 = vld [vmem:[#allocation9 + $0xd4] ss:$8 sps:$4 sm:$0xff]   ;;  %v2654_v61 = vld [vmem:[#allocation11 + $0xe4] ss:$8 sps:$4 sm:$0xff]   ;;  %v2659_v62 = vld [vmem:[#allocation9 + $0xd0] ss:$8 sps:$4 sm:$0xff]  }
 0x102   : > { %739 = vmatprep.mubr.bf16.mxu0 %v488_v56  ;;  %v2658_v63 = vld [vmem:[#allocation11 + $0xe0] ss:$8 sps:$4 sm:$0xff]   ;;  %v2662_v0 = vld [vmem:[#allocation9 + $0xe4] ss:$8 sps:$4 sm:$0xff]   ;;  %v2660_v1 = vld [vmem:[#allocation11 + $0xf4] ss:$8 sps:$4 sm:$0xff]  }
 0x103   : > { %975 = vmatpush1.bf16.msra.mxu1 %v2604_v21  ;;  %v2665_v2 = vld [vmem:[#allocation9 + $0xe0] ss:$8 sps:$4 sm:$0xff]   ;;  %v2664_v3 = vld [vmem:[#allocation11 + $0xf0] ss:$8 sps:$4 sm:$0xff]   ;;  %v2666_v6 = vld [vmem:[#allocation9 + $0xf4] ss:$8 sps:$4 sm:$0xff]  }
 0x104   : > { %976 = vmatprep.subr.bf16.mxu1 %v2606_v23  ;;  %718 = vmatpush1.bf16.msra.mxu0 %v2611_v25  ;;  %v493_v5 = vld [vmem:[%s3499_s25 + $0x10] sm:$0xff]  ;;  %v479_v8 = vld [vmem:[%s3491_s17] sm:$0xff]  ;;  %v496_v12 = vld [vmem:[%s3499_s25 + $0x28] sm:$0xff]  ;;  %s2394_s14 = sshll.u32 %s3196_s9, 10  ;;  %s3846_s7 = sld [smem:[#allocation33_spill]] }
 0x105   : > { %719 = vmatprep.subr.bf16.mxu0 %v2614_v26  ;;  %v2668_v7 = vld [vmem:[#allocation9 + $0xf0] ss:$8 sps:$4 sm:$0xff]   ;;  %v499_v10 = vpack.c.bf16 %v493_v5, %v491_v4  ;;  %v495_v15 = vld [vmem:[%s3499_s25 + $0x20] sm:$0xff]  ;;  %v484_v48 = vld [vmem:[%s3491_s17 + $0x28] sm:$0xff]  ;;  %s2024_s1 = sshll.u32 %s3584_s11, 4  ;;  %s1993_s27 = scalar_lea.sflag [#allocation17], %s3484_s19  ;;  %s3690_s1 = int_to_ptr.vmem [resolvable:$true] %s2024_s1 }
 0x106   : > { %v481_v9 = vld [vmem:[%s3491_s17 + $0x10] sm:$0xff]  ;;  %v498_v13 = vld [vmem:[%s3499_s25 + $0x38] sm:$0xff]  ;;  %v2677_v45 = vld [vmem:[#allocation12 + $0x24] ss:$8 sps:$4 sm:$0xff]   ;;  %s2999_s12 = scalar_lea.vmem %s3690_s1, 1024  ;;  %p3847_p2 = scmp.ne.s32.totalorder %s3826_s23, 0 }
 0x107   : > { %977 = vmatpush1.bf16.msra.mxu1 %v2610_v24  ;;  %v487_v11 = vpack.c.bf16 %v481_v9, %v479_v8  ;;  %v502_v14 = vpack.c.bf16 %v498_v13, %v496_v12  ;;  %v497_v16 = vld [vmem:[%s3499_s25 + $0x30] sm:$0xff]  ;;  %v504_v56 = vld [vmem:[%s3506_s16 + $0x8] sm:$0xff]  ;;  %p3000_p5 = scmp.ne.s32.totalorder %s3690_s1, %s2999_s12  ;;  %s3124_s10 = smov [#allocation16]  }
 0x108   : > { %978 = vmatprep.subr.bf16.mxu1 %v2612_v27  ;;  %720 = vmatpush1.bf16.msra.mxu0 %v2617_v28  ;;  %v501_v17 = vpack.c.bf16 %v497_v16, %v495_v15  ;;  %v2672_v44 = vld [vmem:[#allocation12 + $0x10] ss:$8 sps:$4 sm:$0xff]   ;;  %v2698_v4 = vld [vmem:[#allocation12 + $0x94] ss:$8 sps:$4 sm:$0xff]   ;;  %v2711_v15 = vld [vmem:[#allocation12 + $0xe0] ss:$8 sps:$4 sm:$0xff]  }
 0x109   : > { %721 = vmatprep.subr.bf16.mxu0 %v2620_v30  ;;  %v485_v52 = vld [vmem:[%s3491_s17 + $0x30] sm:$0xff]  ;;  %p3001_p4 = pnand %p3000_p5, %p3847_p2  ;;  %s3003_s18 = sshll.u32 %s3124_s10, 4  ;;  %s3004_s18 = int_to_ptr.vmem [resolvable:$false] %s3003_s18 }
 0x10a   : > { %v2678_v53 = vld [vmem:[#allocation12 + $0x30] ss:$8 sps:$4 sm:$0xff]   ;;  %v2704_v8 = vld [vmem:[#allocation12 + $0xb4] ss:$8 sps:$4 sm:$0xff]   ;;  %s3687_s30 = scalar_lea.hbm %s3846_s7, %s2394_s14  ;;  %s3005_s3 = scalar_lea.vmem %s3004_s18, 2048 }
 0x10b   : > { %979 = vmatpush1.bf16.msra.mxu1 %v2616_v29  ;;  %v2696_v5 = vld [vmem:[#allocation12 + $0x90] ss:$8 sps:$4 sm:$0xff]   ;;  %v2710_v12 = vld [vmem:[#allocation12 + $0xd4] ss:$8 sps:$4 sm:$0xff]   ;;  %p3002_p11 = pneg %p3001_p4  ;;  %p3006_p13 = scmp.lt.s32.totalorder %s3690_s1, %s3004_s18 }
 0x10c   : > { %980 = vmatprep.subr.bf16.mxu1 %v2618_v31  ;;  %722 = vmatpush1.bf16.msra.mxu0 %v2623_v33  ;;  %v2702_v9 = vld [vmem:[#allocation12 + $0xb0] ss:$8 sps:$4 sm:$0xff]   ;;  %v2716_v16 = vld [vmem:[#allocation12 + $0xf4] ss:$8 sps:$4 sm:$0xff]   ;;  %p3007_p7 = scmp.lt.s32.totalorder %s3005_s3, %s2999_s12 }
 0x10d   : > { %723 = vmatprep.subr.bf16.mxu0 %v2626_v34  ;;  %v2708_v13 = vld [vmem:[#allocation12 + $0xd0] ss:$8 sps:$4 sm:$0xff]  }
 0x10e   : > { %p3008_p9 = por %p3007_p7, %p3006_p13 }
 0x10f   : > { %981 = vmatpush1.bf16.msra.mxu1 %v2622_v32 }
 0x110   : > { %982 = vmatprep.subr.bf16.mxu1 %v2624_v35  ;;  %724 = vmatpush1.bf16.msra.mxu0 %v2629_v36  ;;  %p3009_p12 = pnand %p3008_p9, %p3002_p11 }
 0x111   : > { %725 = vmatprep.subr.bf16.mxu0 %v2632_v38 }
 0x113   : > { %983 = vmatpush1.bf16.msra.mxu1 %v2628_v37 }
 0x114   : > { %984 = vmatprep.subr.bf16.mxu1 %v2630_v39  ;;  %726 = vmatpush1.bf16.msra.mxu0 %v2635_v41  ;;  %v2669_v41 = vld [vmem:[#allocation12] ss:$8 sps:$4 sm:$0xff]  }
 0x115   : > { %727 = vmatprep.subr.bf16.mxu0 %v2638_v42  ;;  %v2671_v42 = vld [vmem:[#allocation12 + $0x4] ss:$8 sps:$4 sm:$0xff]  }
 0x117   : > { %985 = vmatpush1.bf16.msra.mxu1 %v2634_v40 }
 0x118   : > { %986 = vmatprep.subr.bf16.mxu1 %v2636_v43  ;;  %728 = vmatpush1.bf16.msra.mxu0 %v2641_v47  ;;  %v2674_v43 = vld [vmem:[#allocation12 + $0x14] ss:$8 sps:$4 sm:$0xff]  }
 0x119   : > { %729 = vmatprep.subr.bf16.mxu0 %v2644_v50  ;;  %v2680_v47 = vld [vmem:[#allocation12 + $0x34] ss:$8 sps:$4 sm:$0xff]  }
 0x11b   : > { %987 = vmatpush1.bf16.msra.mxu1 %v2640_v46  ;;  %v2675_v46 = vld [vmem:[#allocation12 + $0x20] ss:$8 sps:$4 sm:$0xff]  }
 0x11c   : > { %988 = vmatprep.subr.bf16.mxu1 %v2642_v49  ;;  %730 = vmatpush1.bf16.msra.mxu0 %v2647_v51  ;;  %v486_v49 = vld [vmem:[%s3491_s17 + $0x38] sm:$0xff]  ;;  %v483_v51 = vld [vmem:[%s3491_s17 + $0x20] sm:$0xff] }
 0x11d   : > { %731 = vmatprep.subr.bf16.mxu0 %v2650_v55  ;;  %v490_v50 = vpack.c.bf16 %v486_v49, %v484_v48  ;;  %v2683_v55 = vld [vmem:[#allocation12 + $0x44] ss:$8 sps:$4 sm:$0xff]  }
 0x11f   : > { %989 = vmatpush1.bf16.msra.mxu1 %v2646_v54  ;;  %v489_v54 = vpack.c.bf16 %v485_v52, %v483_v51 }
 0x120   : > { %990 = vmatprep.subr.bf16.mxu1 %v2648_v57  ;;  %732 = vmatpush1.bf16.msra.mxu0 %v2653_v58  ;;  %v506_v57 = vld [vmem:[%s3506_s16 + $0x18] sm:$0xff] }
 0x121   : > { %733 = vmatprep.subr.bf16.mxu0 %v2656_v60  ;;  %v512_v58 = vpack.c.bf16 %v506_v57, %v504_v56  ;;  %v2686_v60 = vld [vmem:[#allocation12 + $0x54] ss:$8 sps:$4 sm:$0xff]  }
 0x123   : > { %991 = vmatpush1.bf16.msra.mxu1 %v2652_v59  ;;  %v2681_v59 = vld [vmem:[#allocation12 + $0x40] ss:$8 sps:$4 sm:$0xff]  }
 0x124   : > { %992 = vmatprep.subr.bf16.mxu1 %v2654_v61  ;;  %734 = vmatpush1.bf16.msra.mxu0 %v2659_v62  ;;  %v2684_v61 = vld [vmem:[#allocation12 + $0x50] ss:$8 sps:$4 sm:$0xff]   ;;  %v2689_v62 = vld [vmem:[#allocation12 + $0x64] ss:$8 sps:$4 sm:$0xff]  }
 0x125   : > { %735 = vmatprep.subr.bf16.mxu0 %v2662_v0  ;;  %v2692_v0 = vld [vmem:[#allocation12 + $0x74] ss:$8 sps:$4 sm:$0xff]  }
 0x127   : > { %993 = vmatpush1.bf16.msra.mxu1 %v2658_v63  ;;  %v2687_v63 = vld [vmem:[#allocation12 + $0x60] ss:$8 sps:$4 sm:$0xff]  }
 0x128   : > { %994 = vmatprep.subr.bf16.mxu1 %v2660_v1  ;;  %736 = vmatpush1.bf16.msra.mxu0 %v2665_v2  ;;  %v2690_v1 = vld [vmem:[#allocation12 + $0x70] ss:$8 sps:$4 sm:$0xff]   ;;  %v2695_v2 = vld [vmem:[#allocation12 + $0x84] ss:$8 sps:$4 sm:$0xff]  }
 0x129   : > { %737 = vmatprep.subr.bf16.mxu0 %v2666_v6  ;;  %v2701_v6 = vld [vmem:[#allocation12 + $0xa4] ss:$8 sps:$4 sm:$0xff]  }
 0x12b   : > { %995 = vmatpush1.bf16.msra.mxu1 %v2664_v3  ;;  %v2693_v3 = vld [vmem:[#allocation12 + $0x80] ss:$8 sps:$4 sm:$0xff]  }
 0x12c   : > { %738 = vmatpush1.bf16.msra.mxu0 %v2668_v7  ;;  %2413 = vmatprep.subr.bf16.mxu1 %v3122_v18  ;;  %v2699_v7 = vld [vmem:[#allocation12 + $0xa0] ss:$8 sps:$4 sm:$0xff]  }
 0x12d   : > { %1213 = vmatprep.subr.bf16.mxu0 %v2671_v42 }
 0x12e   : > { %997 = vmatmul.mubr.bf16.vlgmr.msra.gmra.mrb[0].mxu1 %v499_v10  ;;  %v2707_v10 = vld [vmem:[#allocation12 + $0xc4] ss:$8 sps:$4 sm:$0xff]  }
 0x12f   : > { %740 = vmatmul.mubr.bf16.vlgmr.msra.gmra.mrb[0].mxu0 %v487_v11  ;;  %1006 = vmatprep.mubr.bf16.mxu1 %v502_v14  ;;  %v2705_v11 = vld [vmem:[#allocation12 + $0xc0] ss:$8 sps:$4 sm:$0xff]   ;;  %v2713_v14 = vld [vmem:[#allocation12 + $0xe4] ss:$8 sps:$4 sm:$0xff]  }
 0x130   : > { %1214 = vmatpush1.bf16.msra.mxu0 %v2669_v41  ;;  %749 = vmatprep.mubr.bf16.mxu0 %v490_v50 }
 0x131   : > { %1215 = vmatprep.subr.bf16.mxu0 %v2674_v43 }
 0x134   : > { %1216 = vmatpush1.bf16.msra.mxu0 %v2672_v44 }
 0x135   : > { %1217 = vmatprep.subr.bf16.mxu0 %v2677_v45 }
 0x136   : > { %1007 = vmatmul.mubr.bf16.gmra.mrb[4].mxu1 %v501_v17  ;;  %v2714_v17 = vld [vmem:[#allocation12 + $0xf0] ss:$8 sps:$4 sm:$0xff]  }
 0x137   : > { %2415 = vmatprep.mubr.msk.bf16.mxu1 %vm3123_vm0, %v3122_v18  ;;  %750 = vmatmul.mubr.bf16.gmra.mrb[4].mxu0 %v489_v54 }
 0x138   : > { %1218 = vmatpush1.bf16.msra.mxu0 %v2675_v46  ;;  %1245 = vmatprep.mubr.bf16.mxu0 %v512_v58 }
 0x139   : > { %1219 = vmatprep.subr.bf16.mxu0 %v2680_v47 }
 0x13c   : > { %1220 = vmatpush1.bf16.msra.mxu0 %v2678_v53 }
 0x13d   : > { %1221 = vmatprep.subr.bf16.mxu0 %v2683_v55 }
 0x140   : > { %1222 = vmatpush1.bf16.msra.mxu0 %v2681_v59 }
 0x141   : > { %1223 = vmatprep.subr.bf16.mxu0 %v2686_v60 }
 0x144   : > { %1224 = vmatpush1.bf16.msra.mxu0 %v2684_v61 }
 0x145   : > { %1225 = vmatprep.subr.bf16.mxu0 %v2689_v62 }
 0x148   : > { %1226 = vmatpush1.bf16.msra.mxu0 %v2687_v63 }
 0x149   : > { %1227 = vmatprep.subr.bf16.mxu0 %v2692_v0 }
 0x14c   : > { %1228 = vmatpush1.bf16.msra.mxu0 %v2690_v1 }
 0x14d   : > { %1229 = vmatprep.subr.bf16.mxu0 %v2695_v2 }
 0x150   : > { %1230 = vmatpush1.bf16.msra.mxu0 %v2693_v3 }
 0x151   : > { %1231 = vmatprep.subr.bf16.mxu0 %v2698_v4 }
 0x154   : > { %1232 = vmatpush1.bf16.msra.mxu0 %v2696_v5 }
 0x155   : > { %1233 = vmatprep.subr.bf16.mxu0 %v2701_v6 }
 0x158   : > { %1234 = vmatpush1.bf16.msra.mxu0 %v2699_v7 }
 0x159   : > { %1235 = vmatprep.subr.bf16.mxu0 %v2704_v8 }
 0x15c   : > { %1236 = vmatpush1.bf16.msra.mxu0 %v2702_v9 }
 0x15d   : > { %1237 = vmatprep.subr.bf16.mxu0 %v2707_v10 }
 0x160   : > { %1238 = vmatpush1.bf16.msra.mxu0 %v2705_v11 }
 0x161   : > { %1239 = vmatprep.subr.bf16.mxu0 %v2710_v12 }
 0x164   : > { %1240 = vmatpush1.bf16.msra.mxu0 %v2708_v13 }
 0x165   : > { %1241 = vmatprep.subr.bf16.mxu0 %v2713_v14 }
 0x168   : > { %1242 = vmatpush1.bf16.msra.mxu0 %v2711_v15 }
 0x169   : > { %1243 = vmatprep.subr.bf16.mxu0 %v2716_v16 }
 0x16c   : > { %1244 = vmatpush1.bf16.msra.mxu0 %v2714_v17 }
 0x201   : > { %v998_v19 = vpop.f32.mrb[0].mxu1 }
 0x202   : > { %v3531_v20 = vpop.f32.mrb[1].mxu1  ;;  %v741_v24 = vpop.f32.mrb[0].mxu0 }
 0x203   : > { %v1002_v21 = vpop.f32.mrb[2].mxu1  ;;  %v760_v26 = vmul.f32 0.0625, %v741_v24  ;;  %v743_v27 = vpop.f32.mrb[1].mxu0 }
 0x204   : > { %v1017_v22 = vpack.c.bf16 %v1002_v21, %v998_v19  ;;  %v3533_v23 = vpop.f32.mrb[3].mxu1  ;;  %v3537_v28 = vmul.f32 0.0625, %v743_v27  ;;  %v745_v29 = vpop.f32.mrb[2].mxu0  ;;  %v503_v19 = vld [vmem:[%s3506_s16] sm:$0xff]  ;;  %v505_v21 = vld [vmem:[%s3506_s16 + $0x10] sm:$0xff] }
 0x205   : > { %v1018_v25 = vpack.c.bf16 %v3533_v23, %v3531_v20  ;;  %v762_v30 = vmul.f32 0.0625, %v745_v29  ;;  %v747_v31 = vpop.f32.mrb[3].mxu0 }
 0x206   : > { %2414 = vmatpush3.bf16.xpose.msra.mxu1 %v1017_v22  ;;  %v3540_v32 = vmul.f32 0.0625, %v747_v31  ;;  %v511_v22 = vpack.c.bf16 %v505_v21, %v503_v19 }
 0x207   : > { %2419 = vmatprep.subr.bf16.mxu1 %v3122_v18  ;;  %v768_v33 = vpack.c.bf16 %v762_v30, %v760_v26 }
 0x208   : > { %v769_v34 = vpack.c.bf16 %v3540_v32, %v3537_v28  ;;  %1246 = vmatmul.mubr.bf16.vlgmr.msra.gmra.mrb[8].mxu0 %v511_v22 }
 0x209   : > { %v3546_v35 = vpop.f32.mrb[4].mxu1 }
 0x20a   : > { %v3548_v36 = vpop.f32.mrb[5].mxu1  ;;  %v751_v50 = vpop.f32.mrb[4].mxu0 }
 0x20b   : > { %v3550_v37 = vpop.f32.mrb[6].mxu1  ;;  %v753_v51 = vpop.f32.mrb[5].mxu0  ;;  %v3570_v54 = vmul.f32 0.0625, %v751_v50 }
 0x20c   : > { %v1019_v38 = vpack.c.bf16 %v3550_v37, %v3546_v35  ;;  %v3554_v39 = vpop.f32.mrb[7].mxu1  ;;  %v755_v52 = vpop.f32.mrb[6].mxu0  ;;  %v3572_v55 = vmul.f32 0.0625, %v753_v51  ;;  %v2731_v51 = vld [vmem:[#allocation14 + $0x44] ss:$8 sps:$4 sm:$0xff]  }
 0x20d   : > { %2416 = vmatmul.mubr.bf16.vlgmr.msra.gmra.mrb[8].mxu1 %v768_v33  ;;  %v1020_v40 = vpack.c.bf16 %v3554_v39, %v3548_v36  ;;  %v757_v53 = vpop.f32.mrb[7].mxu0  ;;  %v3574_v56 = vmul.f32 0.0625, %v755_v52  ;;  %v2729_v52 = vld [vmem:[#allocation14 + $0x40] ss:$8 sps:$4 sm:$0xff]  }
 0x20e   : > { %2421 = vmatprep.mubr.msk.bf16.mxu1 %vm3123_vm0, %v3122_v18  ;;  %v3576_v57 = vmul.f32 0.0625, %v757_v53  ;;  %v2734_v53 = vld [vmem:[#allocation14 + $0x54] ss:$8 sps:$4 sm:$0xff]  }
 0x20f   : > { %v770_v58 = vpack.c.bf16 %v3574_v56, %v3570_v54 }
 0x210   : > { %v771_v59 = vpack.c.bf16 %v3576_v57, %v3572_v55 }
 0x2db   : > { %v1247_v60 = vpop.f32.mrb[8].mxu0 }
 0x2dc   : > { %v1249_v61 = vpop.f32.mrb[9].mxu0 }
 0x2dd   : > { %v1251_v62 = vpop.f32.mrb[10].mxu0 }
 0x2de   : > { %v1253_v63 = vpop.f32.mrb[11].mxu0  ;;  %v1266_v0 = vpack.c.bf16 %v1251_v62, %v1247_v60  ;;  %v2732_v60 = vld [vmem:[#allocation14 + $0x50] ss:$8 sps:$4 sm:$0xff]   ;;  %v2735_v62 = vld [vmem:[#allocation14 + $0x60] ss:$8 sps:$4 sm:$0xff]  }
 0x2df   : > { %v1267_v1 = vpack.c.bf16 %v1253_v63, %v1249_v61  ;;  %v2737_v61 = vld [vmem:[#allocation14 + $0x64] ss:$8 sps:$4 sm:$0xff]   ;;  %v2740_v63 = vld [vmem:[#allocation14 + $0x74] ss:$8 sps:$4 sm:$0xff]  }
 0x2e0   : > { %v1304_v24 = vpop.f32.mrb[8].mxu1  ;;  %2420 = vmatpush3.bf16.msra.mxu1 %v1266_v0  ;;  %v2738_v0 = vld [vmem:[#allocation14 + $0x70] ss:$8 sps:$4 sm:$0xff]  }
 0x2e1   : > { %v1312_v26 = vsel %vm1311_vm1, %v1304_v24, -inf  ;;  %v2417_v27 = vpop.f32.mrb[9].mxu1  ;;  %2425 = vmatprep.subr.bf16.mxu1 %v3122_v18 }
 0x2e2   : > { %1313 = vmax.xlane.f32.xlu0 %v1312_v26  ;;  %v1307_v29 = vpop.f32.mrb[10].mxu1 }
 0x2e3   : > { %v2418_v30 = vpop.f32.mrb[11].mxu1  ;;  %v1315_v31 = vsel %vm1311_vm1, %v1307_v29, -inf }
 0x2e4   : > { %v2719_v30 = vld [vmem:[#allocation14 + $0x4] ss:$8 sps:$4 sm:$0xff]  }
 0x2e5   : > { %1926 = vmatprep.subr.bf16.mxu0 %v2719_v30 }
 0x2e6   : > { %1316 = vmax.xlane.f32.xlu0 %v1315_v31  ;;  %v2722_v31 = vld [vmem:[#allocation14 + $0x14] ss:$8 sps:$4 sm:$0xff]  }
 0x36f   : > { %v1314_v33 = vpop.xlane.xlu0 %1313 }
 0x370   : > { %v1318_v41 = vsub.f32 %v1304_v24, %v1314_v33  ;;  %v2720_v33 = vld [vmem:[#allocation14 + $0x10] ss:$8 sps:$4 sm:$0xff]  }
 0x372   : > { %v1320_v42 = vmul.f32 1.442695, %v1318_v41  ;;  %v2725_v41 = vld [vmem:[#allocation14 + $0x24] ss:$8 sps:$4 sm:$0xff]  }
 0x373   : > { %v1317_v43 = vpop.xlane.xlu0 %1316 }
 0x374   : > { %2765 = vpow2.f32 %v1320_v42  ;;  %v1319_v44 = vsub.f32 %v1307_v29, %v1317_v43  ;;  %v2717_v29 = vld [vmem:[#allocation14] ss:$8 sps:$4 sm:$0xff]   ;;  %v2728_v43 = vld [vmem:[#allocation14 + $0x34] ss:$8 sps:$4 sm:$0xff]  }
 0x375   : > { %1927 = vmatpush1.bf16.msra.mxu0 %v2717_v29  ;;  %v2723_v42 = vld [vmem:[#allocation14 + $0x20] ss:$8 sps:$4 sm:$0xff]  }
 0x376   : > { %v1322_v45 = vmul.f32 1.442695, %v1319_v44  ;;  %1928 = vmatprep.subr.bf16.mxu0 %v2722_v31  ;;  %v508_v44 = vld [vmem:[%s3506_s16 + $0x28] sm:$0xff] }
 0x378   : > { %2767 = vpow2.f32 %v1322_v45  ;;  %v510_v45 = vld [vmem:[%s3506_s16 + $0x38] sm:$0xff] }
 0x379   : > { %1929 = vmatpush1.bf16.msra.mxu0 %v2720_v33 }
 0x37a   : > { %1930 = vmatprep.subr.bf16.mxu0 %v2725_v41 }
 0x37d   : > { %1931 = vmatpush1.bf16.msra.mxu0 %v2723_v42 }
 0x37e   : > { %v2766_v46 = vpop.eup %2765  ;;  %1932 = vmatprep.subr.bf16.mxu0 %v2728_v43 }
 0x37f   : > { %v1324_v47 = vsel %vm1311_vm1, %v2766_v46, 0.0 }
 0x380   : > { %1325 = vadd.xlane.f32.xlu1 %v1324_v47  ;;  %v507_v47 = vld [vmem:[%s3506_s16 + $0x20] sm:$0xff] }
 0x382   : > { %v2768_v48 = vpop.eup %2767 }
 0x383   : > { %v1327_v49 = vsel %vm1311_vm1, %v2768_v48, 0.0 }
 0x384   : > { %1328 = vadd.xlane.f32.xlu1 %v1327_v49  ;;  %v2726_v49 = vld [vmem:[#allocation14 + $0x30] ss:$8 sps:$4 sm:$0xff]  }
 0x385   : > { %1933 = vmatpush1.bf16.msra.mxu0 %v2726_v49 }
 0x386   : > { %1934 = vmatprep.subr.bf16.mxu0 %v2731_v51 }
 0x389   : > { %1935 = vmatpush1.bf16.msra.mxu0 %v2729_v52 }
 0x38a   : > { %1936 = vmatprep.subr.bf16.mxu0 %v2734_v53 }
 0x38d   : > { %1937 = vmatpush1.bf16.msra.mxu0 %v2732_v60 }
 0x38e   : > { %1938 = vmatprep.subr.bf16.mxu0 %v2737_v61 }
 0x391   : > { %1939 = vmatpush1.bf16.msra.mxu0 %v2735_v62 }
 0x392   : > { %1940 = vmatprep.subr.bf16.mxu0 %v2740_v63 }
 0x395   : > { %1941 = vmatpush1.bf16.msra.mxu0 %v2738_v0 }
 0x40d   : > { %v1326_v2 = vpop.xlane.xlu1 %1325 }
 0x40e   : > { %2769 = vrcp.f32 %v1326_v2  ;;  %v2741_v2 = vld [vmem:[#allocation14 + $0x80] ss:$8 sps:$4 sm:$0xff]  }
 0x411   : > { %v1329_v3 = vpop.xlane.xlu1 %1328 }
 0x412   : > { %2771 = vrcp.f32 %v1329_v3  ;;  %v2746_v3 = vld [vmem:[#allocation14 + $0x94] ss:$8 sps:$4 sm:$0xff]  }
 0x418   : > { %v2770_v4 = vpop.eup %2769 }
 0x419   : > { %v1334_v5 = vmul.f32 %v2770_v4, %v2766_v46  ;;  %v514_v46 = vpack.c.bf16 %v510_v45, %v508_v44  ;;  %v2744_v4 = vld [vmem:[#allocation14 + $0x90] ss:$8 sps:$4 sm:$0xff]  }
 0x41b   : > { %1336 = vst.msk [vmem:[%s3584_s11] sm:$0xff] %vm1311_vm1, %v1334_v5  ;;  %1255 = vmatprep.mubr.bf16.mxu0 %v514_v46 }
 0x41c   : > { %v2772_v6 = vpop.eup %2771 }
 0x41d   : > { %v1335_v7 = vmul.f32 %v2772_v6, %v2768_v48  ;;  %v509_v48 = vld [vmem:[%s3506_s16 + $0x30] sm:$0xff]  ;;  %v2747_v6 = vld [vmem:[#allocation14 + $0xa0] ss:$8 sps:$4 sm:$0xff]  }
 0x41e   : > { %v513_v50 = vpack.c.bf16 %v509_v48, %v507_v47 }
 0x41f   : > { %1337 = vst.msk [vmem:[%s3584_s11 + $0x8] sm:$0xff] %vm1311_vm1, %v1335_v7  ;;  %v1338_v8 = vpack.c.bf16 %v1335_v7, %v1334_v5  ;;  %v2749_v5 = vld [vmem:[#allocation14 + $0xa4] ss:$8 sps:$4 sm:$0xff]   ;;  %v2752_v7 = vld [vmem:[#allocation14 + $0xb4] ss:$8 sps:$4 sm:$0xff]  }
 0x420   : > { %1256 = vmatmul.mubr.bf16.gmra.mrb[12].mxu0 %v513_v50 }
 0x421   : > { %2422 = vmatmul.mubr.msk.bf16.vlgmr.msra.gmra.mrb[12].mxu1 %vm1311_vm1, %v1338_v8  ;;  %v2750_v8 = vld [vmem:[#allocation14 + $0xb0] ss:$8 sps:$4 sm:$0xff]  }
 0x422   : > { %2426 = vmatpush3.bf16.xpose.msra.mxu1 %v1018_v25  ;;  %2427 = vmatprep.mubr.msk.bf16.mxu1 %vm3123_vm0, %v3122_v18 }
 0x423   : > { %2431 = vmatprep.subr.bf16.mxu1 %v3122_v18 }
 0x429   : > { %2428 = vmatmul.mubr.bf16.vlgmr.msra.gmra.mrb[16].mxu1 %v769_v34 }
 0x42a   : > { %2432 = vmatpush3.bf16.msra.mxu1 %v1267_v1  ;;  %2433 = vmatprep.mubr.msk.bf16.mxu1 %vm3123_vm0, %v3122_v18  ;;  %v2743_v1 = vld [vmem:[#allocation14 + $0x84] ss:$8 sps:$4 sm:$0xff]  }
 0x42b   : > { %2437 = vmatprep.subr.bf16.mxu1 %v3122_v18  ;;  %1942 = vmatprep.subr.bf16.mxu0 %v2743_v1 }
 0x42c   : > { %1943 = vmatpush1.bf16.msra.mxu0 %v2741_v2 }
 0x42d   : > { %1944 = vmatprep.subr.bf16.mxu0 %v2746_v3 }
 0x430   : > { %1945 = vmatpush1.bf16.msra.mxu0 %v2744_v4 }
 0x431   : > { %1946 = vmatprep.subr.bf16.mxu0 %v2749_v5 }
 0x434   : > { %1947 = vmatpush1.bf16.msra.mxu0 %v2747_v6 }
 0x435   : > { %1948 = vmatprep.subr.bf16.mxu0 %v2752_v7 }
 0x438   : > { %1949 = vmatpush1.bf16.msra.mxu0 %v2750_v8 }
 0x4f3   : > { %v1257_v31 = vpop.f32.mrb[12].mxu0 }
 0x4f4   : > { %v3603_v9 = vpop.f32.mrb[12].mxu1  ;;  %v1259_v33 = vpop.f32.mrb[13].mxu0 }
 0x4f5   : > { %v2423_v10 = vpop.f32.mrb[13].mxu1  ;;  %v1261_v41 = vpop.f32.mrb[14].mxu0 }
 0x4f6   : > { %v3605_v20 = vpop.f32.mrb[14].mxu1  ;;  %v2755_v10 = vld [vmem:[#allocation14 + $0xc4] ss:$8 sps:$4 sm:$0xff]   ;;  %v1268_v42 = vpack.c.bf16 %v1261_v41, %v1257_v31  ;;  %v1263_v43 = vpop.f32.mrb[15].mxu0 }
 0x4f7   : > { %v1383_v23 = vpack.c.bf16 %v3605_v20, %v3603_v9  ;;  %v2424_v25 = vpop.f32.mrb[15].mxu1  ;;  %1950 = vmatprep.subr.bf16.mxu0 %v2755_v10  ;;  %v1269_v44 = vpack.c.bf16 %v1263_v43, %v1259_v33 }
 0x4f8   : > { %v2753_v25 = vld [vmem:[#allocation14 + $0xc0] ss:$8 sps:$4 sm:$0xff]  }
 0x4f9   : > { %1951 = vmatpush1.bf16.msra.mxu0 %v2753_v25 }
 0x4fc   : > { %v1419_v11 = vpop.f32.mrb[16].mxu1 }
 0x4fd   : > { %v2429_v12 = vpop.f32.mrb[17].mxu1  ;;  %v1426_v28 = vsel %vm1311_vm1, %v1419_v11, -inf }
 0x4fe   : > { %1427 = vmax.xlane.f32.xlu0 %v1426_v28  ;;  %v1422_v32 = vpop.f32.mrb[18].mxu1  ;;  %v2756_v12 = vld [vmem:[#allocation14 + $0xd0] ss:$8 sps:$4 sm:$0xff]   ;;  %v2761_v28 = vld [vmem:[#allocation14 + $0xe4] ss:$8 sps:$4 sm:$0xff]  }
 0x4ff   : > { %v2430_v34 = vpop.f32.mrb[19].mxu1  ;;  %v1429_v13 = vsel %vm1311_vm1, %v1422_v32, -inf }
 0x500   : > { %1430 = vmax.xlane.f32.xlu1 %v1429_v13 }
 0x58b   : > { %v1428_v14 = vpop.xlane.xlu0 %1427 }
 0x58c   : > { %v1432_v15 = vsub.f32 %v1419_v11, %v1428_v14  ;;  %v2758_v11 = vld [vmem:[#allocation14 + $0xd4] ss:$8 sps:$4 sm:$0xff]  }
 0x58d   : > { %v1431_v16 = vpop.xlane.xlu1 %1430  ;;  %1952 = vmatprep.subr.bf16.mxu0 %v2758_v11 }
 0x58e   : > { %v1434_v17 = vmul.f32 1.442695, %v1432_v15  ;;  %v1433_v19 = vsub.f32 %v1422_v32, %v1431_v16  ;;  %1953 = vmatpush1.bf16.msra.mxu0 %v2756_v12  ;;  %v2759_v32 = vld [vmem:[#allocation14 + $0xe0] ss:$8 sps:$4 sm:$0xff]  }
 0x58f   : > { %1954 = vmatprep.subr.bf16.mxu0 %v2761_v28 }
 0x590   : > { %2773 = vpow2.f32 %v1434_v17  ;;  %v1436_v21 = vmul.f32 1.442695, %v1433_v19 }
 0x592   : > { %2775 = vpow2.f32 %v1436_v21  ;;  %1955 = vmatpush1.bf16.msra.mxu0 %v2759_v32  ;;  %v2764_v21 = vld [vmem:[#allocation14 + $0xf4] ss:$8 sps:$4 sm:$0xff]  }
 0x593   : > { %1956 = vmatprep.subr.bf16.mxu0 %v2764_v21 }
 0x59a   : > { %v3611_v22 = vpop.eup %2773 }
 0x59b   : > { %v1438_v24 = vsel %vm1311_vm1, %v3611_v22, 0.0 }
 0x59c   : > { %v3615_v26 = vpop.eup %2775  ;;  %1439 = vadd.xlane.f32.xlu0 %v1438_v24 }
 0x59d   : > { %v1441_v27 = vsel %vm1311_vm1, %v3615_v26, 0.0 }
 0x59e   : > { %1442 = vadd.xlane.f32.xlu1 %v1441_v27 }
 0x629   : > { %v1440_v34 = vpop.xlane.xlu0 %1439 }
 0x62a   : > { %2777 = vrcp.f32 %v1440_v34 }
 0x62b   : > { %v1443_v13 = vpop.xlane.xlu1 %1442 }
 0x62c   : > { %2779 = vrcp.f32 %v1443_v13 }
 0x634   : > { %v2778_v14 = vpop.eup %2777 }
 0x635   : > { %v1448_v15 = vmul.f32 %v2778_v14, %v3611_v22  ;;  %v2762_v22 = vld [vmem:[#allocation14 + $0xf0] ss:$8 sps:$4 sm:$0xff]  }
 0x636   : > { %v2780_v16 = vpop.eup %2779  ;;  %1957 = vmatpush1.bf16.msra.mxu0 %v2762_v22 }
 0x637   : > { %2336 = vst.msk [vmem:[%s3584_s11 + $0x10] sm:$0xff] %vm1311_vm1, %v1448_v15  ;;  %v1449_v17 = vmul.f32 %v2780_v16, %v3615_v26 }
 0x639   : > { %2337 = vst.msk [vmem:[%s3584_s11 + $0x18] sm:$0xff] %vm1311_vm1, %v1449_v17  ;;  %v1453_v19 = vpack.c.bf16 %v1449_v17, %v1448_v15 }
 0x63b   : > { %2434 = vmatmul.mubr.msk.bf16.vlgmr.msra.gmra.mrb[20].mxu1 %vm1311_vm1, %v1453_v19 }
 0x63c   : > { %2438 = vmatpush3.bf16.xpose.msra.mxu1 %v1019_v38  ;;  %2439 = vmatprep.mubr.msk.bf16.mxu1 %vm3123_vm0, %v3122_v18 }
 0x63d   : > { %2443 = vmatprep.subr.bf16.mxu1 %v3122_v18 }
 0x643   : > { %2440 = vmatmul.mubr.bf16.vlgmr.msra.gmra.mrb[24].mxu1 %v770_v58 }
 0x644   : > { %2445 = vmatprep.mubr.msk.bf16.mxu1 %vm3123_vm0, %v3122_v18  ;;  %2444 = vmatpush3.bf16.msra.mxu1 %v1268_v42 }
 0x645   : > { %2449 = vmatprep.subr.bf16.mxu1 %v3122_v18 }
 0x70e   : > { %v1491_v24 = vpop.f32.mrb[20].mxu1 }
 0x70f   : > { %v2435_v26 = vpop.f32.mrb[21].mxu1 }
 0x710   : > { %v1494_v35 = vpop.f32.mrb[22].mxu1 }
 0x711   : > { %v1498_v37 = vpack.c.bf16 %v1494_v35, %v1491_v24  ;;  %v2436_v38 = vpop.f32.mrb[23].mxu1 }
 0x713   : > { %1958 = vmatprep.mubr.bf16.mxu0 %v1498_v37 }
 0x714   : > { %1959 = vmatmul.mubr.bf16.vlgmr.msra.gmra.mrb[16].mxu0 %v1383_v23 }
 0x716   : > { %v1534_v27 = vpop.f32.mrb[24].mxu1 }
 0x717   : > { %v2441_v54 = vpop.f32.mrb[25].mxu1  ;;  %v1541_v56 = vsel %vm1311_vm1, %v1534_v27, -inf }
 0x718   : > { %1542 = vmax.xlane.f32.xlu0 %v1541_v56  ;;  %v1537_v58 = vpop.f32.mrb[26].mxu1 }
 0x719   : > { %v2442_v29 = vpop.f32.mrb[27].mxu1  ;;  %v1544_v30 = vsel %vm1311_vm1, %v1537_v58, -inf }
 0x71a   : > { %1545 = vmax.xlane.f32.xlu1 %v1544_v30 }
 0x7a5   : > { %v1543_v9 = vpop.xlane.xlu0 %1542 }
 0x7a6   : > { %v1547_v20 = vsub.f32 %v1534_v27, %v1543_v9 }
 0x7a7   : > { %v1546_v23 = vpop.xlane.xlu1 %1545 }
 0x7a8   : > { %v1549_v45 = vmul.f32 1.442695, %v1547_v20  ;;  %v1548_v46 = vsub.f32 %v1537_v58, %v1546_v23 }
 0x7aa   : > { %2781 = vpow2.f32 %v1549_v45  ;;  %v1551_v47 = vmul.f32 1.442695, %v1548_v46 }
 0x7ac   : > { %2783 = vpow2.f32 %v1551_v47 }
 0x7b4   : > { %v2782_v48 = vpop.eup %2781 }
 0x7b5   : > { %v1553_v49 = vsel %vm1311_vm1, %v2782_v48, 0.0 }
 0x7b6   : > { %v2784_v50 = vpop.eup %2783  ;;  %1554 = vadd.xlane.f32.xlu0 %v1553_v49 }
 0x7b7   : > { %v1556_v51 = vsel %vm1311_vm1, %v2784_v50, 0.0 }
 0x7b8   : > { %1557 = vadd.xlane.f32.xlu1 %v1556_v51 }
 0x7e7   : > { %v1960_v52 = vpop.f32.mrb[16].mxu0 }
 0x7e8   : > { %1979 = vst [vmem:[%s3650_s26] sm:$0xff] %v1960_v52  ;;  %v1962_v53 = vpop.f32.mrb[17].mxu0 }
 0x7e9   : > { %1980 = vst [vmem:[%s3650_s26 + $0x8] sm:$0xff] %v1962_v53  ;;  %v1964_v60 = vpop.f32.mrb[18].mxu0 }
 0x7ea   : > { %1981 = vst [vmem:[%s3650_s26 + $0x10] sm:$0xff] %v1964_v60  ;;  %v1966_v61 = vpop.f32.mrb[19].mxu0 }
 0x7eb   : > { %1982 = vst [vmem:[%s3650_s26 + $0x18] sm:$0xff] %v1966_v61 }
 0x843   : > { %v1555_v62 = vpop.xlane.xlu0 %1554 }
 0x844   : > { %2785 = vrcp.f32 %v1555_v62 }
 0x845   : > { %v1558_v63 = vpop.xlane.xlu1 %1557 }
 0x846   : > { %2787 = vrcp.f32 %v1558_v63 }
 0x84e   : > { %v2786_v0 = vpop.eup %2785 }
 0x84f   : > { %v1563_v1 = vmul.f32 %v2786_v0, %v2782_v48 }
 0x850   : > { %v2788_v2 = vpop.eup %2787 }
 0x851   : > { %2339 = vst.msk [vmem:[%s3584_s11 + $0x20] sm:$0xff] %vm1311_vm1, %v1563_v1  ;;  %v1564_v3 = vmul.f32 %v2788_v2, %v2784_v50 }
 0x853   : > { %2340 = vst.msk [vmem:[%s3584_s11 + $0x28] sm:$0xff] %vm1311_vm1, %v1564_v3  ;;  %v1568_v4 = vpack.c.bf16 %v1564_v3, %v1563_v1 }
 0x855   : > { %2446 = vmatmul.mubr.msk.bf16.vlgmr.msra.gmra.mrb[28].mxu1 %vm1311_vm1, %v1568_v4 }
 0x856   : > { %2450 = vmatpush3.bf16.xpose.msra.mxu1 %v1020_v40  ;;  %2451 = vmatprep.mubr.msk.bf16.mxu1 %vm3123_vm0, %v3122_v18 }
 0x857   : > { %2455 = vmatprep.subr.bf16.mxu1 %v3122_v18 }
 0x85d   : > { %2452 = vmatmul.mubr.bf16.vlgmr.msra.gmra.mrb[32].mxu1 %v771_v59 }
 0x85e   : > { %2456 = vmatpush3.bf16.msra.mxu1 %v1269_v44  ;;  %2457 = vmatprep.mubr.msk.bf16.mxu1 %vm3123_vm0, %v3122_v18 }
 0x928   : > { %v1606_v5 = vpop.f32.mrb[28].mxu1 }
 0x929   : > { %v2447_v6 = vpop.f32.mrb[29].mxu1 }
 0x92a   : > { %v1609_v7 = vpop.f32.mrb[30].mxu1 }
 0x92b   : > { %v1613_v8 = vpack.c.bf16 %v1609_v7, %v1606_v5  ;;  %v2448_v10 = vpop.f32.mrb[31].mxu1 }
 0x930   : > { %v1649_v36 = vpop.f32.mrb[32].mxu1 }
 0x931   : > { %v2453_v39 = vpop.f32.mrb[33].mxu1  ;;  %v1656_v40 = vsel %vm1311_vm1, %v1649_v36, -inf }
 0x932   : > { %1657 = vmax.xlane.f32.xlu0 %v1656_v40  ;;  %v1652_v25 = vpop.f32.mrb[34].mxu1 }
 0x933   : > { %v2454_v11 = vpop.f32.mrb[35].mxu1  ;;  %v1659_v12 = vsel %vm1311_vm1, %v1652_v25, -inf }
 0x934   : > { %1660 = vmax.xlane.f32.xlu1 %v1659_v12 }
 0x9bf   : > { %v1658_v55 = vpop.xlane.xlu0 %1657 }
 0x9c0   : > { %v1662_v57 = vsub.f32 %v1649_v36, %v1658_v55 }
 0x9c1   : > { %v1661_v59 = vpop.xlane.xlu1 %1660 }
 0x9c2   : > { %v1664_v28 = vmul.f32 1.442695, %v1662_v57  ;;  %v1663_v18 = vsub.f32 %v1652_v25, %v1661_v59 }
 0x9c4   : > { %2789 = vpow2.f32 %v1664_v28  ;;  %v1666_v32 = vmul.f32 1.442695, %v1663_v18 }
 0x9c6   : > { %2791 = vpow2.f32 %v1666_v32 }
 0x9ce   : > { %v2790_v34 = vpop.eup %2789 }
 0x9cf   : > { %v1668_v13 = vsel %vm1311_vm1, %v2790_v34, 0.0 }
 0x9d0   : > { %v2792_v14 = vpop.eup %2791  ;;  %1669 = vadd.xlane.f32.xlu0 %v1668_v13 }
 0x9d1   : > { %v1671_v15 = vsel %vm1311_vm1, %v2792_v14, 0.0 }
 0x9d2   : > { %1672 = vadd.xlane.f32.xlu1 %v1671_v15 }
 0xa5d   : > { %v1670_v16 = vpop.xlane.xlu0 %1669 }
 0xa5e   : > { %2793 = vrcp.f32 %v1670_v16 }
 0xa5f   : > { %v1673_v17 = vpop.xlane.xlu1 %1672 }
 0xa60   : > { %2795 = vrcp.f32 %v1673_v17 }
 0xa68   : > { %v2794_v19 = vpop.eup %2793 }
 0xa69   : > { %v1678_v21 = vmul.f32 %v2794_v19, %v2790_v34 }
 0xa6a   : > { %v2796_v22 = vpop.eup %2795 }
 0xa6b   : > { %2342 = vst.msk [vmem:[%s3584_s11 + $0x30] sm:$0xff] %vm1311_vm1, %v1678_v21  ;;  %v1679_v24 = vmul.f32 %v2796_v22, %v2792_v14 }
 0xa6d   : > { %2343 = vst.msk [vmem:[%s3584_s11 + $0x38] sm:$0xff] %vm1311_vm1, %v1679_v24  ;;  %v1683_v26 = vpack.c.bf16 %v1679_v24, %v1678_v21 }
 0xa6f   : > { %2458 = vmatmul.mubr.msk.bf16.vlgmr.msra.gmra.mrb[36].mxu1 %vm1311_vm1, %v1683_v26 }
 0xb42   : > { %v1721_v35 = vpop.f32.mrb[36].mxu1 }
 0xb43   : > { %v2459_v37 = vpop.f32.mrb[37].mxu1 }
 0xb44   : > { %v1724_v38 = vpop.f32.mrb[38].mxu1 }
 0xb45   : > { %v1728_v27 = vpack.c.bf16 %v1724_v38, %v1721_v35  ;;  %v2460_v54 = vpop.f32.mrb[39].mxu1 }
 0xb47   : > { %1968 = vmatprep.mubr.bf16.mxu0 %v1728_v27 }
 0xb48   : > { %1969 = vmatmul.mubr.bf16.gmra.mrb[20].mxu0 %v1613_v8 }
 0xb49   : > { %3012 = shalt.err (!%p3009_p12)
}
 0xb4a   : > { %s3013_s8 = scalar_lea.hbm %s3687_s30, 1024  ;;  %s3017_s15 = scalar_lea.hbm %s3846_s7, 2048 }
 0xb4b   : > { %p3014_p8 = scmp.ne.s32.totalorder %s3687_s30, %s3013_s8  ;;  %p3018_p1 = scmp.lt.u32.totalorder %s3687_s30, %s3846_s7 }
 0xb4c   : > { %p3019_p6 = scmp.lt.u32.totalorder %s3017_s15, %s3013_s8  ;;  %p3021_p5 = scmp.lt.u32.totalorder %s3013_s8, %s3687_s30 }
 0xb4d   : > { %p3015_p10 = pnand %p3014_p8, %p3847_p2 }
 0xb4e   : > { %p3020_p3 = por %p3019_p6, %p3018_p1 }
 0xb4f   : > { %p3016_p0 = pneg %p3015_p10 }
 0xb50   : > { %p3022_p4 = por %p3021_p5, %p3020_p3 }
 0xb52   : > { %p3023_p11 = pnand %p3022_p4, %p3016_p0 }
 0xb54   : > { %3026 = shalt.err (!%p3023_p11)
}
 0xb55   : > { %s3125_s13 = smov 128   ;;  %s3126_s25 = smov 8  }
 0xb56   : > { %2484 = dma.vmem_to_hbm [thread:$0]  (%p3847_p2), %s3690_s1, 1024, %s3687_s30, %s1993_s27, %s3125_s13, %s3125_s13, %s3126_s25  }
 0xb57   : > { %s2007_s16 = sshll.u32 %s3650_s26, 4  ;;  %s3848_s22 = sld [smem:[#allocation32_spill]]  ;;  %s3717_s16 = int_to_ptr.vmem [resolvable:$true] %s2007_s16 }
 0xb58   : > { %s1988_s30 = scalar_lea.sflag [#allocation5], %s3484_s19  ;;  %s3027_s1 = scalar_lea.vmem %s3717_s16, 1024 }
 0xb59   : > { %p3028_p13 = scmp.ne.s32.totalorder %s3717_s16, %s3027_s1  ;;  %s3127_s27 = smov [#allocation15]  }
 0xb5a   : > { %s3031_s10 = sshll.u32 %s3127_s27, 4  ;;  %s3032_s10 = int_to_ptr.vmem [resolvable:$false] %s3031_s10 }
 0xb5b   : > { %p3029_p7 = pnand %p3028_p13, %p3847_p2  ;;  %s3033_s9 = scalar_lea.vmem %s3032_s10, 2048 }
 0xb5c   : > { %p3034_p12 = scmp.lt.s32.totalorder %s3717_s16, %s3032_s10  ;;  %p3035_p8 = scmp.lt.s32.totalorder %s3033_s9, %s3027_s1 }
 0xb5d   : > { %s3725_s12 = scalar_lea.hbm %s3848_s22, %s2394_s14  ;;  %p3030_p9 = pneg %p3029_p7 }
 0xb5e   : > { %p3036_p10 = por %p3035_p8, %p3034_p12 }
 0xb60   : > { %p3037_p0 = pnand %p3036_p10, %p3030_p9 }
 0xc1b   : > { %v1970_v56 = vpop.f32.mrb[20].mxu0 }
 0xc1c   : > { %1983 = vst [vmem:[%s3650_s26 + $0x20] sm:$0xff] %v1970_v56  ;;  %v1972_v58 = vpop.f32.mrb[21].mxu0 }
 0xc1d   : > { %1984 = vst [vmem:[%s3650_s26 + $0x28] sm:$0xff] %v1972_v58  ;;  %v1974_v29 = vpop.f32.mrb[22].mxu0 }
 0xc1e   : > { %1985 = vst [vmem:[%s3650_s26 + $0x30] sm:$0xff] %v1974_v29  ;;  %v1976_v30 = vpop.f32.mrb[23].mxu0 }
 0xc1f   : > { %1986 = vst [vmem:[%s3650_s26 + $0x38] sm:$0xff] %v1976_v30 }
 0xc20   : > { %3040 = shalt.err (!%p3037_p0)
}
 0xc21   : > { %s3041_s26 = scalar_lea.hbm %s3725_s12, 1024  ;;  %s3045_s3 = scalar_lea.hbm %s3848_s22, 2048 }
 0xc22   : > { %p3042_p1 = scmp.ne.s32.totalorder %s3725_s12, %s3041_s26  ;;  %p3046_p5 = scmp.lt.u32.totalorder %s3725_s12, %s3848_s22 }
 0xc23   : > { %p3047_p4 = scmp.lt.u32.totalorder %s3045_s3, %s3041_s26  ;;  %p3049_p13 = scmp.lt.u32.totalorder %s3041_s26, %s3725_s12 }
 0xc24   : > { %p3043_p6 = pnand %p3042_p1, %p3847_p2 }
 0xc25   : > { %p3048_p11 = por %p3047_p4, %p3046_p5 }
 0xc26   : > { %p3044_p3 = pneg %p3043_p6 }
 0xc27   : > { %p3050_p7 = por %p3049_p13, %p3048_p11 }
 0xc29   : > { %p3051_p9 = pnand %p3050_p7, %p3044_p3 }
 0xc2b   : > { %3054 = shalt.err (!%p3051_p9)
}
 0xc2c   : > { %s3128_s24 = smov 256   ;;  %s3129_s15 = smov 16  }
 0xc2d   : > { %2483 = dma.vmem_to_hbm [thread:$0]  (%p3847_p2), %s3717_s16, 1024, %s3725_s12, %s1988_s30, %s3128_s24, %s3128_s24, %s3129_s15  }
 0xc2e PF: > { %s3849_s17 = sld [smem:[#allocation24_spill]]  ;;  %s3850_s5 = sld [smem:[#allocation26_spill]] }
 0xc2f   : > { %s3851_s13 = sld [smem:[#allocation25_spill]] }
 0xc34   : > { %s2039_s25 = sand.u32 1, %s3849_s17   ;;  %p3852_p12 = scmp.ne.s32.totalorder %s3850_s5, 0 }
 0xc35   : > { %p3853_p8 = scmp.ge.s32.totalorder %s3851_s13, 2  ;;  %s2040_s11 = scalar_lea.sflag [#allocation5], %s2039_s25 }
 0xc37   : > { %p2511_p10 = pnand %p3853_p8, %p3852_p12 }
 0xc39   : > { %3088 = dma.done.wait (!%p2511_p10), %s2040_s11, 1024  }
 0xc3a   : > { %3090 = vsyncadd (!%p2511_p10), %s2040_s11, 4294966272  ;;  %s2049_s21 = scalar_lea.sflag [#allocation17], %s2039_s25 }
 0xc3b   : > { %3092 = dma.done.wait (!%p2511_p10), %s2049_s21, 1024  }
 0xc3c   : > { %3094 = vsyncadd (!%p2511_p10), %s2049_s21, 4294966272  ;;  %s3854_s30 = sld [smem:[#allocation27_spill]]  ;;  %s3855_s23 = sld [smem:[#allocation28_spill]] }
 0xc3d   : > { %s3856_s27 = smov %s3101_s28  ;;  %s3857_s28 = smov %s3105_s29 }
 0xc42   : > { %p30_p2 = scmp.ge.s32.totalorder %s3854_s30, 4   ;;  %s3858_s29 = smov %s3855_s23 }
 0xc44   :  { %32 = sbr.rel (!%p30_p2) target bundleno = 17 (0x11), region = 153 }
 0xc4b   :  { %2054 = vsyncpa [#allocation4], 1 }
 0xc4c   :  { %2056 = vsyncpa [#allocation4 + $0x1], 1 }
 0xc4d   :  { %2057 = vsyncpa [#allocation7], 1 }
 0xc4e   :  { %2059 = vsyncpa [#allocation7 + $0x1], 1 }
 0xc4f   :  { %2060 = vsyncpa [#allocation10], 1 }
 0xc50   :  { %2061 = vsyncpa [#allocation13], 1 }
 0xc51   :  { %2062 = vsyncpa [#allocation5], 1 }
 0xc52   :  { %2064 = vsyncpa [#allocation5 + $0x1], 1 }
 0xc53   :  { %2065 = vsyncpa [#allocation17], 1 }
 0xc54   :  { %2067 = vsyncpa [#allocation17 + $0x1], 1 }

</bundles_post_ra>
